<compile_context>
chip_gen: v6e
topology: v6e:2x2x1
jax: 0.10.0
libtpu: 0.0.40
codegen_flags: <defaults>
</compile_context>

<pallas_src>
import jax
import jax.numpy as jnp
from jax import lax
from jax.experimental import pallas as pl
from jax.experimental.pallas import tpu as pltpu

_SMALL_TOTAL = 64 * 1024   # below this, kernel launch + final reduce dominate


def _cdiv(a: int, b: int) -> int:
    return -(-a // b)


def _round_up(x: int, m: int) -> int:
    return _cdiv(x, m) * m


def _device_params():
    """(vmem_capacity_bytes, tensorcore_count) with conservative fallbacks."""
    vmem_cap = None
    n_cores = 1
    try:
        info = pltpu.get_tpu_info()
        vmem_cap = getattr(info, "vmem_capacity_bytes", None)
        for name in ("num_tensorcores", "tensor_core_count", "tensorcore_count",
                     "num_cores", "core_count"):
            v = getattr(info, name, None)
            if isinstance(v, int) and v > 0:
                n_cores = v
                break
    except Exception:
        pass
    if not isinstance(vmem_cap, int) or vmem_cap <= 0:
        vmem_cap = 64 * 1024 * 1024          # assume the smallest (v7x) VMEM
    return vmem_cap, n_cores


def _jsd_dense(p: jax.Array, q: jax.Array) -> jax.Array:
    """Pure-XLA path (exact module math). Used for small inputs and as reference."""
    d = p.shape[-1]
    p2 = p.reshape(-1, d).astype(jnp.float32)
    q2 = q.reshape(-1, d).astype(jnp.float32)
    n = p2.shape[0]
    log_m = jnp.log(0.5 * (p2 + q2))
    kl_pm = jnp.sum(p2 * (jnp.log(p2) - log_m))
    kl_qm = jnp.sum(q2 * (jnp.log(q2) - log_m))
    return 0.5 * (kl_pm + kl_qm) / n


def _make_jsd_kernel(tm: int, steps: int, blocks_total: int, rows: int,
                     needs_mask: bool):
    def kernel(p_ref, q_ref, o_ref):
        c = pl.program_id(0)
        i = pl.program_id(1)

        @pl.when(i == 0)
        def _init():
            o_ref[...] = jnp.zeros_like(o_ref)

        p = p_ref[...].astype(jnp.float32)
        q = q_ref[...].astype(jnp.float32)

        def accumulate(pv, qv):
            # Exactly 3 EUP log pushes per element pair (compute ceiling).
            # Note: p == 0 gives 0*log(0) = NaN, same as the PyTorch reference.
            log_m = jnp.log(0.5 * (pv + qv))
            term = pv * (jnp.log(pv) - log_m) + qv * (jnp.log(qv) - log_m)
            r, w = term.shape
            # VPU-only partial reduction preserving (sublane, lane) vreg
            # structure; final cross-lane/sublane reduce happens outside.
            o_ref[...] += jnp.sum(term.reshape(r // 8, 8, w), axis=0)

        if needs_mask:
            block_idx = c * steps + i
            is_edge = block_idx >= blocks_total - 1

            @pl.when(is_edge)
            def _edge_block():
                # Rewrite p and q to 1.0 BEFORE the logs: out-of-bounds or
                # duplicated rows then contribute exactly 0 (log 1 = log_m = 0)
                # and log(garbage) can never poison the accumulator.
                row_ids = block_idx * tm + lax.broadcasted_iota(jnp.int32, p.shape, 0)
                valid = row_ids < rows
                accumulate(jnp.where(valid, p, 1.0), jnp.where(valid, q, 1.0))

            @pl.when(block_idx < blocks_total - 1)
            def _interior_block():
                accumulate(p, q)
        else:
            accumulate(p, q)

    return kernel


def jsd(p: jax.Array, q: jax.Array, *, max_tile_bytes: int | None = None) -> jax.Array:
    """Jensen-Shannon divergence matching the PyTorch JSD module (forward)."""
    assert p.shape == q.shape, (p.shape, q.shape)
    d = p.shape[-1]
    total = p.size
    rows = total // d                      # batchmean divisor (rows of view(-1, D))

    if total < _SMALL_TOTAL:
        return _jsd_dense(p, q)            # launch overhead dominates at this size

    # Collapse leading dims only (layout-free); never touch the lane dimension.
    p2 = p.reshape(rows, d)
    q2 = q.reshape(rows, d)
    d_pad = _round_up(d, 128)              # lane-padded width for VMEM budgeting

    # Generation-aware tile / VMEM sizing.
    vmem_cap, n_cores = _device_params()
    if vmem_cap >= 96 * 1024 * 1024:       # v5e / v6e class (128 MiB physical VMEM)
        tile_bytes = 8 * 1024 * 1024
        vmem_limit = 96 * 1024 * 1024
    else:                                  # v7x class (64 MiB physical VMEM)
        tile_bytes = 4 * 1024 * 1024
        vmem_limit = 48 * 1024 * 1024
    if max_tile_bytes is not None:
        tile_bytes = max_tile_bytes

    tm = max(8, (tile_bytes // (4 * d_pad)) // 8 * 8)
    tm = min(tm, _round_up(rows, 8))
    blocks_total = _cdiv(rows, tm)

    # Leading parallel axis: split the reduction across TensorCores if possible.
    if n_cores == 2 and blocks_total >= 2:
        grid_cores, sem0 = 2, pltpu.CORE_PARALLEL
    elif blocks_total >= 2:
        grid_cores, sem0 = 2, pltpu.PARALLEL
    else:
        grid_cores, sem0 = 1, pltpu.PARALLEL
    steps = _cdiv(blocks_total, grid_cores)
    needs_mask = (rows % tm != 0) or (grid_cores * steps != blocks_total)

    # Clamp so no block index points fully outside the array; duplicated /
    # partial blocks are zeroed by the in-kernel mask.
    last_block = blocks_total - 1

    def in_map(c, i):
        return (jnp.minimum(c * steps + i, last_block), 0)

    in_itemsize = jnp.dtype(p.dtype).itemsize
    # Headroom for huge-D edge cases where a single (8, D) block exceeds the
    # generation default (f32 intermediates counted conservatively).
    vmem_limit = max(vmem_limit, 6 * tm * d_pad * max(in_itemsize, 4) + (8 << 20))

    kernel = _make_jsd_kernel(tm, steps, blocks_total, rows, needs_mask)
    parts = pl.pallas_call(
        kernel,
        out_shape=jax.ShapeDtypeStruct((grid_cores, 8, d), jnp.float32),
        grid=(grid_cores, steps),
        in_specs=[pl.BlockSpec((tm, d), in_map),
                  pl.BlockSpec((tm, d), in_map)],
        out_specs=pl.BlockSpec((None, 8, d), lambda c, i: (c, 0, 0)),
        compiler_params=pltpu.CompilerParams(
            dimension_semantics=(sem0, pltpu.ARBITRARY),
            vmem_limit_bytes=vmem_limit,
        ),
    )(p2, q2)

    # Final reduction of the tiny (cores, 8, D) partial-sum slab + batchmean + 0.5.
    return jnp.sum(parts) * (0.5 / rows)


if __name__ == "__main__":
    key = jax.random.PRNGKey(0)
    k1, k2, k3, k4, k5, k6, k7, k8 = jax.random.split(key, 8)

    def check(p, q, rtol, atol=1e-6, **kw):
        out = jax.block_until_ready(jsd(p, q, **kw))
        ref = _jsd_dense(p, q)
        assert jnp.allclose(out, ref, rtol=rtol, atol=atol), (out, ref)

    # Case 1: small shape matching the module's use (batch=2, seq=8, hidden=32).
    # Inputs are probability distributions over the last axis. Fast (XLA) path.
    p1 = jax.nn.softmax(jax.random.normal(k1, (2, 8, 32), jnp.float32), axis=-1)
    q1 = jax.nn.softmax(jax.random.normal(k2, (2, 8, 32), jnp.float32), axis=-1)
    check(p1, q1, rtol=1e-4)

    # Case 2: 128-aligned last dim -> Pallas path, single full block.
    p2 = jax.nn.softmax(jax.random.normal(k3, (16, 8, 1024), jnp.float32), axis=-1)
    q2 = jax.nn.softmax(jax.random.normal(k4, (16, 8, 1024), jnp.float32), axis=-1)
    check(p2, q2, rtol=1e-3)

    # Case 3: forced small tiles -> multi-block accumulation, 2-way core axis,
    # and a partial last block exercising the in-kernel tail mask.
    p3 = jax.nn.softmax(jax.random.normal(k5, (2, 300, 1024), jnp.float32), axis=-1)
    q3 = jax.nn.softmax(jax.random.normal(k6, (2, 300, 1024), jnp.float32), axis=-1)
    check(p3, q3, rtol=1e-3, max_tile_bytes=640 * 1024)

    # Case 4: bf16 inputs -> native-dtype streaming with in-kernel f32 cast.
    p4 = jax.nn.softmax(jax.random.normal(k7, (8, 128, 512), jnp.float32), axis=-1).astype(jnp.bfloat16)
    q4 = jax.nn.softmax(jax.random.normal(k8, (8, 128, 512), jnp.float32), axis=-1).astype(jnp.bfloat16)
    check(p4, q4, rtol=1e-3)

    print("KERNEL_OK")
</pallas_src>

<mosaic_0001>
module attributes {stable_mosaic.version = 11 : i64} {
  func.func @kernel(%arg0: i32, %arg1: i32, %arg2: memref<128x1024xf32, #tpu.memory_space<vmem>>, %arg3: memref<128x1024xf32, #tpu.memory_space<vmem>>, %arg4: memref<1x8x1024xf32, #tpu.memory_space<vmem>>) attributes {dimension_semantics = [#tpu.dimension_semantics<parallel>, #tpu.dimension_semantics<arbitrary>], iteration_bounds = array<i64: 1, 1>, scalar_prefetch = 0 : i64, scratch_operands = 0 : i64, tpu.core_type = #tpu.core_type<tc>, window_params = [{transform_indices = @transform_0, window_bounds = array<i64: 128, 1024>}, {transform_indices = @transform_1, window_bounds = array<i64: 128, 1024>}, {transform_indices = @transform_2, window_bounds = array<i64: 1, 8, 1024>}]} {
    %c0_i32 = arith.constant 0 : i32
    %0 = arith.cmpi eq, %arg1, %c0_i32 : i32
    %1 = arith.extui %0 : i1 to i32
    %c0_i32_0 = arith.constant 0 : i32
    %2 = arith.cmpi ne, %1, %c0_i32_0 : i32
    scf.if %2 {
      %cst_11 = arith.constant 0.000000e+00 : f32
      %24 = vector.broadcast %cst_11 : f32 to vector<8x1024xf32>
      %c0_12 = arith.constant 0 : index
      %c0_13 = arith.constant 0 : index
      %c0_14 = arith.constant 0 : index
      %25 = vector.load %arg4[%c0_12, %c0_13, %c0_14] : memref<1x8x1024xf32, #tpu.memory_space<vmem>>, vector<1x8x1024xf32>
      %26 = vector.shape_cast %25 : vector<1x8x1024xf32> to vector<8x1024xf32>
      %27 = vector.shape_cast %24 : vector<8x1024xf32> to vector<1x8x1024xf32>
      tpu.vector_store %arg4[%c0_12, %c0_13, %c0_14], %27 {strides = array<i32>} : memref<1x8x1024xf32, #tpu.memory_space<vmem>>, vector<1x8x1024xf32>,
    } else {
    }
    %c0 = arith.constant 0 : index
    %c0_1 = arith.constant 0 : index
    %3 = vector.load %arg2[%c0, %c0_1] : memref<128x1024xf32, #tpu.memory_space<vmem>>, vector<128x1024xf32>
    %c0_2 = arith.constant 0 : index
    %c0_3 = arith.constant 0 : index
    %4 = vector.load %arg3[%c0_2, %c0_3] : memref<128x1024xf32, #tpu.memory_space<vmem>>, vector<128x1024xf32>
    %5 = arith.addf %3, %4 : vector<128x1024xf32>
    %cst = arith.constant 5.000000e-01 : f32
    %6 = vector.broadcast %cst : f32 to vector<128x1024xf32>
    %7 = arith.mulf %6, %5 : vector<128x1024xf32>
    %8 = math.log %7 : vector<128x1024xf32>
    %9 = math.log %3 : vector<128x1024xf32>
    %10 = arith.subf %9, %8 : vector<128x1024xf32>
    %11 = arith.mulf %3, %10 : vector<128x1024xf32>
    %12 = math.log %4 : vector<128x1024xf32>
    %13 = arith.subf %12, %8 : vector<128x1024xf32>
    %14 = arith.mulf %4, %13 : vector<128x1024xf32>
    %15 = arith.addf %11, %14 : vector<128x1024xf32>
    %c0_4 = arith.constant 0 : index
    %c0_5 = arith.constant 0 : index
    %c0_6 = arith.constant 0 : index
    %16 = vector.load %arg4[%c0_4, %c0_5, %c0_6] : memref<1x8x1024xf32, #tpu.memory_space<vmem>>, vector<1x8x1024xf32>
    %17 = vector.shape_cast %16 : vector<1x8x1024xf32> to vector<8x1024xf32>
    %18 = vector.shape_cast %15 : vector<128x1024xf32> to vector<16x8x1024xf32>
    %cst_7 = arith.constant dense<0.000000e+00> : vector<8x1024xf32>
    %19 = vector.multi_reduction <add>, %18, %cst_7 [0] : vector<16x8x1024xf32> to vector<8x1024xf32>
    %20 = arith.addf %17, %19 : vector<8x1024xf32>
    %c0_8 = arith.constant 0 : index
    %c0_9 = arith.constant 0 : index
    %c0_10 = arith.constant 0 : index
    %21 = vector.load %arg4[%c0_8, %c0_9, %c0_10] : memref<1x8x1024xf32, #tpu.memory_space<vmem>>, vector<1x8x1024xf32>
    %22 = vector.shape_cast %21 : vector<1x8x1024xf32> to vector<8x1024xf32>
    %23 = vector.shape_cast %20 : vector<8x1024xf32> to vector<1x8x1024xf32>
    tpu.vector_store %arg4[%c0_8, %c0_9, %c0_10], %23 {strides = array<i32>} : memref<1x8x1024xf32, #tpu.memory_space<vmem>>, vector<1x8x1024xf32>,
    return
  }
  func.func @transform_0(%arg0: i32, %arg1: i32) -> (i32, i32) {
    %c1_i32 = arith.constant 1 : i32
    %0 = arith.muli %arg0, %c1_i32 : i32
    %1 = arith.addi %0, %arg1 : i32
    %c0_i32 = arith.constant 0 : i32
    %2 = arith.minsi %1, %c0_i32 : i32
    %c0_i32_0 = arith.constant 0 : i32
    %c0_i32_1 = arith.constant 0 : i32
    return %2, %c0_i32_0 : i32, i32
  }
  func.func @transform_1(%arg0: i32, %arg1: i32) -> (i32, i32) {
    %c1_i32 = arith.constant 1 : i32
    %0 = arith.muli %arg0, %c1_i32 : i32
    %1 = arith.addi %0, %arg1 : i32
    %c0_i32 = arith.constant 0 : i32
    %2 = arith.minsi %1, %c0_i32 : i32
    %c0_i32_0 = arith.constant 0 : i32
    %c0_i32_1 = arith.constant 0 : i32
    return %2, %c0_i32_0 : i32, i32
  }
  func.func @transform_2(%arg0: i32, %arg1: i32) -> (i32, i32, i32) {
    %c0_i32 = arith.constant 0 : i32
    %c0_i32_0 = arith.constant 0 : i32
    %c0_i32_1 = arith.constant 0 : i32
    return %arg0, %c0_i32, %c0_i32_0 : i32, i32, i32
  }
}

</mosaic_0001>

<bundles_post_ra>
// kernel: tpu_custom_call.1
= control target key start
LH: loop header
LB: loop body
LE: loop exit
PB: predicated region body
PF: predicated region fallthrough
CT: control target
= control target key end

     0   :  { %7 = vsyncpa [#allocation3], 0  ;;  %s6529_s0 = inlined_call_operand.hbm [shape: f32[128,1024], index: 0, kind: input, shape index: {}]   ;;  %s6530_s1 = inlined_call_operand.hbm [shape: f32[128,1024], index: 1, kind: input, shape index: {}]   ;;  %s6531_s2 = inlined_call_operand.hbm [shape: f32[1,8,1024], index: 2, kind: output, shape index: {}]  }
   0x1   :  { %8 = vsyncpa [#allocation6], 0 }
   0x2   :  { %9 = vsyncpa [#allocation4], 0  ;;  %s3254_s9 = smov [#allocation2]  }
   0x3   :  { %s22_s10 = sshll.u32 %s3254_s9, 4  ;;  %s23_s10 = int_to_ptr.vmem [resolvable:$true] %s22_s10 }
   0x4   :  { %s3196_s11 = scalar_lea.vmem %s23_s10, 16384  ;;  %p3201_p1 = scmp.lt.s32.totalorder %s23_s10, %s23_s10 }
   0x5   :  { %p3197_p0 = scmp.ne.s32.totalorder %s23_s10, %s3196_s11  ;;  %p3202_p2 = scmp.lt.s32.totalorder %s3196_s11, %s3196_s11 }
   0x7   :  { %p3203_p3 = por %p3202_p2, %p3201_p1 }
   0x9   :  { %p3204_p4 = pnand %p3203_p3, %p3197_p0 }
   0xb   :  { %3207 = shalt.err (!%p3204_p4)
}
   0xc   :  { %s3255_s12 = smov 1024   ;;  %s3256_s13 = smov 64  }
   0xd   :  { %28 = dma.hbm_to_vmem [thread:$0]  %s6529_s0, 16384, %s23_s10, [#allocation3], %s3255_s12, %s3255_s12, %s3256_s13  }
   0xe   :  { %s3257_s16 = smov [#allocation5]  }
   0xf   :  { %s41_s17 = sshll.u32 %s3257_s16, 4  ;;  %s42_s17 = int_to_ptr.vmem [resolvable:$true] %s41_s17 }
  0x10   :  { %s3216_s18 = scalar_lea.vmem %s42_s17, 16384  ;;  %p3221_p6 = scmp.lt.s32.totalorder %s42_s17, %s42_s17 }
  0x11   :  { %p3217_p5 = scmp.ne.s32.totalorder %s42_s17, %s3216_s18  ;;  %p3222_p7 = scmp.lt.s32.totalorder %s3216_s18, %s3216_s18 }
  0x13   :  { %p3223_p8 = por %p3222_p7, %p3221_p6 }
  0x15   :  { %p3224_p9 = pnand %p3223_p8, %p3217_p5 }
  0x17   :  { %3227 = shalt.err (!%p3224_p9)
}
  0x18   :  { %47 = dma.hbm_to_vmem [thread:$0]  %s6530_s1, 16384, %s42_s17, [#allocation6], %s3255_s12, %s3255_s12, %s3256_s13  }
  0x19   :  { %3248 = dma.done.wait [#allocation3], 16384  }
  0x1a   :  { %3249 = vsyncadd [#allocation3], 4294950912 }
  0x1b   :  { %3250 = dma.done.wait [#allocation6], 16384  }
  0x1c   :  { %3251 = vsyncadd [#allocation6], 4294950912  ;;  %v74_v0 = vld [vmem:[#allocation2] sm:$0xff]  ;;  %v75_v2 = vld [vmem:[#allocation2 + $0x8] sm:$0xff]  ;;  %s3258_s0 = smov [#allocation7]  }
  0x1d   :  { %v202_v1 = vld [vmem:[#allocation5] sm:$0xff]  ;;  %v203_v3 = vld [vmem:[#allocation5 + $0x8] sm:$0xff]  ;;  %v76_v4 = vld [vmem:[#allocation2 + $0x10] sm:$0xff]  ;;  %s2144_s1 = sshll.u32 %s3258_s0, 4  ;;  %s2145_s1 = int_to_ptr.vmem [resolvable:$true] %s2144_s1 }
  0x1e   :  { %v204_v5 = vld [vmem:[#allocation5 + $0x10] sm:$0xff]  ;;  %v77_v6 = vld [vmem:[#allocation2 + $0x18] sm:$0xff]  ;;  %v330_v8 = vadd.f32 %v202_v1, %v74_v0  ;;  %v78_v9 = vld [vmem:[#allocation2 + $0x20] sm:$0xff]  ;;  %v331_v11 = vadd.f32 %v203_v3, %v75_v2  ;;  %s3228_s21 = scalar_lea.vmem %s2145_s1, 1024  ;;  %p3233_p11 = scmp.lt.s32.totalorder %s2145_s1, %s2145_s1 }
  0x1f   :  { %v205_v7 = vld [vmem:[#allocation5 + $0x18] sm:$0xff]  ;;  %v206_v10 = vld [vmem:[#allocation5 + $0x20] sm:$0xff]  ;;  %v79_v12 = vld [vmem:[#allocation2 + $0x28] sm:$0xff]  ;;  %v332_v14 = vadd.f32 %v204_v5, %v76_v4  ;;  %p3229_p10 = scmp.ne.s32.totalorder %s2145_s1, %s3228_s21  ;;  %p3234_p12 = scmp.lt.s32.totalorder %s3228_s21, %s3228_s21 }
  0x20   :  { %v207_v13 = vld [vmem:[#allocation5 + $0x28] sm:$0xff]  ;;  %v80_v15 = vld [vmem:[#allocation2 + $0x30] sm:$0xff]  ;;  %v333_v17 = vadd.f32 %v205_v7, %v77_v6  ;;  %v81_v18 = vld [vmem:[#allocation2 + $0x38] sm:$0xff]  ;;  %v334_v20 = vadd.f32 %v206_v10, %v78_v9  ;;  %v458_v21 = vmul.f32 0.5, %v330_v8  ;;  %v459_v25 = vmul.f32 0.5, %v331_v11 }
  0x21   :  { %v208_v16 = vld [vmem:[#allocation5 + $0x30] sm:$0xff]  ;;  %v209_v19 = vld [vmem:[#allocation5 + $0x38] sm:$0xff]  ;;  %v82_v22 = vld [vmem:[#allocation2 + $0x40] sm:$0xff]  ;;  %v335_v24 = vadd.f32 %v207_v13, %v79_v12  ;;  %v460_v29 = vmul.f32 0.5, %v332_v14  ;;  %p3235_p13 = por %p3234_p12, %p3233_p11 }
  0x22   :  { %v210_v23 = vld [vmem:[#allocation5 + $0x40] sm:$0xff]  ;;  %v83_v26 = vld [vmem:[#allocation2 + $0x48] sm:$0xff]  ;;  %v336_v28 = vadd.f32 %v208_v16, %v80_v15  ;;  %v84_v30 = vld [vmem:[#allocation2 + $0x50] sm:$0xff]  ;;  %v337_v32 = vadd.f32 %v209_v19, %v81_v18  ;;  %v461_v33 = vmul.f32 0.5, %v333_v17  ;;  %v462_v37 = vmul.f32 0.5, %v334_v20 }
  0x23   :  { %v211_v27 = vld [vmem:[#allocation5 + $0x48] sm:$0xff]  ;;  %v212_v31 = vld [vmem:[#allocation5 + $0x50] sm:$0xff]  ;;  %v85_v34 = vld [vmem:[#allocation2 + $0x58] sm:$0xff]  ;;  %v338_v36 = vadd.f32 %v210_v23, %v82_v22  ;;  %2164 = vlog2.f32 %v458_v21  ;;  %v463_v41 = vmul.f32 0.5, %v335_v24  ;;  %p3236_p0 = pnand %p3235_p13, %p3229_p10 }
  0x24   :  { %v213_v35 = vld [vmem:[#allocation5 + $0x58] sm:$0xff]  ;;  %v86_v38 = vld [vmem:[#allocation2 + $0x60] sm:$0xff]  ;;  %v339_v40 = vadd.f32 %v211_v27, %v83_v26  ;;  %2166 = vlog2.f32 %v459_v25  ;;  %v87_v42 = vld [vmem:[#allocation2 + $0x68] sm:$0xff]  ;;  %v340_v44 = vadd.f32 %v212_v31, %v84_v30  ;;  %v464_v45 = vmul.f32 0.5, %v336_v28 }
  0x25   :  { %v214_v39 = vld [vmem:[#allocation5 + $0x60] sm:$0xff]  ;;  %v215_v43 = vld [vmem:[#allocation5 + $0x68] sm:$0xff]  ;;  %2168 = vlog2.f32 %v460_v29  ;;  %v88_v46 = vld [vmem:[#allocation2 + $0x70] sm:$0xff]  ;;  %v341_v48 = vadd.f32 %v213_v35, %v85_v34  ;;  %v465_v49 = vmul.f32 0.5, %v337_v32  ;;  %v466_v53 = vmul.f32 0.5, %v338_v36 }
  0x26   :  { %v216_v47 = vld [vmem:[#allocation5 + $0x70] sm:$0xff]  ;;  %2170 = vlog2.f32 %v461_v33  ;;  %v89_v50 = vld [vmem:[#allocation2 + $0x78] sm:$0xff]  ;;  %v342_v52 = vadd.f32 %v214_v39, %v86_v38  ;;  %v90_v54 = vld [vmem:[#allocation2 + $0x80] sm:$0xff]  ;;  %v343_v56 = vadd.f32 %v215_v43, %v87_v42  ;;  %v467_v57 = vmul.f32 0.5, %v339_v40 }
  0x27   :  { %v217_v51 = vld [vmem:[#allocation5 + $0x78] sm:$0xff]  ;;  %2172 = vlog2.f32 %v462_v37  ;;  %v218_v55 = vld [vmem:[#allocation5 + $0x80] sm:$0xff]  ;;  %v91_v58 = vld [vmem:[#allocation2 + $0x88] sm:$0xff]  ;;  %v344_v60 = vadd.f32 %v216_v47, %v88_v46  ;;  %v468_v61 = vmul.f32 0.5, %v340_v44  ;;  %v469_v1 = vmul.f32 0.5, %v341_v48 }
  0x28   :  { %2174 = vlog2.f32 %v463_v41  ;;  %v219_v59 = vld [vmem:[#allocation5 + $0x88] sm:$0xff]  ;;  %v92_v62 = vld [vmem:[#allocation2 + $0x90] sm:$0xff]  ;;  %v345_v0 = vadd.f32 %v217_v51, %v89_v50  ;;  %v93_v2 = vld [vmem:[#allocation2 + $0x98] sm:$0xff]  ;;  %v346_v4 = vadd.f32 %v218_v55, %v90_v54  ;;  %v470_v5 = vmul.f32 0.5, %v342_v52 }
  0x29   :  { %2176 = vlog2.f32 %v464_v45  ;;  %v220_v63 = vld [vmem:[#allocation5 + $0x90] sm:$0xff]  ;;  %v221_v3 = vld [vmem:[#allocation5 + $0x98] sm:$0xff]  ;;  %v94_v6 = vld [vmem:[#allocation2 + $0xa0] sm:$0xff]  ;;  %v347_v8 = vadd.f32 %v219_v59, %v91_v58  ;;  %v471_v9 = vmul.f32 0.5, %v343_v56  ;;  %v472_v13 = vmul.f32 0.5, %v344_v60 }
  0x2a   :  { %2178 = vlog2.f32 %v465_v49  ;;  %v222_v7 = vld [vmem:[#allocation5 + $0xa0] sm:$0xff]  ;;  %v95_v10 = vld [vmem:[#allocation2 + $0xa8] sm:$0xff]  ;;  %v348_v12 = vadd.f32 %v220_v63, %v92_v62  ;;  %v96_v14 = vld [vmem:[#allocation2 + $0xb0] sm:$0xff]  ;;  %v349_v16 = vadd.f32 %v221_v3, %v93_v2  ;;  %v473_v17 = vmul.f32 0.5, %v345_v0 }
  0x2b   :  { %2180 = vlog2.f32 %v466_v53  ;;  %v223_v11 = vld [vmem:[#allocation5 + $0xa8] sm:$0xff]  ;;  %v224_v15 = vld [vmem:[#allocation5 + $0xb0] sm:$0xff]  ;;  %v97_v18 = vld [vmem:[#allocation2 + $0xb8] sm:$0xff]  ;;  %v350_v20 = vadd.f32 %v222_v7, %v94_v6  ;;  %v474_v21 = vmul.f32 0.5, %v346_v4  ;;  %v475_v26 = vmul.f32 0.5, %v347_v8 }
  0x2c   :  { %2182 = vlog2.f32 %v467_v57  ;;  %v225_v19 = vld [vmem:[#allocation5 + $0xb8] sm:$0xff]  ;;  %v98_v23 = vld [vmem:[#allocation2 + $0xc0] sm:$0xff]  ;;  %v351_v25 = vadd.f32 %v223_v11, %v95_v10  ;;  %v99_v28 = vld [vmem:[#allocation2 + $0xc8] sm:$0xff]  ;;  %v352_v30 = vadd.f32 %v224_v15, %v96_v14  ;;  %v476_v31 = vmul.f32 0.5, %v348_v12 }
  0x2d   :  { %2184 = vlog2.f32 %v468_v61  ;;  %v226_v24 = vld [vmem:[#allocation5 + $0xc0] sm:$0xff]  ;;  %v227_v29 = vld [vmem:[#allocation5 + $0xc8] sm:$0xff]  ;;  %v100_v33 = vld [vmem:[#allocation2 + $0xd0] sm:$0xff]  ;;  %v353_v35 = vadd.f32 %v225_v19, %v97_v18  ;;  %v477_v36 = vmul.f32 0.5, %v349_v16  ;;  %v478_v41 = vmul.f32 0.5, %v350_v20 }
  0x2e   :  { %2186 = vlog2.f32 %v469_v1  ;;  %v228_v34 = vld [vmem:[#allocation5 + $0xd0] sm:$0xff]  ;;  %v101_v38 = vld [vmem:[#allocation2 + $0xd8] sm:$0xff]  ;;  %v354_v40 = vadd.f32 %v226_v24, %v98_v23  ;;  %v102_v43 = vld [vmem:[#allocation2 + $0xe0] sm:$0xff]  ;;  %v355_v45 = vadd.f32 %v227_v29, %v99_v28  ;;  %v479_v46 = vmul.f32 0.5, %v351_v25 }
  0x2f   :  { %2188 = vlog2.f32 %v470_v5  ;;  %v229_v39 = vld [vmem:[#allocation5 + $0xd8] sm:$0xff]  ;;  %v230_v44 = vld [vmem:[#allocation5 + $0xe0] sm:$0xff]  ;;  %v103_v48 = vld [vmem:[#allocation2 + $0xe8] sm:$0xff]  ;;  %v356_v50 = vadd.f32 %v228_v34, %v100_v33  ;;  %v480_v51 = vmul.f32 0.5, %v352_v30  ;;  %v481_v56 = vmul.f32 0.5, %v353_v35 }
  0x30   :  { %v3280_v22 = vpop.eup %2164  ;;  %2190 = vlog2.f32 %v471_v9  ;;  %v231_v49 = vld [vmem:[#allocation5 + $0xe8] sm:$0xff]  ;;  %v104_v53 = vld [vmem:[#allocation2 + $0xf0] sm:$0xff]  ;;  %v357_v55 = vadd.f32 %v229_v39, %v101_v38  ;;  %v105_v58 = vld [vmem:[#allocation2 + $0xf8] sm:$0xff]  ;;  %v358_v60 = vadd.f32 %v230_v44, %v102_v43  ;;  %v482_v61 = vmul.f32 0.5, %v354_v40 }
  0x31   :  { %v3282_v27 = vpop.eup %2166  ;;  %2192 = vlog2.f32 %v472_v13  ;;  %v232_v54 = vld [vmem:[#allocation5 + $0xf0] sm:$0xff]  ;;  %v233_v59 = vld [vmem:[#allocation5 + $0xf8] sm:$0xff]  ;;  %v106_v63 = vld [vmem:[#allocation2 + $0x100] sm:$0xff]  ;;  %v359_v1 = vadd.f32 %v231_v49, %v103_v48  ;;  %v483_v2 = vmul.f32 0.5, %v355_v45  ;;  %v484_v7 = vmul.f32 0.5, %v356_v50 }
  0x32   :  { %v3284_v32 = vpop.eup %2168  ;;  %2194 = vlog2.f32 %v473_v17  ;;  %v234_v0 = vld [vmem:[#allocation5 + $0x100] sm:$0xff]  ;;  %v107_v4 = vld [vmem:[#allocation2 + $0x108] sm:$0xff]  ;;  %v360_v6 = vadd.f32 %v232_v54, %v104_v53  ;;  %v108_v9 = vld [vmem:[#allocation2 + $0x110] sm:$0xff]  ;;  %v361_v11 = vadd.f32 %v233_v59, %v105_v58  ;;  %v485_v12 = vmul.f32 0.5, %v357_v55 }
  0x33   :  { %v3286_v37 = vpop.eup %2170  ;;  %2196 = vlog2.f32 %v474_v21  ;;  %v235_v5 = vld [vmem:[#allocation5 + $0x108] sm:$0xff]  ;;  %v236_v10 = vld [vmem:[#allocation5 + $0x110] sm:$0xff]  ;;  %v109_v14 = vld [vmem:[#allocation2 + $0x118] sm:$0xff]  ;;  %v362_v16 = vadd.f32 %v234_v0, %v106_v63  ;;  %v486_v17 = vmul.f32 0.5, %v358_v60  ;;  %v487_v23 = vmul.f32 0.5, %v359_v1 }
  0x34   :  { %6644 = vst [vmem:[#allocation11_spill] sm:$0xff] %v3286_v37  ;;  %v3288_v42 = vpop.eup %2172  ;;  %2198 = vlog2.f32 %v475_v26  ;;  %v237_v15 = vld [vmem:[#allocation5 + $0x118] sm:$0xff]  ;;  %v110_v19 = vld [vmem:[#allocation2 + $0x120] sm:$0xff]  ;;  %v363_v21 = vadd.f32 %v235_v5, %v107_v4  ;;  %v111_v25 = vld [vmem:[#allocation2 + $0x128] sm:$0xff]  ;;  %v364_v28 = vadd.f32 %v236_v10, %v108_v9  ;;  %v488_v29 = vmul.f32 0.5, %v360_v6 }
  0x35   :  { %6645 = vst [vmem:[#allocation12_spill] sm:$0xff] %v3288_v42  ;;  %v3290_v47 = vpop.eup %2174  ;;  %2200 = vlog2.f32 %v476_v31  ;;  %v238_v20 = vld [vmem:[#allocation5 + $0x120] sm:$0xff]  ;;  %v239_v26 = vld [vmem:[#allocation5 + $0x128] sm:$0xff]  ;;  %v112_v31 = vld [vmem:[#allocation2 + $0x130] sm:$0xff]  ;;  %v365_v34 = vadd.f32 %v237_v15, %v109_v14  ;;  %v489_v35 = vmul.f32 0.5, %v361_v11 }
  0x36   :  { %6646 = vst [vmem:[#allocation13_spill] sm:$0xff] %v3290_v47  ;;  %v3292_v52 = vpop.eup %2176  ;;  %2202 = vlog2.f32 %v477_v36  ;;  %v240_v33 = vld [vmem:[#allocation5 + $0x130] sm:$0xff]  ;;  %v113_v38 = vld [vmem:[#allocation2 + $0x138] sm:$0xff]  ;;  %v366_v40 = vadd.f32 %v238_v20, %v110_v19  ;;  %v114_v44 = vld [vmem:[#allocation2 + $0x140] sm:$0xff]  ;;  %v491_v48 = vmul.f32 0.5, %v363_v21  ;;  %v492_v54 = vmul.f32 0.5, %v364_v28 }
  0x37   :  { %6647 = vst [vmem:[#allocation14_spill] sm:$0xff] %v3292_v52  ;;  %v3294_v57 = vpop.eup %2178  ;;  %2204 = vlog2.f32 %v478_v41  ;;  %v241_v39 = vld [vmem:[#allocation5 + $0x138] sm:$0xff]  ;;  %v490_v41 = vmul.f32 0.5, %v362_v16  ;;  %v242_v45 = vld [vmem:[#allocation5 + $0x140] sm:$0xff]  ;;  %v115_v50 = vld [vmem:[#allocation2 + $0x148] sm:$0xff]  ;;  %v368_v53 = vadd.f32 %v240_v33, %v112_v31  ;;  %v493_v60 = vmul.f32 0.5, %v365_v34 }
  0x38   :  { %6648 = vst [vmem:[#allocation15_spill] sm:$0xff] %v3294_v57  ;;  %v3296_v62 = vpop.eup %2180  ;;  %2206 = vlog2.f32 %v479_v46  ;;  %v367_v46 = vadd.f32 %v239_v26, %v111_v25  ;;  %v244_v58 = vld [vmem:[#allocation5 + $0x150] sm:$0xff]  ;;  %v369_v59 = vadd.f32 %v241_v39, %v113_v38  ;;  %v117_v63 = vld [vmem:[#allocation2 + $0x158] sm:$0xff]  ;;  %v370_v1 = vadd.f32 %v242_v45, %v114_v44  ;;  %v118_v5 = vld [vmem:[#allocation2 + $0x160] sm:$0xff] }
  0x39   :  { %6649 = vst [vmem:[#allocation16_spill] sm:$0xff] %v3296_v62  ;;  %v3298_v3 = vpop.eup %2182  ;;  %2208 = vlog2.f32 %v480_v51  ;;  %v243_v51 = vld [vmem:[#allocation5 + $0x148] sm:$0xff]  ;;  %v245_v0 = vld [vmem:[#allocation5 + $0x158] sm:$0xff]  ;;  %v246_v6 = vld [vmem:[#allocation5 + $0x160] sm:$0xff]  ;;  %v496_v15 = vmul.f32 0.5, %v368_v53 }
  0x3a   :  { %6650 = vst [vmem:[#allocation17_spill] sm:$0xff] %v3298_v3  ;;  %v3300_v8 = vpop.eup %2184  ;;  %2210 = vlog2.f32 %v481_v56  ;;  %v116_v56 = vld [vmem:[#allocation2 + $0x150] sm:$0xff]  ;;  %v495_v9 = vmul.f32 0.5, %v367_v46  ;;  %v119_v11 = vld [vmem:[#allocation2 + $0x168] sm:$0xff]  ;;  %v373_v20 = vadd.f32 %v245_v0, %v117_v63  ;;  %v497_v21 = vmul.f32 0.5, %v369_v59  ;;  %v121_v25 = vld [vmem:[#allocation2 + $0x178] sm:$0xff] }
  0x3b   :  { %6651 = vst [vmem:[#allocation18_spill] sm:$0xff] %v3300_v8  ;;  %v3302_v13 = vpop.eup %2186  ;;  %2212 = vlog2.f32 %v482_v61  ;;  %v372_v14 = vadd.f32 %v244_v58, %v116_v56  ;;  %v248_v19 = vld [vmem:[#allocation5 + $0x170] sm:$0xff]  ;;  %v249_v26 = vld [vmem:[#allocation5 + $0x178] sm:$0xff]  ;;  %v374_v28 = vadd.f32 %v246_v6, %v118_v5  ;;  %v122_v33 = vld [vmem:[#allocation2 + $0x180] sm:$0xff] }
  0x3c   :  { %6652 = vst [vmem:[#allocation19_spill] sm:$0xff] %v3302_v13  ;;  %v3304_v18 = vpop.eup %2188  ;;  %2214 = vlog2.f32 %v483_v2  ;;  %v494_v2 = vmul.f32 0.5, %v366_v40  ;;  %v250_v34 = vld [vmem:[#allocation5 + $0x180] sm:$0xff]  ;;  %v123_v40 = vld [vmem:[#allocation2 + $0x188] sm:$0xff]  ;;  %v501_v53 = vmul.f32 0.5, %v373_v20  ;;  %v125_v56 = vld [vmem:[#allocation2 + $0x198] sm:$0xff] }
  0x3d   :  { %6653 = vst [vmem:[#allocation20_spill] sm:$0xff] %v3304_v18  ;;  %v3306_v24 = vpop.eup %2190  ;;  %2216 = vlog2.f32 %v484_v7  ;;  %v371_v7 = vadd.f32 %v243_v51, %v115_v50  ;;  %v500_v45 = vmul.f32 0.5, %v372_v14  ;;  %v252_v50 = vld [vmem:[#allocation5 + $0x190] sm:$0xff]  ;;  %v377_v51 = vadd.f32 %v249_v26, %v121_v25  ;;  %v253_v58 = vld [vmem:[#allocation5 + $0x198] sm:$0xff]  ;;  %v126_v0 = vld [vmem:[#allocation2 + $0x1a0] sm:$0xff] }
  0x3e   :  { %6654 = vst [vmem:[#allocation21_spill] sm:$0xff] %v3306_v24  ;;  %v3308_v30 = vpop.eup %2192  ;;  %2218 = vlog2.f32 %v485_v12  ;;  %v247_v12 = vld [vmem:[#allocation5 + $0x168] sm:$0xff]  ;;  %v378_v59 = vadd.f32 %v250_v34, %v122_v33  ;;  %v129_v25 = vld [vmem:[#allocation2 + $0x1b8] sm:$0xff]  ;;  %v130_v34 = vld [vmem:[#allocation2 + $0x1c0] sm:$0xff] }
  0x3f   :  { %6655 = vst [vmem:[#allocation22_spill] sm:$0xff] %v3308_v30  ;;  %v3310_v36 = vpop.eup %2194  ;;  %2220 = vlog2.f32 %v486_v17  ;;  %v120_v17 = vld [vmem:[#allocation2 + $0x170] sm:$0xff]  ;;  %v499_v38 = vmul.f32 0.5, %v371_v7  ;;  %v127_v7 = vld [vmem:[#allocation2 + $0x1a8] sm:$0xff]  ;;  %v505_v20 = vmul.f32 0.5, %v377_v51  ;;  %v257_v26 = vld [vmem:[#allocation5 + $0x1b8] sm:$0xff] }
  0x40   :  { %6656 = vst [vmem:[#allocation23_spill] sm:$0xff] %v3310_v36  ;;  %v3312_v43 = vpop.eup %2196  ;;  %2222 = vlog2.f32 %v487_v23  ;;  %v376_v44 = vadd.f32 %v248_v19, %v120_v17  ;;  %v256_v17 = vld [vmem:[#allocation5 + $0x1b0] sm:$0xff]  ;;  %v381_v19 = vadd.f32 %v253_v58, %v125_v56  ;;  %v385_v58 = vadd.f32 %v257_v26, %v129_v25  ;;  %v263_v25 = vld [vmem:[#allocation5 + $0x1e8] sm:$0xff] }
  0x41   :  { %6657 = vst [vmem:[#allocation24_spill] sm:$0xff] %v3312_v43  ;;  %v3314_v49 = vpop.eup %2198  ;;  %2224 = vlog2.f32 %v488_v29  ;;  %v498_v29 = vmul.f32 0.5, %v370_v1  ;;  %v254_v1 = vld [vmem:[#allocation5 + $0x1a0] sm:$0xff]  ;;  %v260_v56 = vld [vmem:[#allocation5 + $0x1d0] sm:$0xff] }
  0x42   :  { %6658 = vst [vmem:[#allocation25_spill] sm:$0xff] %v3314_v49  ;;  %v3316_v55 = vpop.eup %2200  ;;  %2226 = vlog2.f32 %v489_v35  ;;  %v375_v35 = vadd.f32 %v247_v12, %v119_v11  ;;  %v504_v12 = vmul.f32 0.5, %v376_v44  ;;  %v131_v44 = vld [vmem:[#allocation2 + $0x1c8] sm:$0xff] }
  0x43   :  { %6659 = vst [vmem:[#allocation26_spill] sm:$0xff] %v3316_v55  ;;  %v3318_v61 = vpop.eup %2202  ;;  %2228 = vlog2.f32 %v490_v41  ;;  %v251_v41 = vld [vmem:[#allocation5 + $0x188] sm:$0xff] }
  0x44   :  { %6660 = vst [vmem:[#allocation27_spill] sm:$0xff] %v3318_v61  ;;  %v3320_v4 = vpop.eup %2204  ;;  %2230 = vlog2.f32 %v491_v48  ;;  %v124_v48 = vld [vmem:[#allocation2 + $0x190] sm:$0xff]  ;;  %v503_v5 = vmul.f32 0.5, %v375_v35  ;;  %v258_v35 = vld [vmem:[#allocation5 + $0x1c0] sm:$0xff] }
  0x45   :  { %6661 = vst [vmem:[#allocation28_spill] sm:$0xff] %v3320_v4  ;;  %v3322_v10 = vpop.eup %2206  ;;  %2232 = vlog2.f32 %v492_v54  ;;  %v380_v11 = vadd.f32 %v252_v50, %v124_v48  ;;  %v281_v4 = vld [vmem:[#allocation5 + $0x278] sm:$0xff] }
  0x46   :  { %6662 = vst [vmem:[#allocation29_spill] sm:$0xff] %v3322_v10  ;;  %v3324_v16 = vpop.eup %2208  ;;  %2234 = vlog2.f32 %v493_v60  ;;  %v502_v60 = vmul.f32 0.5, %v374_v28  ;;  %v382_v28 = vadd.f32 %v254_v1, %v126_v0  ;;  %v133_v0 = vld [vmem:[#allocation2 + $0x1d8] sm:$0xff]  ;;  %v280_v10 = vld [vmem:[#allocation5 + $0x270] sm:$0xff] }
  0x47   :  { %6663 = vst [vmem:[#allocation30_spill] sm:$0xff] %v3324_v16  ;;  %v3326_v23 = vpop.eup %2210  ;;  %2236 = vlog2.f32 %v494_v2  ;;  %v379_v2 = vadd.f32 %v251_v41, %v123_v40  ;;  %v508_v50 = vmul.f32 0.5, %v380_v11  ;;  %v261_v1 = vld [vmem:[#allocation5 + $0x1d8] sm:$0xff] }
  0x48   :  { %6664 = vst [vmem:[#allocation31_spill] sm:$0xff] %v3326_v23  ;;  %v3328_v31 = vpop.eup %2212  ;;  %2238 = vlog2.f32 %v495_v9  ;;  %v255_v9 = vld [vmem:[#allocation5 + $0x1a8] sm:$0xff] }
  0x49   :  { %6665 = vst [vmem:[#allocation32_spill] sm:$0xff] %v3328_v31  ;;  %v3330_v39 = vpop.eup %2214  ;;  %2240 = vlog2.f32 %v496_v15  ;;  %v128_v15 = vld [vmem:[#allocation2 + $0x1b0] sm:$0xff]  ;;  %v507_v40 = vmul.f32 0.5, %v379_v2  ;;  %v386_v2 = vadd.f32 %v258_v35, %v130_v34  ;;  %v279_v23 = vld [vmem:[#allocation5 + $0x268] sm:$0xff] }
  0x4a   :  { %6666 = vst [vmem:[#allocation33_spill] sm:$0xff] %v3330_v39  ;;  %v3332_v46 = vpop.eup %2216  ;;  %2242 = vlog2.f32 %v497_v21  ;;  %v384_v48 = vadd.f32 %v256_v17, %v128_v15  ;;  %v262_v15 = vld [vmem:[#allocation5 + $0x1e0] sm:$0xff]  ;;  %v264_v34 = vld [vmem:[#allocation5 + $0x1f0] sm:$0xff] }
  0x4b   :  { %6667 = vst [vmem:[#allocation34_spill] sm:$0xff] %v3332_v46  ;;  %v3334_v54 = vpop.eup %2218  ;;  %2244 = vlog2.f32 %v498_v29  ;;  %v506_v29 = vmul.f32 0.5, %v378_v59  ;;  %v509_v59 = vmul.f32 0.5, %v381_v19 }
  0x4c   :  { %6668 = vst [vmem:[#allocation35_spill] sm:$0xff] %v3334_v54  ;;  %v3336_v63 = vpop.eup %2220  ;;  %2246 = vlog2.f32 %v499_v38  ;;  %v383_v38 = vadd.f32 %v255_v9, %v127_v7  ;;  %v134_v9 = vld [vmem:[#allocation2 + $0x1e0] sm:$0xff] }
  0x4d   :  { %6669 = vst [vmem:[#allocation36_spill] sm:$0xff] %v3336_v63  ;;  %v3338_v6 = vpop.eup %2222  ;;  %2248 = vlog2.f32 %v500_v45  ;;  %v259_v45 = vld [vmem:[#allocation5 + $0x1c8] sm:$0xff] }
  0x4e   :  { %6670 = vst [vmem:[#allocation37_spill] sm:$0xff] %v3338_v6  ;;  %v3340_v14 = vpop.eup %2224  ;;  %2250 = vlog2.f32 %v501_v53  ;;  %v132_v53 = vld [vmem:[#allocation2 + $0x1d0] sm:$0xff]  ;;  %v387_v11 = vadd.f32 %v259_v45, %v131_v44  ;;  %v265_v44 = vld [vmem:[#allocation5 + $0x1f8] sm:$0xff] }
  0x4f   :  { %6671 = vst [vmem:[#allocation38_spill] sm:$0xff] %v3340_v14  ;;  %v3342_v21 = vpop.eup %2226  ;;  %2252 = vlog2.f32 %v502_v60  ;;  %v388_v19 = vadd.f32 %v260_v56, %v132_v53  ;;  %v139_v53 = vld [vmem:[#allocation2 + $0x208] sm:$0xff] }
  0x50   :  { %6672 = vst [vmem:[#allocation39_spill] sm:$0xff] %v3342_v21  ;;  %v3344_v33 = vpop.eup %2228  ;;  %2254 = vlog2.f32 %v503_v5  ;;  %v510_v5 = vmul.f32 0.5, %v382_v28  ;;  %v389_v28 = vadd.f32 %v261_v1, %v133_v0  ;;  %v515_v56 = vmul.f32 0.5, %v387_v11  ;;  %v140_v0 = vld [vmem:[#allocation2 + $0x210] sm:$0xff]  ;;  %v145_v11 = vld [vmem:[#allocation2 + $0x238] sm:$0xff] }
  0x51   :  { %6673 = vst [vmem:[#allocation40_spill] sm:$0xff] %v3344_v33  ;;  %v3346_v41 = vpop.eup %2230  ;;  %2256 = vlog2.f32 %v504_v12  ;;  %v511_v12 = vmul.f32 0.5, %v383_v38  ;;  %v390_v38 = vadd.f32 %v262_v15, %v134_v9  ;;  %v268_v9 = vld [vmem:[#allocation5 + $0x210] sm:$0xff] }
  0x52   :  { %6674 = vst [vmem:[#allocation41_spill] sm:$0xff] %v3346_v41  ;;  %v3348_v51 = vpop.eup %2232  ;;  %2258 = vlog2.f32 %v505_v20  ;;  %v512_v20 = vmul.f32 0.5, %v384_v48  ;;  %v266_v48 = vld [vmem:[#allocation5 + $0x200] sm:$0xff]  ;;  %v396_v6 = vadd.f32 %v268_v9, %v140_v0  ;;  %v155_v9 = vld [vmem:[#allocation2 + $0x288] sm:$0xff] }
  0x53   :  { %6675 = vst [vmem:[#allocation42_spill] sm:$0xff] %v3348_v51  ;;  %v3350_v60 = vpop.eup %2234  ;;  %2260 = vlog2.f32 %v506_v29  ;;  %v135_v51 = vld [vmem:[#allocation2 + $0x1e8] sm:$0xff]  ;;  %v513_v29 = vmul.f32 0.5, %v385_v58  ;;  %v141_v58 = vld [vmem:[#allocation2 + $0x218] sm:$0xff] }
  0x54   :  { %6676 = vst [vmem:[#allocation43_spill] sm:$0xff] %v3350_v60  ;;  %v3352_v7 = vpop.eup %2236  ;;  %2262 = vlog2.f32 %v507_v40  ;;  %v136_v60 = vld [vmem:[#allocation2 + $0x1f0] sm:$0xff]  ;;  %v514_v40 = vmul.f32 0.5, %v386_v2  ;;  %v142_v2 = vld [vmem:[#allocation2 + $0x220] sm:$0xff] }
  0x55   :  { %6677 = vst [vmem:[#allocation44_spill] sm:$0xff] %v3352_v7  ;;  %v3354_v17 = vpop.eup %2238  ;;  %2264 = vlog2.f32 %v508_v50  ;;  %v137_v7 = vld [vmem:[#allocation2 + $0x1f8] sm:$0xff]  ;;  %v391_v50 = vadd.f32 %v263_v25, %v135_v51  ;;  %v392_v1 = vadd.f32 %v264_v34, %v136_v60  ;;  %v144_v51 = vld [vmem:[#allocation2 + $0x230] sm:$0xff]  ;;  %v146_v60 = vld [vmem:[#allocation2 + $0x240] sm:$0xff] }
  0x56   :  { %6678 = vst [vmem:[#allocation45_spill] sm:$0xff] %v3354_v17  ;;  %v3356_v26 = vpop.eup %2240  ;;  %2266 = vlog2.f32 %v509_v59  ;;  %v138_v17 = vld [vmem:[#allocation2 + $0x200] sm:$0xff]  ;;  %v267_v59 = vld [vmem:[#allocation5 + $0x208] sm:$0xff]  ;;  %v393_v15 = vadd.f32 %v265_v44, %v137_v7  ;;  %v272_v44 = vld [vmem:[#allocation5 + $0x230] sm:$0xff] }
  0x57   :  { %6679 = vst [vmem:[#allocation46_spill] sm:$0xff] %v3356_v26  ;;  %v3358_v35 = vpop.eup %2242  ;;  %2268 = vlog2.f32 %v510_v5  ;;  %v143_v5 = vld [vmem:[#allocation2 + $0x228] sm:$0xff]  ;;  %v394_v25 = vadd.f32 %v266_v48, %v138_v17  ;;  %v519_v14 = vmul.f32 0.5, %v391_v50  ;;  %v520_v63 = vmul.f32 0.5, %v392_v1  ;;  %v274_v48 = vld [vmem:[#allocation5 + $0x240] sm:$0xff]  ;;  %v152_v50 = vld [vmem:[#allocation2 + $0x270] sm:$0xff] }
  0x58   :  { %6680 = vst [vmem:[#allocation47_spill] sm:$0xff] %v3358_v35  ;;  %v3360_v45 = vpop.eup %2244  ;;  %2270 = vlog2.f32 %v511_v12  ;;  %v516_v35 = vmul.f32 0.5, %v388_v19  ;;  %v269_v12 = vld [vmem:[#allocation5 + $0x218] sm:$0xff]  ;;  %v147_v19 = vld [vmem:[#allocation2 + $0x248] sm:$0xff]  ;;  %v521_v46 = vmul.f32 0.5, %v393_v15  ;;  %v154_v1 = vld [vmem:[#allocation2 + $0x280] sm:$0xff]  ;;  %v400_v16 = vadd.f32 %v272_v44, %v144_v51 }
  0x59   :  { %6681 = vst [vmem:[#allocation48_spill] sm:$0xff] %v3360_v45  ;;  %v3362_v26 = vpop.eup %2246  ;;  %2272 = vlog2.f32 %v512_v20  ;;  %v517_v45 = vmul.f32 0.5, %v389_v28  ;;  %v270_v20 = vld [vmem:[#allocation5 + $0x220] sm:$0xff]  ;;  %v271_v34 = vld [vmem:[#allocation5 + $0x228] sm:$0xff]  ;;  %v148_v28 = vld [vmem:[#allocation2 + $0x250] sm:$0xff]  ;;  %v397_v54 = vadd.f32 %v269_v12, %v141_v58  ;;  %v522_v0 = vmul.f32 0.5, %v394_v25 }
  0x5a   :  { %6682 = vst [vmem:[#allocation49_spill] sm:$0xff] %v3362_v26  ;;  %v3364_v41 = vpop.eup %2248  ;;  %2274 = vlog2.f32 %v513_v29  ;;  %v518_v26 = vmul.f32 0.5, %v390_v38  ;;  %v149_v29 = vld [vmem:[#allocation2 + $0x258] sm:$0xff]  ;;  %v150_v38 = vld [vmem:[#allocation2 + $0x260] sm:$0xff]  ;;  %v398_v39 = vadd.f32 %v270_v20, %v142_v2  ;;  %v399_v31 = vadd.f32 %v271_v34, %v143_v5  ;;  %v156_v12 = vld [vmem:[#allocation2 + $0x290] sm:$0xff] }
  0x5b   :  { %6683 = vst [vmem:[#allocation50_spill] sm:$0xff] %v3364_v41  ;;  %v3366_v33 = vpop.eup %2250  ;;  %2276 = vlog2.f32 %v514_v40  ;;  %v395_v41 = vadd.f32 %v267_v59, %v139_v53  ;;  %v151_v40 = vld [vmem:[#allocation2 + $0x268] sm:$0xff]  ;;  %v276_v59 = vld [vmem:[#allocation5 + $0x250] sm:$0xff]  ;;  %v402_v2 = vadd.f32 %v274_v48, %v146_v60  ;;  %v158_v20 = vld [vmem:[#allocation2 + $0x2a0] sm:$0xff] }
  0x5c   :  { %6684 = vst [vmem:[#allocation51_spill] sm:$0xff] %v3366_v33  ;;  %v3368_v21 = vpop.eup %2252  ;;  %2278 = vlog2.f32 %v515_v56  ;;  %v273_v33 = vld [vmem:[#allocation5 + $0x238] sm:$0xff]  ;;  %v159_v34 = vld [vmem:[#allocation2 + $0x2a8] sm:$0xff]  ;;  %v160_v44 = vld [vmem:[#allocation2 + $0x2b0] sm:$0xff]  ;;  %v526_v48 = vmul.f32 0.5, %v398_v39 }
  0x5d   :  { %6685 = vst [vmem:[#allocation52_spill] sm:$0xff] %v3368_v21  ;;  %v3370_v7 = vpop.eup %2254  ;;  %2280 = vlog2.f32 %v516_v35  ;;  %v275_v21 = vld [vmem:[#allocation5 + $0x248] sm:$0xff]  ;;  %v153_v56 = vld [vmem:[#allocation2 + $0x278] sm:$0xff]  ;;  %v401_v58 = vadd.f32 %v273_v33, %v145_v11  ;;  %v523_v15 = vmul.f32 0.5, %v395_v41  ;;  %v3384_v33 = vadd.f32 %v276_v59, %v148_v28  ;;  %v162_v28 = vld [vmem:[#allocation2 + $0x2c0] sm:$0xff] }
  0x5e   :  { %6686 = vst [vmem:[#allocation53_spill] sm:$0xff] %v3370_v7  ;;  %v3372_v17 = vpop.eup %2256  ;;  %2282 = vlog2.f32 %v517_v45  ;;  %v277_v7 = vld [vmem:[#allocation5 + $0x258] sm:$0xff]  ;;  %v3380_v5 = vadd.f32 %v275_v21, %v147_v19  ;;  %v283_v51 = vld [vmem:[#allocation5 + $0x288] sm:$0xff]  ;;  %v525_v41 = vmul.f32 0.5, %v397_v54  ;;  %v284_v21 = vld [vmem:[#allocation5 + $0x290] sm:$0xff]  ;;  %v3396_v54 = vadd.f32 %v280_v10, %v152_v50 }
  0x5f   :  { %6687 = vst [vmem:[#allocation54_spill] sm:$0xff] %v3372_v17  ;;  %v3374_v53 = vpop.eup %2258  ;;  %2284 = vlog2.f32 %v518_v26  ;;  %v278_v17 = vld [vmem:[#allocation5 + $0x260] sm:$0xff]  ;;  %v524_v26 = vmul.f32 0.5, %v396_v6  ;;  %v161_v60 = vld [vmem:[#allocation2 + $0x2b8] sm:$0xff]  ;;  %v163_v59 = vld [vmem:[#allocation2 + $0x2c8] sm:$0xff] }
  0x60   :  { %6688 = vst [vmem:[#allocation55_spill] sm:$0xff] %v3374_v53  ;;  %v3376_v35 = vpop.eup %2260  ;;  %2286 = vlog2.f32 %v519_v14  ;;  %v157_v53 = vld [vmem:[#allocation2 + $0x298] sm:$0xff]  ;;  %v3386_v14 = vadd.f32 %v277_v7, %v149_v29  ;;  %v3390_v6 = vadd.f32 %v278_v17, %v150_v38  ;;  %v286_v7 = vld [vmem:[#allocation5 + $0x2a0] sm:$0xff]  ;;  %v287_v29 = vld [vmem:[#allocation5 + $0x2a8] sm:$0xff]  ;;  %v536_v18 = vmul.f32 0.5, %v3396_v54 }
  0x61   :  { %6689 = vst [vmem:[#allocation56_spill] sm:$0xff] %v3376_v35  ;;  %v3378_v45 = vpop.eup %2262  ;;  %2288 = vlog2.f32 %v520_v63  ;;  %v282_v35 = vld [vmem:[#allocation5 + $0x280] sm:$0xff]  ;;  %v285_v19 = vld [vmem:[#allocation5 + $0x298] sm:$0xff]  ;;  %v3392_v63 = vadd.f32 %v279_v23, %v151_v40  ;;  %v164_v17 = vld [vmem:[#allocation2 + $0x2d0] sm:$0xff] }
  0x62   :  { %6690 = vst [vmem:[#allocation57_spill] sm:$0xff] %v3378_v45  ;;  %v3382_v25 = vpop.eup %2264  ;;  %2290 = vlog2.f32 %v521_v46  ;;  %v3398_v46 = vadd.f32 %v281_v4, %v153_v56  ;;  %v165_v38 = vld [vmem:[#allocation2 + $0x2d8] sm:$0xff]  ;;  %v288_v23 = vld [vmem:[#allocation5 + $0x2b0] sm:$0xff]  ;;  %v3402_v39 = vadd.f32 %v282_v35, %v154_v1  ;;  %v166_v10 = vld [vmem:[#allocation2 + $0x2e0] sm:$0xff]  ;;  %v533_v36 = vmul.f32 0.5, %v3386_v14 }
  0x63   :  { %6691 = vst [vmem:[#allocation58_spill] sm:$0xff] %v3382_v25  ;;  %v3388_v11 = vpop.eup %2266  ;;  %2292 = vlog2.f32 %v522_v0  ;;  %v289_v40 = vld [vmem:[#allocation5 + $0x2b8] sm:$0xff]  ;;  %v3404_v0 = vadd.f32 %v283_v51, %v155_v9  ;;  %v167_v50 = vld [vmem:[#allocation2 + $0x2e8] sm:$0xff]  ;;  %v290_v4 = vld [vmem:[#allocation5 + $0x2c0] sm:$0xff]  ;;  %v534_v30 = vmul.f32 0.5, %v3390_v6  ;;  %v535_v24 = vmul.f32 0.5, %v3392_v63 }
  0x64   :  { %6692 = vst [vmem:[#allocation59_spill] sm:$0xff] %v3388_v11  ;;  %v3394_v25 = vpop.eup %2268  ;;  %v527_v11 = vmul.f32 0.5, %v399_v31  ;;  %2294 = vlog2.f32 %v523_v15  ;;  %v291_v56 = vld [vmem:[#allocation5 + $0x2c8] sm:$0xff]  ;;  %v3408_v31 = vadd.f32 %v284_v21, %v156_v12  ;;  %v3410_v15 = vadd.f32 %v285_v19, %v157_v53  ;;  %v168_v35 = vld [vmem:[#allocation2 + $0x2f0] sm:$0xff]  ;;  %v169_v1 = vld [vmem:[#allocation2 + $0x2f8] sm:$0xff] }
  0x65   :  { %6693 = vst [vmem:[#allocation60_spill] sm:$0xff] %v3394_v25  ;;  %v3400_v45 = vpop.eup %2270  ;;  %v528_v25 = vmul.f32 0.5, %v400_v16  ;;  %2296 = vlog2.f32 %v524_v26  ;;  %v292_v9 = vld [vmem:[#allocation5 + $0x2d0] sm:$0xff]  ;;  %v293_v51 = vld [vmem:[#allocation5 + $0x2d8] sm:$0xff]  ;;  %v3414_v16 = vadd.f32 %v286_v7, %v158_v20  ;;  %v3416_v26 = vadd.f32 %v287_v29, %v159_v34  ;;  %v170_v12 = vld [vmem:[#allocation2 + $0x300] sm:$0xff] }
  0x66   :  { %6694 = vst [vmem:[#allocation61_spill] sm:$0xff] %v3400_v45  ;;  %v3406_v61 = vpop.eup %2272  ;;  %v529_v45 = vmul.f32 0.5, %v401_v58  ;;  %2298 = vlog2.f32 %v525_v41  ;;  %v171_v21 = vld [vmem:[#allocation2 + $0x308] sm:$0xff]  ;;  %v294_v53 = vld [vmem:[#allocation5 + $0x2e0] sm:$0xff]  ;;  %v3420_v58 = vadd.f32 %v288_v23, %v160_v44  ;;  %v3422_v41 = vadd.f32 %v289_v40, %v161_v60  ;;  %v172_v20 = vld [vmem:[#allocation2 + $0x310] sm:$0xff] }
  0x67   :  { %6695 = vst [vmem:[#allocation62_spill] sm:$0xff] %v3406_v61  ;;  %v3412_v55 = vpop.eup %2274  ;;  %v530_v61 = vmul.f32 0.5, %v402_v2  ;;  %2300 = vlog2.f32 %v526_v48  ;;  %v295_v19 = vld [vmem:[#allocation5 + $0x2e8] sm:$0xff]  ;;  %v173_v34 = vld [vmem:[#allocation2 + $0x318] sm:$0xff]  ;;  %v296_v7 = vld [vmem:[#allocation5 + $0x2f0] sm:$0xff]  ;;  %v3427_v48 = vadd.f32 %v290_v4, %v162_v28  ;;  %v3429_v29 = vadd.f32 %v291_v56, %v163_v59 }
  0x68   :  { %6696 = vst [vmem:[#allocation63_spill] sm:$0xff] %v3412_v55  ;;  %v3418_v49 = vpop.eup %2276  ;;  %v531_v55 = vmul.f32 0.5, %v3380_v5  ;;  %2302 = vlog2.f32 %v527_v11  ;;  %v297_v2 = vld [vmem:[#allocation5 + $0x2f8] sm:$0xff]  ;;  %v174_v60 = vld [vmem:[#allocation2 + $0x320] sm:$0xff]  ;;  %v175_v23 = vld [vmem:[#allocation2 + $0x328] sm:$0xff]  ;;  %v3434_v11 = vadd.f32 %v292_v9, %v164_v17  ;;  %v537_v13 = vmul.f32 0.5, %v3398_v46 }
  0x69   :  { %6697 = vst [vmem:[#allocation64_spill] sm:$0xff] %v3418_v49  ;;  %v3425_v43 = vpop.eup %2278  ;;  %v532_v49 = vmul.f32 0.5, %v3384_v33  ;;  %2304 = vlog2.f32 %v528_v25  ;;  %v298_v40 = vld [vmem:[#allocation5 + $0x300] sm:$0xff]  ;;  %v299_v5 = vld [vmem:[#allocation5 + $0x308] sm:$0xff]  ;;  %v176_v59 = vld [vmem:[#allocation2 + $0x330] sm:$0xff]  ;;  %v3441_v25 = vadd.f32 %v294_v53, %v166_v10  ;;  %v538_v8 = vmul.f32 0.5, %v3402_v39 }
  0x6a   :  { %6698 = vst [vmem:[#allocation65_spill] sm:$0xff] %v3425_v43  ;;  %v3432_v44 = vpop.eup %2280  ;;  %v3436_v43 = vadd.f32 %v293_v51, %v165_v38  ;;  %2306 = vlog2.f32 %v529_v45  ;;  %v177_v4 = vld [vmem:[#allocation2 + $0x338] sm:$0xff]  ;;  %v300_v56 = vld [vmem:[#allocation5 + $0x310] sm:$0xff]  ;;  %v178_v38 = vld [vmem:[#allocation2 + $0x340] sm:$0xff]  ;;  %v3448_v45 = vadd.f32 %v296_v7, %v168_v35  ;;  %v539_v3 = vmul.f32 0.5, %v3404_v0 }
  0x6b   :  { %6699 = vst [vmem:[#allocation66_spill] sm:$0xff] %v3432_v44  ;;  %v3439_v28 = vpop.eup %2282  ;;  %v301_v33 = vld [vmem:[#allocation5 + $0x318] sm:$0xff]  ;;  %v3443_v44 = vadd.f32 %v295_v19, %v167_v50  ;;  %2308 = vlog2.f32 %v530_v61  ;;  %v179_v9 = vld [vmem:[#allocation2 + $0x348] sm:$0xff]  ;;  %v302_v51 = vld [vmem:[#allocation5 + $0x320] sm:$0xff]  ;;  %v3455_v61 = vadd.f32 %v298_v40, %v170_v12  ;;  %v540_v62 = vmul.f32 0.5, %v3408_v31 }
  0x6c   :  { %6700 = vst [vmem:[#allocation67_spill] sm:$0xff] %v3439_v28  ;;  %v3446_v17 = vpop.eup %2284  ;;  %v303_v14 = vld [vmem:[#allocation5 + $0x328] sm:$0xff]  ;;  %v3450_v28 = vadd.f32 %v297_v2, %v169_v1  ;;  %2310 = vlog2.f32 %v531_v55  ;;  %v180_v50 = vld [vmem:[#allocation2 + $0x350] sm:$0xff]  ;;  %v181_v53 = vld [vmem:[#allocation2 + $0x358] sm:$0xff]  ;;  %v3462_v55 = vadd.f32 %v300_v56, %v172_v20  ;;  %v541_v57 = vmul.f32 0.5, %v3410_v15 }
  0x6d   :  { %6701 = vst [vmem:[#allocation68_spill] sm:$0xff] %v3446_v17  ;;  %v3453_v10 = vpop.eup %2286  ;;  %v304_v19 = vld [vmem:[#allocation5 + $0x330] sm:$0xff]  ;;  %v305_v6 = vld [vmem:[#allocation5 + $0x338] sm:$0xff]  ;;  %v3457_v17 = vadd.f32 %v299_v5, %v171_v21  ;;  %2312 = vlog2.f32 %v532_v49  ;;  %v182_v1 = vld [vmem:[#allocation2 + $0x360] sm:$0xff]  ;;  %v3469_v49 = vadd.f32 %v302_v51, %v174_v60  ;;  %v542_v52 = vmul.f32 0.5, %v3414_v16 }
  0x6e   :  { %6702 = vst [vmem:[#allocation69_spill] sm:$0xff] %v3453_v10  ;;  %v3460_v35 = vpop.eup %2288  ;;  %v183_v7 = vld [vmem:[#allocation2 + $0x368] sm:$0xff]  ;;  %v306_v2 = vld [vmem:[#allocation5 + $0x340] sm:$0xff]  ;;  %v3464_v10 = vadd.f32 %v301_v33, %v173_v34  ;;  %2314 = vlog2.f32 %v533_v36  ;;  %v184_v21 = vld [vmem:[#allocation2 + $0x370] sm:$0xff]  ;;  %v3476_v36 = vadd.f32 %v304_v19, %v176_v59  ;;  %v543_v47 = vmul.f32 0.5, %v3416_v26 }
  0x6f   :  { %6703 = vst [vmem:[#allocation70_spill] sm:$0xff] %v3460_v35  ;;  %v307_v63 = vld [vmem:[#allocation5 + $0x348] sm:$0xff]  ;;  %v3467_v12 = vpop.eup %2290  ;;  %v185_v40 = vld [vmem:[#allocation2 + $0x378] sm:$0xff]  ;;  %v308_v5 = vld [vmem:[#allocation5 + $0x350] sm:$0xff]  ;;  %v3471_v35 = vadd.f32 %v303_v14, %v175_v23  ;;  %2316 = vlog2.f32 %v534_v30  ;;  %v3483_v30 = vadd.f32 %v306_v2, %v178_v38  ;;  %v544_v42 = vmul.f32 0.5, %v3420_v58 }
  0x70   :  { %6704 = vst [vmem:[#allocation71_spill] sm:$0xff] %v3467_v12  ;;  %v309_v54 = vld [vmem:[#allocation5 + $0x358] sm:$0xff]  ;;  %v3474_v20 = vpop.eup %2292  ;;  %v186_v34 = vld [vmem:[#allocation2 + $0x380] sm:$0xff]  ;;  %v187_v56 = vld [vmem:[#allocation2 + $0x388] sm:$0xff]  ;;  %v3478_v12 = vadd.f32 %v305_v6, %v177_v4  ;;  %2318 = vlog2.f32 %v535_v24  ;;  %v3490_v24 = vadd.f32 %v308_v5, %v180_v50  ;;  %v546_v58 = vmul.f32 0.5, %v3427_v48 }
  0x71   :  { %6705 = vst [vmem:[#allocation72_spill] sm:$0xff] %v3474_v20  ;;  %v310_v33 = vld [vmem:[#allocation5 + $0x360] sm:$0xff]  ;;  %v311_v46 = vld [vmem:[#allocation5 + $0x368] sm:$0xff]  ;;  %v3481_v60 = vpop.eup %2294  ;;  %v188_v23 = vld [vmem:[#allocation2 + $0x390] sm:$0xff]  ;;  %v3485_v20 = vadd.f32 %v307_v63, %v179_v9  ;;  %2320 = vlog2.f32 %v536_v18 }
  0x72   :  { %6706 = vst [vmem:[#allocation73_spill] sm:$0xff] %v3481_v60  ;;  %v189_v51 = vld [vmem:[#allocation2 + $0x398] sm:$0xff]  ;;  %v312_v14 = vld [vmem:[#allocation5 + $0x370] sm:$0xff]  ;;  %v3488_v59 = vpop.eup %2296  ;;  %v190_v4 = vld [vmem:[#allocation2 + $0x3a0] sm:$0xff]  ;;  %v3492_v60 = vadd.f32 %v309_v54, %v181_v53  ;;  %2322 = vlog2.f32 %v537_v13  ;;  %v3497_v18 = vadd.f32 %v310_v33, %v182_v1 }
  0x73   :  { %v313_v39 = vld [vmem:[#allocation5 + $0x378] sm:$0xff]  ;;  %6707 = vst [vmem:[#allocation74_spill] sm:$0xff] %v3488_v59  ;;  %v191_v19 = vld [vmem:[#allocation2 + $0x3a8] sm:$0xff]  ;;  %v314_v6 = vld [vmem:[#allocation5 + $0x380] sm:$0xff]  ;;  %v3495_v38 = vpop.eup %2298  ;;  %v3499_v59 = vadd.f32 %v311_v46, %v183_v7  ;;  %2324 = vlog2.f32 %v538_v8  ;;  %v3504_v13 = vadd.f32 %v312_v14, %v184_v21 }
  0x74   :  { %v315_v0 = vld [vmem:[#allocation5 + $0x388] sm:$0xff]  ;;  %6708 = vst [vmem:[#allocation75_spill] sm:$0xff] %v3495_v38  ;;  %v192_v9 = vld [vmem:[#allocation2 + $0x3b0] sm:$0xff]  ;;  %v193_v2 = vld [vmem:[#allocation2 + $0x3b8] sm:$0xff]  ;;  %v3502_v50 = vpop.eup %2300  ;;  %v3506_v38 = vadd.f32 %v313_v39, %v185_v40  ;;  %2326 = vlog2.f32 %v539_v3  ;;  %v3511_v8 = vadd.f32 %v314_v6, %v186_v34 }
  0x75   :  { %v316_v63 = vld [vmem:[#allocation5 + $0x390] sm:$0xff]  ;;  %v317_v31 = vld [vmem:[#allocation5 + $0x398] sm:$0xff]  ;;  %6709 = vst [vmem:[#allocation76_spill] sm:$0xff] %v3502_v50  ;;  %v194_v53 = vld [vmem:[#allocation2 + $0x3c0] sm:$0xff]  ;;  %v3509_v1 = vpop.eup %2302  ;;  %v3513_v50 = vadd.f32 %v315_v0, %v187_v56  ;;  %2328 = vlog2.f32 %v540_v62 }
  0x76   :  { %v195_v5 = vld [vmem:[#allocation2 + $0x3c8] sm:$0xff]  ;;  %v318_v54 = vld [vmem:[#allocation5 + $0x3a0] sm:$0xff]  ;;  %6710 = vst [vmem:[#allocation77_spill] sm:$0xff] %v3509_v1  ;;  %v196_v7 = vld [vmem:[#allocation2 + $0x3d0] sm:$0xff]  ;;  %v3516_v21 = vpop.eup %2304  ;;  %v3518_v26 = vadd.f32 %v316_v63, %v188_v23  ;;  %v3520_v3 = vadd.f32 %v317_v31, %v189_v51  ;;  %v545_v1 = vmul.f32 0.5, %v3422_v41  ;;  %2330 = vlog2.f32 %v541_v57 }
  0x77   :  { %v319_v15 = vld [vmem:[#allocation5 + $0x3a8] sm:$0xff]  ;;  %v197_v33 = vld [vmem:[#allocation2 + $0x3d8] sm:$0xff]  ;;  %v320_v46 = vld [vmem:[#allocation5 + $0x3b0] sm:$0xff]  ;;  %6711 = vst [vmem:[#allocation78_spill] sm:$0xff] %v3516_v21  ;;  %v3523_v37 = vpop.eup %2306  ;;  %v3525_v0 = vadd.f32 %v318_v54, %v190_v4  ;;  %2332 = vlog2.f32 %v542_v52  ;;  %v547_v41 = vmul.f32 0.5, %v3429_v29  ;;  %v548_v52 = vmul.f32 0.5, %v3434_v11 }
  0x78   :  { %v321_v16 = vld [vmem:[#allocation5 + $0x3b8] sm:$0xff]  ;;  %v198_v40 = vld [vmem:[#allocation2 + $0x3e0] sm:$0xff]  ;;  %v323_v39 = vld [vmem:[#allocation5 + $0x3c8] sm:$0xff]  ;;  %6712 = vst [vmem:[#allocation79_spill] sm:$0xff] %v3523_v37  ;;  %v3527_v62 = vadd.f32 %v319_v15, %v191_v19  ;;  %v3530_v21 = vpop.eup %2308  ;;  %v3532_v31 = vadd.f32 %v320_v46, %v192_v9  ;;  %2334 = vlog2.f32 %v543_v47 }
  0x79   :  { %v322_v14 = vld [vmem:[#allocation5 + $0x3c0] sm:$0xff]  ;;  %v199_v34 = vld [vmem:[#allocation2 + $0x3e8] sm:$0xff]  ;;  %v324_v56 = vld [vmem:[#allocation5 + $0x3d0] sm:$0xff]  ;;  %6713 = vst [vmem:[#allocation80_spill] sm:$0xff] %v3530_v21  ;;  %v3534_v57 = vadd.f32 %v321_v16, %v193_v2  ;;  %v3537_v37 = vpop.eup %2310  ;;  %v3539_v48 = vadd.f32 %v323_v39, %v195_v5  ;;  %2336 = vlog2.f32 %v544_v42  ;;  %v549_v2 = vmul.f32 0.5, %v3436_v43 }
  0x7a   :  { %v325_v6 = vld [vmem:[#allocation5 + $0x3d8] sm:$0xff]  ;;  %v200_v23 = vld [vmem:[#allocation2 + $0x3f0] sm:$0xff]  ;;  %v326_v51 = vld [vmem:[#allocation5 + $0x3e0] sm:$0xff]  ;;  %6714 = vst [vmem:[#allocation81_spill] sm:$0xff] %v3537_v37  ;;  %v450_v15 = vadd.f32 %v322_v14, %v194_v53  ;;  %v3542_v21 = vpop.eup %2312  ;;  %v452_v9 = vadd.f32 %v324_v56, %v196_v7  ;;  %2338 = vlog2.f32 %v545_v1  ;;  %v550_v37 = vmul.f32 0.5, %v3441_v25 }
  0x7b   :  { %v327_v63 = vld [vmem:[#allocation5 + $0x3e8] sm:$0xff]  ;;  %v201_v4 = vld [vmem:[#allocation2 + $0x3f8] sm:$0xff]  ;;  %v328_v19 = vld [vmem:[#allocation5 + $0x3f0] sm:$0xff]  ;;  %v453_v46 = vadd.f32 %v325_v6, %v197_v33  ;;  %v3545_v29 = vpop.eup %2314  ;;  %v454_v47 = vadd.f32 %v326_v51, %v198_v40  ;;  %2340 = vlog2.f32 %v546_v58  ;;  %v551_v42 = vmul.f32 0.5, %v3443_v44 }
  0x7c   :  { %v329_v54 = vld [vmem:[#allocation5 + $0x3f8] sm:$0xff]  ;;  %v455_v16 = vadd.f32 %v327_v63, %v199_v34  ;;  %v3548_v53 = vpop.eup %2316  ;;  %v456_v5 = vadd.f32 %v328_v19, %v200_v23  ;;  %2342 = vlog2.f32 %v547_v41  ;;  %v552_v7 = vmul.f32 0.5, %v3448_v45 }
  0x7d   :  { %v457_v14 = vadd.f32 %v329_v54, %v201_v4  ;;  %v3551_v11 = vpop.eup %2318  ;;  %v553_v43 = vmul.f32 0.5, %v3450_v28  ;;  %v554_v1 = vmul.f32 0.5, %v3455_v61  ;;  %2344 = vlog2.f32 %v548_v52 }
  0x7e   :  { %v3556_v33 = vpop.eup %2320  ;;  %v555_v25 = vmul.f32 0.5, %v3457_v17  ;;  %v556_v40 = vmul.f32 0.5, %v3462_v55  ;;  %v557_v39 = vmul.f32 0.5, %v3464_v10  ;;  %2346 = vlog2.f32 %v549_v2  ;;  %v6718_v2 = vld [vmem:[#allocation12_spill] sm:$0xff] }
  0x7f   :  { %v3561_v44 = vpop.eup %2322  ;;  %v558_v34 = vmul.f32 0.5, %v3469_v49  ;;  %v559_v45 = vmul.f32 0.5, %v3471_v35  ;;  %v560_v28 = vmul.f32 0.5, %v3476_v36  ;;  %2348 = vlog2.f32 %v550_v37 }
  0x80   :  { %v3566_v61 = vpop.eup %2324  ;;  %v561_v56 = vmul.f32 0.5, %v3478_v12  ;;  %v562_v17 = vmul.f32 0.5, %v3483_v30  ;;  %v563_v55 = vmul.f32 0.5, %v3485_v20  ;;  %2350 = vlog2.f32 %v551_v42  ;;  %v6721_v42 = vld [vmem:[#allocation15_spill] sm:$0xff] }
  0x81   :  { %v3571_v10 = vpop.eup %2326  ;;  %v564_v6 = vmul.f32 0.5, %v3490_v24  ;;  %v3575_v49 = vmul.f32 0.5, %v3492_v60  ;;  %v3578_v35 = vmul.f32 0.5, %v3497_v18  ;;  %2352 = vlog2.f32 %v552_v7 }
  0x82   :  { %v3580_v37 = vpop.eup %2328  ;;  %v3583_v12 = vmul.f32 0.5, %v3499_v59  ;;  %v3586_v36 = vmul.f32 0.5, %v3504_v13  ;;  %v3589_v20 = vmul.f32 0.5, %v3506_v38  ;;  %2354 = vlog2.f32 %v553_v43  ;;  %v6723_v43 = vld [vmem:[#allocation16_spill] sm:$0xff] }
  0x83   :  { %v3591_v30 = vpop.eup %2330  ;;  %v3594_v60 = vmul.f32 0.5, %v3511_v8  ;;  %v3597_v24 = vmul.f32 0.5, %v3513_v50  ;;  %v3600_v18 = vmul.f32 0.5, %v3518_v26  ;;  %2356 = vlog2.f32 %v554_v1 }
  0x84   :  { %v3602_v59 = vpop.eup %2332  ;;  %v3605_v13 = vmul.f32 0.5, %v3520_v3  ;;  %v3608_v38 = vmul.f32 0.5, %v3525_v0  ;;  %v3611_v58 = vmul.f32 0.5, %v3527_v62  ;;  %2358 = vlog2.f32 %v555_v25  ;;  %v6725_v25 = vld [vmem:[#allocation17_spill] sm:$0xff] }
  0x85   :  { %v3613_v8 = vpop.eup %2334  ;;  %v3616_v50 = vmul.f32 0.5, %v3532_v31  ;;  %v3619_v26 = vmul.f32 0.5, %v3534_v57  ;;  %v3621_v23 = vmul.f32 0.5, %v450_v15  ;;  %2360 = vlog2.f32 %v556_v40 }
  0x86   :  { %v3623_v3 = vpop.eup %2336  ;;  %v3626_v0 = vmul.f32 0.5, %v3539_v48  ;;  %v3628_v51 = vmul.f32 0.5, %v452_v9  ;;  %v3630_v62 = vmul.f32 0.5, %v453_v46  ;;  %2362 = vlog2.f32 %v557_v39  ;;  %v6717_v9 = vld [vmem:[#allocation11_spill] sm:$0xff]  ;;  %v6727_v39 = vld [vmem:[#allocation18_spill] sm:$0xff] }
  0x87   :  { %v3632_v63 = vpop.eup %2338  ;;  %v3634_v31 = vmul.f32 0.5, %v454_v47  ;;  %v3636_v41 = vmul.f32 0.5, %v455_v16  ;;  %v3638_v57 = vmul.f32 0.5, %v456_v5  ;;  %2364 = vlog2.f32 %v558_v34 }
  0x88   :  { %v3640_v4 = vpop.eup %2340  ;;  %v3642_v19 = vmul.f32 0.5, %v457_v14  ;;  %v3645_v54 = vmul.f32 0.6931472, %v3280_v22  ;;  %v3648_v15 = vmul.f32 0.6931472, %v3282_v27  ;;  %2366 = vlog2.f32 %v559_v45  ;;  %v6719_v22 = vld [vmem:[#allocation13_spill] sm:$0xff] }
  0x89   :  { %v3650_v48 = vpop.eup %2342  ;;  %v3653_v52 = vmul.f32 0.6931472, %v3284_v32  ;;  %v3656_v46 = vmul.f32 0.6931472, %v6717_v9  ;;  %v3659_v47 = vmul.f32 0.6931472, %v6718_v2  ;;  %2368 = vlog2.f32 %v560_v28 }
  0x8a   :  { %6715 = vst [vmem:[#allocation82_spill] sm:$0xff] %v3645_v54  ;;  %6716 = vst [vmem:[#allocation83_spill] sm:$0xff] %v3648_v15  ;;  %v3661_v16 = vpop.eup %2344  ;;  %v3664_v5 = vmul.f32 0.6931472, %v6719_v22  ;;  %v6720_v27 = vld [vmem:[#allocation14_spill] sm:$0xff]  ;;  %2370 = vlog2.f32 %v561_v56  ;;  %v6729_v28 = vld [vmem:[#allocation19_spill] sm:$0xff] }
  0x8b   :  { %v3667_v14 = vmul.f32 0.6931472, %v6720_v27  ;;  %v3670_v7 = vmul.f32 0.6931472, %v6721_v42  ;;  %v3672_v32 = vpop.eup %2346  ;;  %v3675_v1 = vmul.f32 0.6931472, %v6723_v43  ;;  %2372 = vlog2.f32 %v562_v17 }
  0x8c   :  { %v3678_v40 = vmul.f32 0.6931472, %v6725_v25  ;;  %v3681_v34 = vmul.f32 0.6931472, %v6727_v39  ;;  %v3683_v45 = vpop.eup %2348  ;;  %v3686_v9 = vmul.f32 0.6931472, %v6729_v28  ;;  %2374 = vlog2.f32 %v563_v55 }
  0x8d   :  { %6722 = vst [vmem:[#allocation11_spill] sm:$0xff] %v3670_v7  ;;  %6724 = vst [vmem:[#allocation12_spill] sm:$0xff] %v3675_v1  ;;  %v6731_v2 = vld [vmem:[#allocation20_spill] sm:$0xff]  ;;  %v6733_v56 = vld [vmem:[#allocation21_spill] sm:$0xff]  ;;  %v3694_v42 = vpop.eup %2350  ;;  %2376 = vlog2.f32 %v564_v6 }
  0x8e   :  { %6726 = vst [vmem:[#allocation13_spill] sm:$0xff] %v3678_v40  ;;  %6728 = vst [vmem:[#allocation14_spill] sm:$0xff] %v3681_v34  ;;  %v3689_v22 = vmul.f32 0.6931472, %v6731_v2  ;;  %v3692_v27 = vmul.f32 0.6931472, %v6733_v56  ;;  %v3705_v28 = vpop.eup %2352  ;;  %2378 = vlog2.f32 %v3575_v49 }
  0x8f   :  { %6730 = vst [vmem:[#allocation15_spill] sm:$0xff] %v3686_v9  ;;  %v6735_v43 = vld [vmem:[#allocation22_spill] sm:$0xff]  ;;  %v6737_v39 = vld [vmem:[#allocation23_spill] sm:$0xff]  ;;  %v6739_v17 = vld [vmem:[#allocation24_spill] sm:$0xff]  ;;  %2380 = vlog2.f32 %v3578_v35 }
  0x90   :  { %6732 = vst [vmem:[#allocation16_spill] sm:$0xff] %v3689_v22  ;;  %6734 = vst [vmem:[#allocation17_spill] sm:$0xff] %v3692_v27  ;;  %v3697_v25 = vmul.f32 0.6931472, %v6735_v43  ;;  %v3700_v34 = vmul.f32 0.6931472, %v6737_v39  ;;  %v3717_v43 = vpop.eup %2354  ;;  %2382 = vlog2.f32 %v3583_v12 }
  0x91   :  { %v3703_v40 = vmul.f32 0.6931472, %v6739_v17  ;;  %v6741_v2 = vld [vmem:[#allocation25_spill] sm:$0xff]  ;;  %v6743_v56 = vld [vmem:[#allocation26_spill] sm:$0xff]  ;;  %v6745_v55 = vld [vmem:[#allocation27_spill] sm:$0xff]  ;;  %2384 = vlog2.f32 %v3586_v36 }
  0x92   :  { %6736 = vst [vmem:[#allocation18_spill] sm:$0xff] %v3697_v25  ;;  %6738 = vst [vmem:[#allocation19_spill] sm:$0xff] %v3700_v34  ;;  %v3708_v22 = vmul.f32 0.6931472, %v6741_v2  ;;  %v3711_v27 = vmul.f32 0.6931472, %v6743_v56  ;;  %v3729_v2 = vpop.eup %2356  ;;  %2386 = vlog2.f32 %v3589_v20 }
  0x93   :  { %6740 = vst [vmem:[#allocation20_spill] sm:$0xff] %v3703_v40  ;;  %v3714_v9 = vmul.f32 0.6931472, %v6745_v55  ;;  %v6747_v39 = vld [vmem:[#allocation28_spill] sm:$0xff]  ;;  %v6749_v17 = vld [vmem:[#allocation29_spill] sm:$0xff]  ;;  %v6751_v40 = vld [vmem:[#allocation30_spill] sm:$0xff]  ;;  %2388 = vlog2.f32 %v3594_v60 }
  0x94   :  { %6742 = vst [vmem:[#allocation21_spill] sm:$0xff] %v3708_v22  ;;  %6744 = vst [vmem:[#allocation22_spill] sm:$0xff] %v3711_v27  ;;  %v3720_v34 = vmul.f32 0.6931472, %v6747_v39  ;;  %v3723_v6 = vmul.f32 0.6931472, %v6749_v17  ;;  %v3741_v39 = vpop.eup %2358  ;;  %2390 = vlog2.f32 %v3597_v24 }
  0x95   :  { %6746 = vst [vmem:[#allocation23_spill] sm:$0xff] %v3714_v9  ;;  %v3726_v25 = vmul.f32 0.6931472, %v6751_v40  ;;  %v6753_v56 = vld [vmem:[#allocation31_spill] sm:$0xff]  ;;  %v6755_v9 = vld [vmem:[#allocation32_spill] sm:$0xff]  ;;  %v6757_v27 = vld [vmem:[#allocation33_spill] sm:$0xff] }
  0x96   :  { %6748 = vst [vmem:[#allocation24_spill] sm:$0xff] %v3720_v34  ;;  %6750 = vst [vmem:[#allocation25_spill] sm:$0xff] %v3723_v6  ;;  %v3732_v55 = vmul.f32 0.6931472, %v6753_v56  ;;  %v3735_v49 = vmul.f32 0.6931472, %v6755_v9  ;;  %v3753_v9 = vpop.eup %2360  ;;  %2392 = vlog2.f32 %v3600_v18 }
  0x97   :  { %6752 = vst [vmem:[#allocation26_spill] sm:$0xff] %v3726_v25  ;;  %v3738_v22 = vmul.f32 0.6931472, %v6757_v27  ;;  %v6759_v17 = vld [vmem:[#allocation34_spill] sm:$0xff]  ;;  %v6761_v25 = vld [vmem:[#allocation35_spill] sm:$0xff]  ;;  %v6763_v6 = vld [vmem:[#allocation36_spill] sm:$0xff] }
  0x98   :  { %6754 = vst [vmem:[#allocation27_spill] sm:$0xff] %v3732_v55  ;;  %6756 = vst [vmem:[#allocation28_spill] sm:$0xff] %v3735_v49  ;;  %v3744_v40 = vmul.f32 0.6931472, %v6759_v17  ;;  %v3747_v35 = vmul.f32 0.6931472, %v6761_v25  ;;  %v3765_v25 = vpop.eup %2362  ;;  %2394 = vlog2.f32 %v3605_v13 }
  0x99   :  { %6758 = vst [vmem:[#allocation29_spill] sm:$0xff] %v3738_v22  ;;  %v3750_v34 = vmul.f32 0.6931472, %v6763_v6  ;;  %v6765_v56 = vld [vmem:[#allocation37_spill] sm:$0xff]  ;;  %v6767_v22 = vld [vmem:[#allocation38_spill] sm:$0xff]  ;;  %v6769_v49 = vld [vmem:[#allocation39_spill] sm:$0xff] }
  0x9a   :  { %6760 = vst [vmem:[#allocation30_spill] sm:$0xff] %v3744_v40  ;;  %6762 = vst [vmem:[#allocation31_spill] sm:$0xff] %v3747_v35  ;;  %v3756_v27 = vmul.f32 0.6931472, %v6765_v56  ;;  %v3759_v12 = vmul.f32 0.6931472, %v6767_v22  ;;  %v3777_v22 = vpop.eup %2364  ;;  %2396 = vlog2.f32 %v3608_v38 }
  0x9b   :  { %6764 = vst [vmem:[#allocation32_spill] sm:$0xff] %v3750_v34  ;;  %v3762_v55 = vmul.f32 0.6931472, %v6769_v49  ;;  %v6771_v17 = vld [vmem:[#allocation40_spill] sm:$0xff]  ;;  %v6773_v34 = vld [vmem:[#allocation41_spill] sm:$0xff]  ;;  %v6775_v35 = vld [vmem:[#allocation42_spill] sm:$0xff] }
  0x9c   :  { %6766 = vst [vmem:[#allocation33_spill] sm:$0xff] %v3756_v27  ;;  %6768 = vst [vmem:[#allocation34_spill] sm:$0xff] %v3759_v12  ;;  %v3768_v6 = vmul.f32 0.6931472, %v6771_v17  ;;  %v3771_v36 = vmul.f32 0.6931472, %v6773_v34  ;;  %v3789_v34 = vpop.eup %2366  ;;  %2398 = vlog2.f32 %v3611_v58 }
  0x9d   :  { %6770 = vst [vmem:[#allocation35_spill] sm:$0xff] %v3762_v55  ;;  %v3774_v40 = vmul.f32 0.6931472, %v6775_v35  ;;  %v6777_v56 = vld [vmem:[#allocation43_spill] sm:$0xff]  ;;  %v6779_v55 = vld [vmem:[#allocation44_spill] sm:$0xff]  ;;  %v6781_v12 = vld [vmem:[#allocation45_spill] sm:$0xff] }
  0x9e   :  { %6772 = vst [vmem:[#allocation36_spill] sm:$0xff] %v3768_v6  ;;  %6774 = vst [vmem:[#allocation37_spill] sm:$0xff] %v3771_v36  ;;  %v3780_v49 = vmul.f32 0.6931472, %v6777_v56  ;;  %v3783_v20 = vmul.f32 0.6931472, %v6779_v55  ;;  %v3801_v55 = vpop.eup %2368  ;;  %2400 = vlog2.f32 %v3616_v50 }
  0x9f   :  { %6776 = vst [vmem:[#allocation38_spill] sm:$0xff] %v3774_v40  ;;  %v3786_v27 = vmul.f32 0.6931472, %v6781_v12  ;;  %v6783_v17 = vld [vmem:[#allocation46_spill] sm:$0xff]  ;;  %v6785_v40 = vld [vmem:[#allocation47_spill] sm:$0xff]  ;;  %v6787_v36 = vld [vmem:[#allocation48_spill] sm:$0xff] }
  0xa0   :  { %6778 = vst [vmem:[#allocation39_spill] sm:$0xff] %v3780_v49  ;;  %6780 = vst [vmem:[#allocation40_spill] sm:$0xff] %v3783_v20  ;;  %v3792_v35 = vmul.f32 0.6931472, %v6783_v17  ;;  %v3795_v60 = vmul.f32 0.6931472, %v6785_v40  ;;  %v3813_v40 = vpop.eup %2370  ;;  %2402 = vlog2.f32 %v3619_v26 }
  0xa1   :  { %6782 = vst [vmem:[#allocation41_spill] sm:$0xff] %v3786_v27  ;;  %v3798_v6 = vmul.f32 0.6931472, %v6787_v36  ;;  %v6789_v56 = vld [vmem:[#allocation49_spill] sm:$0xff]  ;;  %v6791_v27 = vld [vmem:[#allocation50_spill] sm:$0xff]  ;;  %v6793_v20 = vld [vmem:[#allocation51_spill] sm:$0xff] }
  0xa2   :  { %6784 = vst [vmem:[#allocation42_spill] sm:$0xff] %v3792_v35  ;;  %6786 = vst [vmem:[#allocation43_spill] sm:$0xff] %v3795_v60  ;;  %v3804_v12 = vmul.f32 0.6931472, %v6789_v56  ;;  %v3807_v24 = vmul.f32 0.6931472, %v6791_v27  ;;  %v3825_v27 = vpop.eup %2372  ;;  %2404 = vlog2.f32 %v3621_v23 }
  0xa3   :  { %6788 = vst [vmem:[#allocation44_spill] sm:$0xff] %v3798_v6  ;;  %v3810_v49 = vmul.f32 0.6931472, %v6793_v20  ;;  %v6795_v17 = vld [vmem:[#allocation52_spill] sm:$0xff]  ;;  %v6797_v6 = vld [vmem:[#allocation53_spill] sm:$0xff]  ;;  %v6799_v60 = vld [vmem:[#allocation54_spill] sm:$0xff] }
  0xa4   :  { %6790 = vst [vmem:[#allocation45_spill] sm:$0xff] %v3804_v12  ;;  %6792 = vst [vmem:[#allocation46_spill] sm:$0xff] %v3807_v24  ;;  %v3816_v36 = vmul.f32 0.6931472, %v6795_v17  ;;  %v3819_v18 = vmul.f32 0.6931472, %v6797_v6  ;;  %v3837_v6 = vpop.eup %2374  ;;  %2406 = vlog2.f32 %v3626_v0 }
  0xa5   :  { %6794 = vst [vmem:[#allocation47_spill] sm:$0xff] %v3810_v49  ;;  %v3822_v35 = vmul.f32 0.6931472, %v6799_v60  ;;  %v6801_v56 = vld [vmem:[#allocation55_spill] sm:$0xff]  ;;  %v6803_v49 = vld [vmem:[#allocation56_spill] sm:$0xff]  ;;  %v6805_v24 = vld [vmem:[#allocation57_spill] sm:$0xff] }
  0xa6   :  { %6796 = vst [vmem:[#allocation48_spill] sm:$0xff] %v3816_v36  ;;  %6798 = vst [vmem:[#allocation49_spill] sm:$0xff] %v3819_v18  ;;  %v3828_v20 = vmul.f32 0.6931472, %v6801_v56  ;;  %v3831_v13 = vmul.f32 0.6931472, %v6803_v49  ;;  %v3849_v49 = vpop.eup %2376  ;;  %2408 = vlog2.f32 %v3628_v51 }
  0xa7   :  { %6800 = vst [vmem:[#allocation50_spill] sm:$0xff] %v3822_v35  ;;  %v3834_v12 = vmul.f32 0.6931472, %v6805_v24  ;;  %v6807_v17 = vld [vmem:[#allocation58_spill] sm:$0xff]  ;;  %v6809_v35 = vld [vmem:[#allocation59_spill] sm:$0xff]  ;;  %v6811_v18 = vld [vmem:[#allocation60_spill] sm:$0xff] }
  0xa8   :  { %6802 = vst [vmem:[#allocation51_spill] sm:$0xff] %v3828_v20  ;;  %6804 = vst [vmem:[#allocation52_spill] sm:$0xff] %v3831_v13  ;;  %v3840_v60 = vmul.f32 0.6931472, %v6807_v17  ;;  %v3843_v38 = vmul.f32 0.6931472, %v6809_v35  ;;  %v3861_v35 = vpop.eup %2378  ;;  %2410 = vlog2.f32 %v3630_v62 }
  0xa9   :  { %6806 = vst [vmem:[#allocation53_spill] sm:$0xff] %v3834_v12  ;;  %v3846_v36 = vmul.f32 0.6931472, %v6811_v18  ;;  %v6813_v56 = vld [vmem:[#allocation61_spill] sm:$0xff]  ;;  %v6815_v12 = vld [vmem:[#allocation62_spill] sm:$0xff]  ;;  %v6817_v13 = vld [vmem:[#allocation63_spill] sm:$0xff] }
  0xaa   :  { %6808 = vst [vmem:[#allocation54_spill] sm:$0xff] %v3840_v60  ;;  %6810 = vst [vmem:[#allocation55_spill] sm:$0xff] %v3843_v38  ;;  %v3852_v24 = vmul.f32 0.6931472, %v6813_v56  ;;  %v3855_v58 = vmul.f32 0.6931472, %v6815_v12  ;;  %v3873_v12 = vpop.eup %2380  ;;  %2412 = vlog2.f32 %v3634_v31 }
  0xab   :  { %6812 = vst [vmem:[#allocation56_spill] sm:$0xff] %v3846_v36  ;;  %v3858_v20 = vmul.f32 0.6931472, %v6817_v13  ;;  %v6819_v17 = vld [vmem:[#allocation64_spill] sm:$0xff]  ;;  %v6821_v36 = vld [vmem:[#allocation65_spill] sm:$0xff]  ;;  %v6823_v38 = vld [vmem:[#allocation66_spill] sm:$0xff] }
  0xac   :  { %6814 = vst [vmem:[#allocation57_spill] sm:$0xff] %v3852_v24  ;;  %6816 = vst [vmem:[#allocation58_spill] sm:$0xff] %v3855_v58  ;;  %v3864_v18 = vmul.f32 0.6931472, %v6819_v17  ;;  %v3867_v50 = vmul.f32 0.6931472, %v6821_v36  ;;  %v3885_v36 = vpop.eup %2382  ;;  %2414 = vlog2.f32 %v3636_v41 }
  0xad   :  { %6818 = vst [vmem:[#allocation59_spill] sm:$0xff] %v3858_v20  ;;  %v3870_v60 = vmul.f32 0.6931472, %v6823_v38  ;;  %v6825_v56 = vld [vmem:[#allocation67_spill] sm:$0xff]  ;;  %v6827_v20 = vld [vmem:[#allocation68_spill] sm:$0xff]  ;;  %v6829_v58 = vld [vmem:[#allocation69_spill] sm:$0xff] }
  0xae   :  { %6820 = vst [vmem:[#allocation60_spill] sm:$0xff] %v3864_v18  ;;  %6822 = vst [vmem:[#allocation61_spill] sm:$0xff] %v3867_v50  ;;  %v3876_v13 = vmul.f32 0.6931472, %v6825_v56  ;;  %v3879_v26 = vmul.f32 0.6931472, %v6827_v20  ;;  %v3897_v20 = vpop.eup %2384  ;;  %2416 = vlog2.f32 %v3638_v57 }
  0xaf   :  { %6824 = vst [vmem:[#allocation62_spill] sm:$0xff] %v3870_v60  ;;  %v3882_v24 = vmul.f32 0.6931472, %v6829_v58  ;;  %v6831_v17 = vld [vmem:[#allocation70_spill] sm:$0xff]  ;;  %v6833_v60 = vld [vmem:[#allocation71_spill] sm:$0xff]  ;;  %v6835_v50 = vld [vmem:[#allocation72_spill] sm:$0xff] }
  0xb0   :  { %6826 = vst [vmem:[#allocation63_spill] sm:$0xff] %v3876_v13  ;;  %6828 = vst [vmem:[#allocation64_spill] sm:$0xff] %v3879_v26  ;;  %v3888_v38 = vmul.f32 0.6931472, %v6831_v17  ;;  %v3891_v23 = vmul.f32 0.6931472, %v6833_v60  ;;  %v3909_v60 = vpop.eup %2386  ;;  %2418 = vlog2.f32 %v3642_v19 }
  0xb1   :  { %6830 = vst [vmem:[#allocation65_spill] sm:$0xff] %v3882_v24  ;;  %v3894_v18 = vmul.f32 0.6931472, %v6835_v50  ;;  %v6837_v56 = vld [vmem:[#allocation73_spill] sm:$0xff]  ;;  %v6839_v24 = vld [vmem:[#allocation74_spill] sm:$0xff]  ;;  %v6841_v26 = vld [vmem:[#allocation75_spill] sm:$0xff] }
  0xb2   :  { %6832 = vst [vmem:[#allocation66_spill] sm:$0xff] %v3888_v38  ;;  %6834 = vst [vmem:[#allocation67_spill] sm:$0xff] %v3891_v23  ;;  %v3900_v58 = vmul.f32 0.6931472, %v6837_v56  ;;  %v3903_v0 = vmul.f32 0.6931472, %v6839_v24  ;;  %v3921_v24 = vpop.eup %2388 }
  0xb3   :  { %6836 = vst [vmem:[#allocation68_spill] sm:$0xff] %v3894_v18  ;;  %v3906_v13 = vmul.f32 0.6931472, %v6841_v26  ;;  %v6843_v17 = vld [vmem:[#allocation76_spill] sm:$0xff]  ;;  %v6844_v18 = vld [vmem:[#allocation77_spill] sm:$0xff]  ;;  %v6845_v23 = vld [vmem:[#allocation78_spill] sm:$0xff] }
  0xb4   :  { %6838 = vst [vmem:[#allocation69_spill] sm:$0xff] %v3900_v58  ;;  %6840 = vst [vmem:[#allocation70_spill] sm:$0xff] %v3903_v0  ;;  %v3912_v50 = vmul.f32 0.6931472, %v6843_v17  ;;  %v3915_v51 = vmul.f32 0.6931472, %v6844_v18  ;;  %v3933_v18 = vpop.eup %2390 }
  0xb5   :  { %6842 = vst [vmem:[#allocation71_spill] sm:$0xff] %v3906_v13  ;;  %v3918_v38 = vmul.f32 0.6931472, %v6845_v23  ;;  %v6846_v56 = vld [vmem:[#allocation79_spill] sm:$0xff]  ;;  %v6847_v13 = vld [vmem:[#allocation80_spill] sm:$0xff]  ;;  %v6848_v0 = vld [vmem:[#allocation81_spill] sm:$0xff] }
  0xb6   :  { %v3924_v26 = vmul.f32 0.6931472, %v6846_v56  ;;  %v3927_v62 = vmul.f32 0.6931472, %v6847_v13  ;;  %v3930_v58 = vmul.f32 0.6931472, %v6848_v0  ;;  %v3945_v13 = vpop.eup %2392 }
  0xb7   :  { %v3936_v23 = vmul.f32 0.6931472, %v3542_v21  ;;  %v3939_v31 = vmul.f32 0.6931472, %v3545_v29  ;;  %v3942_v17 = vmul.f32 0.6931472, %v3548_v53  ;;  %v3957_v21 = vpop.eup %2394 }
  0xb8   :  { %v3948_v0 = vmul.f32 0.6931472, %v3551_v11  ;;  %v3951_v41 = vmul.f32 0.6931472, %v3556_v33  ;;  %v3954_v56 = vmul.f32 0.6931472, %v3561_v44  ;;  %v3971_v33 = vpop.eup %2396 }
  0xb9   :  { %v3960_v29 = vmul.f32 0.6931472, %v3566_v61  ;;  %v3963_v53 = vmul.f32 0.6931472, %v3571_v10  ;;  %v3966_v57 = vmul.f32 0.6931472, %v3580_v37  ;;  %v2399_v37 = vpop.eup %2398 }
  0xba   :  { %6849 = vst [vmem:[#allocation72_spill] sm:$0xff] %v3954_v56  ;;  %v3968_v11 = vld [vmem:[#allocation2] sm:$0xff]  ;;  %v3974_v44 = vmul.f32 0.6931472, %v3591_v30  ;;  %v3977_v19 = vmul.f32 0.6931472, %v3602_v59  ;;  %v2401_v59 = vpop.eup %2400 }
  0xbb   :  { %6850 = vst [vmem:[#allocation73_spill] sm:$0xff] %v3960_v29  ;;  %6851 = vst [vmem:[#allocation74_spill] sm:$0xff] %v3963_v53  ;;  %2420 = vlog2.f32 %v3968_v11  ;;  %v3980_v61 = vmul.f32 0.6931472, %v3613_v8  ;;  %v3982_v10 = vld [vmem:[#allocation2 + $0x8] sm:$0xff] }
  0xbc   :  { %6852 = vst [vmem:[#allocation75_spill] sm:$0xff] %v3966_v57  ;;  %6853 = vst [vmem:[#allocation76_spill] sm:$0xff] %v3974_v44  ;;  %2422 = vlog2.f32 %v3982_v10  ;;  %v3986_v57 = vmul.f32 0.6931472, %v3623_v3  ;;  %v3989_v53 = vmul.f32 0.6931472, %v3632_v63  ;;  %v2403_v63 = vpop.eup %2402 }
  0xbd   :  { %6854 = vst [vmem:[#allocation77_spill] sm:$0xff] %v3977_v19  ;;  %6855 = vst [vmem:[#allocation78_spill] sm:$0xff] %v3980_v61  ;;  %v3992_v30 = vmul.f32 0.6931472, %v3640_v4  ;;  %v3994_v44 = vld [vmem:[#allocation2 + $0x10] sm:$0xff] }
  0xbe   :  { %6856 = vst [vmem:[#allocation79_spill] sm:$0xff] %v3986_v57  ;;  %6857 = vst [vmem:[#allocation80_spill] sm:$0xff] %v3989_v53  ;;  %2424 = vlog2.f32 %v3994_v44  ;;  %v3998_v8 = vmul.f32 0.6931472, %v3650_v48  ;;  %v4001_v61 = vmul.f32 0.6931472, %v3661_v16  ;;  %v2405_v16 = vpop.eup %2404 }
  0xbf   :  { %6858 = vst [vmem:[#allocation81_spill] sm:$0xff] %v3992_v30  ;;  %v4004_v3 = vmul.f32 0.6931472, %v3672_v32  ;;  %v4006_v57 = vld [vmem:[#allocation2 + $0x18] sm:$0xff]  ;;  %v4010_v4 = vmul.f32 0.6931472, %v3683_v45 }
  0xc0   :  { %6859 = vst [vmem:[#allocation84_spill] sm:$0xff] %v3998_v8  ;;  %6860 = vst [vmem:[#allocation85_spill] sm:$0xff] %v4001_v61  ;;  %2426 = vlog2.f32 %v4006_v57  ;;  %v4013_v30 = vmul.f32 0.6931472, %v3694_v42  ;;  %v4016_v48 = vmul.f32 0.6931472, %v3705_v28  ;;  %v2407_v42 = vpop.eup %2406 }
  0xc1   :  { %6861 = vst [vmem:[#allocation86_spill] sm:$0xff] %v4004_v3  ;;  %6862 = vst [vmem:[#allocation87_spill] sm:$0xff] %v4010_v4  ;;  %v4018_v8 = vld [vmem:[#allocation2 + $0x20] sm:$0xff]  ;;  %v4022_v32 = vmul.f32 0.6931472, %v3717_v43  ;;  %v4030_v4 = vld [vmem:[#allocation2 + $0x28] sm:$0xff] }
  0xc2   :  { %6863 = vst [vmem:[#allocation88_spill] sm:$0xff] %v4013_v30  ;;  %6864 = vst [vmem:[#allocation89_spill] sm:$0xff] %v4016_v48  ;;  %2428 = vlog2.f32 %v4018_v8  ;;  %v4025_v3 = vmul.f32 0.6931472, %v3729_v2  ;;  %v4028_v45 = vmul.f32 0.6931472, %v3741_v39  ;;  %v2409_v2 = vpop.eup %2408 }
  0xc3   :  { %6865 = vst [vmem:[#allocation90_spill] sm:$0xff] %v4022_v32  ;;  %2430 = vlog2.f32 %v4030_v4  ;;  %v4034_v28 = vmul.f32 0.6931472, %v3753_v9  ;;  %v4037_v48 = vmul.f32 0.6931472, %v3765_v25  ;;  %v4042_v32 = vld [vmem:[#allocation2 + $0x30] sm:$0xff]  ;;  %v2411_v25 = vpop.eup %2410 }
  0xc4   :  { %6866 = vst [vmem:[#allocation91_spill] sm:$0xff] %v4025_v3  ;;  %6867 = vst [vmem:[#allocation92_spill] sm:$0xff] %v4028_v45  ;;  %v4040_v43 = vmul.f32 0.6931472, %v3777_v22  ;;  %2432 = vlog2.f32 %v4042_v32  ;;  %v4046_v39 = vmul.f32 0.6931472, %v3789_v34 }
  0xc5   :  { %6868 = vst [vmem:[#allocation93_spill] sm:$0xff] %v4034_v28  ;;  %6869 = vst [vmem:[#allocation94_spill] sm:$0xff] %v4037_v48  ;;  %v4049_v45 = vmul.f32 0.6931472, %v3801_v55  ;;  %v4052_v9 = vmul.f32 0.6931472, %v3813_v40  ;;  %v2413_v55 = vpop.eup %2412 }
  0xc6   :  { %6870 = vst [vmem:[#allocation95_spill] sm:$0xff] %v4040_v43  ;;  %6871 = vst [vmem:[#allocation96_spill] sm:$0xff] %v4046_v39  ;;  %v4054_v28 = vld [vmem:[#allocation2 + $0x38] sm:$0xff]  ;;  %v4058_v22 = vmul.f32 0.6931472, %v3825_v27  ;;  %v4066_v39 = vld [vmem:[#allocation2 + $0x40] sm:$0xff] }
  0xc7   :  { %6872 = vst [vmem:[#allocation97_spill] sm:$0xff] %v4049_v45  ;;  %6873 = vst [vmem:[#allocation98_spill] sm:$0xff] %v4052_v9  ;;  %2434 = vlog2.f32 %v4054_v28  ;;  %v4061_v43 = vmul.f32 0.6931472, %v3837_v6  ;;  %v4064_v34 = vmul.f32 0.6931472, %v3849_v49  ;;  %v2415_v6 = vpop.eup %2414 }
  0xc8   :  { %6874 = vst [vmem:[#allocation99_spill] sm:$0xff] %v4058_v22  ;;  %2436 = vlog2.f32 %v4066_v39  ;;  %v4070_v40 = vmul.f32 0.6931472, %v3861_v35  ;;  %v4073_v9 = vmul.f32 0.6931472, %v3873_v12  ;;  %v4078_v22 = vld [vmem:[#allocation2 + $0x48] sm:$0xff]  ;;  %v2417_v12 = vpop.eup %2416 }
  0xc9   :  { %6875 = vst [vmem:[#allocation100_spill] sm:$0xff] %v4061_v43  ;;  %6876 = vst [vmem:[#allocation101_spill] sm:$0xff] %v4064_v34  ;;  %v4076_v27 = vmul.f32 0.6931472, %v3885_v36  ;;  %2438 = vlog2.f32 %v4078_v22  ;;  %v4082_v49 = vmul.f32 0.6931472, %v3897_v20 }
  0xca   :  { %6877 = vst [vmem:[#allocation102_spill] sm:$0xff] %v4070_v40  ;;  %6878 = vst [vmem:[#allocation103_spill] sm:$0xff] %v4073_v9  ;;  %v4085_v34 = vmul.f32 0.6931472, %v3909_v60  ;;  %v4088_v35 = vmul.f32 0.6931472, %v3921_v24  ;;  %v2419_v60 = vpop.eup %2418 }
  0xcb   :  { %6879 = vst [vmem:[#allocation104_spill] sm:$0xff] %v4076_v27  ;;  %6880 = vst [vmem:[#allocation105_spill] sm:$0xff] %v4082_v49  ;;  %v4090_v40 = vld [vmem:[#allocation2 + $0x50] sm:$0xff]  ;;  %v4094_v36 = vmul.f32 0.6931472, %v3933_v18  ;;  %v4102_v49 = vld [vmem:[#allocation2 + $0x58] sm:$0xff] }
  0xcc   :  { %6881 = vst [vmem:[#allocation106_spill] sm:$0xff] %v4085_v34  ;;  %6882 = vst [vmem:[#allocation107_spill] sm:$0xff] %v4088_v35  ;;  %2440 = vlog2.f32 %v4090_v40  ;;  %v4097_v27 = vmul.f32 0.6931472, %v3945_v13  ;;  %v4100_v20 = vmul.f32 0.6931472, %v3957_v21  ;;  %v2421_v13 = vpop.eup %2420 }
  0xcd   :  { %6883 = vst [vmem:[#allocation108_spill] sm:$0xff] %v4094_v36  ;;  %2442 = vlog2.f32 %v4102_v49  ;;  %v4106_v24 = vmul.f32 0.6931472, %v3971_v33  ;;  %v4108_v35 = vmul.f32 0.6931472, %v2399_v37  ;;  %v4112_v18 = vld [vmem:[#allocation2 + $0x60] sm:$0xff]  ;;  %v2423_v33 = vpop.eup %2422 }
  0xce   :  { %6884 = vst [vmem:[#allocation109_spill] sm:$0xff] %v4097_v27  ;;  %6885 = vst [vmem:[#allocation110_spill] sm:$0xff] %v4100_v20  ;;  %v4110_v34 = vmul.f32 0.6931472, %v2401_v59  ;;  %2444 = vlog2.f32 %v4112_v18  ;;  %v4115_v27 = vmul.f32 0.6931472, %v2403_v63  ;;  %v2425_v63 = vpop.eup %2424 }
  0xcf   :  { %6886 = vst [vmem:[#allocation111_spill] sm:$0xff] %v4106_v24  ;;  %6887 = vst [vmem:[#allocation112_spill] sm:$0xff] %v4108_v35  ;;  %v4117_v21 = vmul.f32 0.6931472, %v2405_v16  ;;  %v4119_v20 = vmul.f32 0.6931472, %v2407_v42 }
  0xd0   :  { %6888 = vst [vmem:[#allocation113_spill] sm:$0xff] %v4110_v34  ;;  %6889 = vst [vmem:[#allocation114_spill] sm:$0xff] %v4115_v27  ;;  %v4121_v36 = vld [vmem:[#allocation2 + $0x68] sm:$0xff]  ;;  %v4124_v37 = vmul.f32 0.6931472, %v2409_v2  ;;  %v4128_v35 = vld [vmem:[#allocation2 + $0x70] sm:$0xff] }
  0xd1   :  { %6890 = vst [vmem:[#allocation115_spill] sm:$0xff] %v4117_v21  ;;  %6891 = vst [vmem:[#allocation116_spill] sm:$0xff] %v4119_v20  ;;  %2446 = vlog2.f32 %v4121_v36  ;;  %v4126_v59 = vmul.f32 0.6931472, %v2411_v25  ;;  %v843_v34 = vmul.f32 0.6931472, %v2421_v13  ;;  %v2427_v21 = vpop.eup %2426 }
  0xd2   :  { %6892 = vst [vmem:[#allocation117_spill] sm:$0xff] %v4124_v37  ;;  %2448 = vlog2.f32 %v4128_v35  ;;  %v4131_v27 = vmul.f32 0.6931472, %v2413_v55  ;;  %v4133_v16 = vmul.f32 0.6931472, %v2415_v6  ;;  %v4135_v20 = vld [vmem:[#allocation2 + $0x78] sm:$0xff]  ;;  %v2429_v37 = vpop.eup %2428 }
  0xd3   :  { %6893 = vst [vmem:[#allocation118_spill] sm:$0xff] %v4126_v59  ;;  %v845_v42 = vmul.f32 0.6931472, %v2423_v33  ;;  %2450 = vlog2.f32 %v4135_v20  ;;  %v4138_v2 = vmul.f32 0.6931472, %v2417_v12  ;;  %v4140_v59 = vld [vmem:[#allocation2 + $0x80] sm:$0xff]  ;;  %v1098_v13 = vsub.f32 %v843_v34, %v3645_v54 }
  0xd4   :  { %6894 = vst [vmem:[#allocation119_spill] sm:$0xff] %v4131_v27  ;;  %6895 = vst [vmem:[#allocation120_spill] sm:$0xff] %v4133_v16  ;;  %v847_v25 = vmul.f32 0.6931472, %v2425_v63  ;;  %2452 = vlog2.f32 %v4140_v59  ;;  %v4144_v55 = vmul.f32 0.6931472, %v2419_v60  ;;  %v2431_v27 = vpop.eup %2430 }
  0xd5   :  { %6896 = vst [vmem:[#allocation121_spill] sm:$0xff] %v4138_v2  ;;  %v849_v6 = vmul.f32 0.6931472, %v2427_v21  ;;  %v4146_v16 = vld [vmem:[#allocation2 + $0x88] sm:$0xff]  ;;  %v1099_v33 = vsub.f32 %v845_v42, %v3648_v15  ;;  %v851_v12 = vmul.f32 0.6931472, %v2429_v37  ;;  %v4155_v34 = vmul.f32 %v3968_v11, %v1098_v13  ;;  %v2433_v60 = vpop.eup %2432 }
  0xd6   :  { %6897 = vst [vmem:[#allocation122_spill] sm:$0xff] %v4144_v55  ;;  %2454 = vlog2.f32 %v4146_v16  ;;  %v4150_v2 = vld [vmem:[#allocation2 + $0x90] sm:$0xff]  ;;  %v1100_v63 = vsub.f32 %v847_v25, %v3653_v52  ;;  %v853_v54 = vmul.f32 0.6931472, %v2431_v27  ;;  %v4157_v21 = vld [vmem:[#allocation2 + $0x98] sm:$0xff]  ;;  %v2435_v37 = vpop.eup %2434  ;;  %v4164_v24 = vld [vmem:[#allocation2 + $0xa0] sm:$0xff] }
  0xd7   :  { %2456 = vlog2.f32 %v4150_v2  ;;  %6898 = vst [vmem:[#allocation123_spill] sm:$0xff] %v4155_v34  ;;  %v1101_v55 = vsub.f32 %v849_v6, %v3656_v46  ;;  %v4162_v42 = vmul.f32 %v3982_v10, %v1099_v33  ;;  %v855_v15 = vmul.f32 0.6931472, %v2433_v60  ;;  %v2437_v27 = vpop.eup %2436  ;;  %v4171_v34 = vld [vmem:[#allocation2 + $0xa8] sm:$0xff] }
  0xd8   :  { %2458 = vlog2.f32 %v4157_v21  ;;  %v1102_v11 = vsub.f32 %v851_v12, %v3659_v47  ;;  %v4169_v25 = vmul.f32 %v3994_v44, %v1100_v63  ;;  %v857_v13 = vmul.f32 0.6931472, %v2435_v37  ;;  %v2439_v33 = vpop.eup %2438 }
  0xd9   :  { %6899 = vst [vmem:[#allocation124_spill] sm:$0xff] %v4162_v42  ;;  %2460 = vlog2.f32 %v4164_v24  ;;  %v1103_v10 = vsub.f32 %v853_v54, %v3664_v5  ;;  %v4176_v6 = vmul.f32 %v4006_v57, %v1101_v55  ;;  %v859_v60 = vmul.f32 0.6931472, %v2437_v27  ;;  %v4178_v42 = vld [vmem:[#allocation2 + $0xb0] sm:$0xff]  ;;  %v2441_v63 = vpop.eup %2440 }
  0xda   :  { %6900 = vst [vmem:[#allocation125_spill] sm:$0xff] %v4169_v25  ;;  %2462 = vlog2.f32 %v4171_v34  ;;  %v1104_v44 = vsub.f32 %v855_v15, %v3667_v14  ;;  %v4183_v12 = vmul.f32 %v4018_v8, %v1102_v11  ;;  %v861_v37 = vmul.f32 0.6931472, %v2439_v33  ;;  %v4185_v25 = vld [vmem:[#allocation2 + $0xb8] sm:$0xff]  ;;  %v2443_v55 = vpop.eup %2442 }
  0xdb   :  { %6901 = vst [vmem:[#allocation126_spill] sm:$0xff] %v4176_v6  ;;  %2464 = vlog2.f32 %v4178_v42  ;;  %v1105_v54 = vsub.f32 %v857_v13, %v3670_v7  ;;  %v4190_v57 = vmul.f32 %v4030_v4, %v1103_v10  ;;  %v863_v27 = vmul.f32 0.6931472, %v2441_v63  ;;  %v4192_v6 = vld [vmem:[#allocation2 + $0xc0] sm:$0xff]  ;;  %v2445_v11 = vpop.eup %2444  ;;  %v6905_v13 = vld [vmem:[#allocation13_spill] sm:$0xff] }
  0xdc   :  { %6902 = vst [vmem:[#allocation127_spill] sm:$0xff] %v4183_v12  ;;  %2466 = vlog2.f32 %v4185_v25  ;;  %v1106_v15 = vsub.f32 %v859_v60, %v3675_v1  ;;  %v4197_v8 = vmul.f32 %v4042_v32, %v1104_v44  ;;  %v865_v33 = vmul.f32 0.6931472, %v2443_v55  ;;  %v4199_v12 = vld [vmem:[#allocation2 + $0xc8] sm:$0xff]  ;;  %v4206_v7 = vld [vmem:[#allocation2 + $0xd0] sm:$0xff]  ;;  %v6907_v60 = vld [vmem:[#allocation14_spill] sm:$0xff] }
  0xdd   :  { %6903 = vst [vmem:[#allocation128_spill] sm:$0xff] %v4190_v57  ;;  %2468 = vlog2.f32 %v4192_v6  ;;  %v1107_v4 = vsub.f32 %v861_v37, %v6905_v13  ;;  %v4204_v10 = vmul.f32 %v4054_v28, %v1105_v54  ;;  %v867_v57 = vmul.f32 0.6931472, %v2445_v11  ;;  %v4213_v1 = vld [vmem:[#allocation2 + $0xd8] sm:$0xff]  ;;  %v6909_v37 = vld [vmem:[#allocation15_spill] sm:$0xff] }
  0xde   :  { %6904 = vst [vmem:[#allocation129_spill] sm:$0xff] %v4197_v8  ;;  %2470 = vlog2.f32 %v4199_v12  ;;  %v2447_v63 = vpop.eup %2446  ;;  %v1108_v32 = vsub.f32 %v863_v27, %v6907_v60  ;;  %v4211_v44 = vmul.f32 %v4066_v39, %v1106_v15  ;;  %v1109_v28 = vsub.f32 %v865_v33, %v6909_v37  ;;  %v4220_v13 = vld [vmem:[#allocation2 + $0xe0] sm:$0xff]  ;;  %v6911_v27 = vld [vmem:[#allocation16_spill] sm:$0xff]  ;;  %v6913_v33 = vld [vmem:[#allocation17_spill] sm:$0xff] }
  0xdf   :  { %6906 = vst [vmem:[#allocation130_spill] sm:$0xff] %v4204_v10  ;;  %2472 = vlog2.f32 %v4206_v7  ;;  %v2449_v55 = vpop.eup %2448  ;;  %v869_v8 = vmul.f32 0.6931472, %v2447_v63  ;;  %v4218_v54 = vmul.f32 %v4078_v22, %v1107_v4  ;;  %v1110_v39 = vsub.f32 %v867_v57, %v6911_v27  ;;  %v4227_v60 = vld [vmem:[#allocation2 + $0xe8] sm:$0xff]  ;;  %v4234_v37 = vld [vmem:[#allocation2 + $0xf0] sm:$0xff]  ;;  %v6915_v57 = vld [vmem:[#allocation18_spill] sm:$0xff] }
  0xe0   :  { %6908 = vst [vmem:[#allocation131_spill] sm:$0xff] %v4211_v44  ;;  %2474 = vlog2.f32 %v4213_v1  ;;  %v2451_v11 = vpop.eup %2450  ;;  %v871_v10 = vmul.f32 0.6931472, %v2449_v55  ;;  %v4225_v15 = vmul.f32 %v4090_v40, %v1108_v32  ;;  %v4232_v4 = vmul.f32 %v4102_v49, %v1109_v28  ;;  %v4241_v27 = vld [vmem:[#allocation2 + $0xf8] sm:$0xff] }
  0xe1   :  { %6910 = vst [vmem:[#allocation132_spill] sm:$0xff] %v4218_v54  ;;  %2476 = vlog2.f32 %v4220_v13  ;;  %v2453_v63 = vpop.eup %2452  ;;  %v873_v44 = vmul.f32 0.6931472, %v2451_v11  ;;  %v1111_v22 = vsub.f32 %v869_v8, %v6913_v33  ;;  %v4239_v32 = vmul.f32 %v4112_v18, %v1110_v39  ;;  %v6917_v8 = vld [vmem:[#allocation19_spill] sm:$0xff] }
  0xe2   :  { %6912 = vst [vmem:[#allocation133_spill] sm:$0xff] %v4225_v15  ;;  %2478 = vlog2.f32 %v4227_v60  ;;  %6914 = vst [vmem:[#allocation134_spill] sm:$0xff] %v4232_v4  ;;  %v875_v54 = vmul.f32 0.6931472, %v2453_v63  ;;  %v1112_v40 = vsub.f32 %v871_v10, %v6915_v57  ;;  %v4248_v33 = vld [vmem:[#allocation2 + $0x100] sm:$0xff]  ;;  %v6919_v10 = vld [vmem:[#allocation20_spill] sm:$0xff] }
  0xe3   :  { %v2455_v55 = vpop.eup %2454  ;;  %2480 = vlog2.f32 %v4234_v37  ;;  %6916 = vst [vmem:[#allocation135_spill] sm:$0xff] %v4239_v32  ;;  %v1113_v49 = vsub.f32 %v873_v44, %v6917_v8  ;;  %v4246_v28 = vmul.f32 %v4121_v36, %v1111_v22  ;;  %v4255_v57 = vld [vmem:[#allocation2 + $0x108] sm:$0xff]  ;;  %v6921_v44 = vld [vmem:[#allocation21_spill] sm:$0xff] }
  0xe4   :  { %v2457_v11 = vpop.eup %2456  ;;  %v877_v15 = vmul.f32 0.6931472, %v2455_v55  ;;  %2482 = vlog2.f32 %v4241_v27  ;;  %v1114_v18 = vsub.f32 %v875_v54, %v6919_v10  ;;  %v4253_v39 = vmul.f32 %v4128_v35, %v1112_v40  ;;  %v4262_v8 = vld [vmem:[#allocation2 + $0x110] sm:$0xff]  ;;  %v6923_v54 = vld [vmem:[#allocation22_spill] sm:$0xff] }
  0xe5   :  { %6918 = vst [vmem:[#allocation136_spill] sm:$0xff] %v4246_v28  ;;  %v2459_v63 = vpop.eup %2458  ;;  %v879_v4 = vmul.f32 0.6931472, %v2457_v11  ;;  %2484 = vlog2.f32 %v4248_v33  ;;  %v4260_v22 = vmul.f32 %v4135_v20, %v1113_v49  ;;  %v4269_v10 = vld [vmem:[#allocation2 + $0x118] sm:$0xff] }
  0xe6   :  { %6920 = vst [vmem:[#allocation137_spill] sm:$0xff] %v4253_v39  ;;  %v2461_v55 = vpop.eup %2460  ;;  %v881_v32 = vmul.f32 0.6931472, %v2459_v63  ;;  %2486 = vlog2.f32 %v4255_v57  ;;  %v1115_v36 = vsub.f32 %v877_v15, %v6921_v44  ;;  %v4267_v40 = vmul.f32 %v4140_v59, %v1114_v18  ;;  %v6925_v15 = vld [vmem:[#allocation23_spill] sm:$0xff] }
  0xe7   :  { %6922 = vst [vmem:[#allocation138_spill] sm:$0xff] %v4260_v22  ;;  %v2463_v11 = vpop.eup %2462  ;;  %v883_v28 = vmul.f32 0.6931472, %v2461_v55  ;;  %2488 = vlog2.f32 %v4262_v8  ;;  %v1116_v35 = vsub.f32 %v879_v4, %v6923_v54  ;;  %v4276_v44 = vld [vmem:[#allocation2 + $0x120] sm:$0xff]  ;;  %v6927_v4 = vld [vmem:[#allocation24_spill] sm:$0xff] }
  0xe8   :  { %6924 = vst [vmem:[#allocation139_spill] sm:$0xff] %v4267_v40  ;;  %v2465_v63 = vpop.eup %2464  ;;  %v885_v39 = vmul.f32 0.6931472, %v2463_v11  ;;  %2490 = vlog2.f32 %v4269_v10  ;;  %v1117_v20 = vsub.f32 %v881_v32, %v6925_v15  ;;  %v4274_v49 = vmul.f32 %v4146_v16, %v1115_v36  ;;  %v4283_v54 = vld [vmem:[#allocation2 + $0x128] sm:$0xff]  ;;  %v6929_v32 = vld [vmem:[#allocation25_spill] sm:$0xff] }
  0xe9   :  { %v2467_v55 = vpop.eup %2466  ;;  %v887_v22 = vmul.f32 0.6931472, %v2465_v63  ;;  %2492 = vlog2.f32 %v4276_v44  ;;  %v1118_v59 = vsub.f32 %v883_v28, %v6927_v4  ;;  %v4281_v18 = vmul.f32 %v4150_v2, %v1116_v35  ;;  %v4290_v15 = vld [vmem:[#allocation2 + $0x130] sm:$0xff]  ;;  %v6931_v28 = vld [vmem:[#allocation26_spill] sm:$0xff] }
  0xea   :  { %6926 = vst [vmem:[#allocation140_spill] sm:$0xff] %v4274_v49  ;;  %v2469_v11 = vpop.eup %2468  ;;  %v889_v40 = vmul.f32 0.6931472, %v2467_v55  ;;  %2494 = vlog2.f32 %v4283_v54  ;;  %v1119_v16 = vsub.f32 %v885_v39, %v6929_v32  ;;  %v4288_v36 = vmul.f32 %v4157_v21, %v1117_v20  ;;  %v4297_v4 = vld [vmem:[#allocation2 + $0x138] sm:$0xff]  ;;  %v6933_v39 = vld [vmem:[#allocation27_spill] sm:$0xff] }
  0xeb   :  { %6928 = vst [vmem:[#allocation141_spill] sm:$0xff] %v4281_v18  ;;  %v2471_v63 = vpop.eup %2470  ;;  %v891_v49 = vmul.f32 0.6931472, %v2469_v11  ;;  %2496 = vlog2.f32 %v4290_v15  ;;  %v1120_v2 = vsub.f32 %v887_v22, %v6931_v28  ;;  %v4295_v35 = vmul.f32 %v4164_v24, %v1118_v59  ;;  %v4304_v32 = vld [vmem:[#allocation2 + $0x140] sm:$0xff]  ;;  %v6935_v22 = vld [vmem:[#allocation28_spill] sm:$0xff] }
  0xec   :  { %6930 = vst [vmem:[#allocation142_spill] sm:$0xff] %v4288_v36  ;;  %v2473_v55 = vpop.eup %2472  ;;  %v893_v18 = vmul.f32 0.6931472, %v2471_v63  ;;  %2498 = vlog2.f32 %v4297_v4  ;;  %v1121_v21 = vsub.f32 %v889_v40, %v6933_v39  ;;  %v4302_v20 = vmul.f32 %v4171_v34, %v1119_v16  ;;  %v4311_v28 = vld [vmem:[#allocation2 + $0x148] sm:$0xff]  ;;  %v6937_v40 = vld [vmem:[#allocation29_spill] sm:$0xff] }
  0xed   :  { %6932 = vst [vmem:[#allocation143_spill] sm:$0xff] %v4295_v35  ;;  %v2475_v11 = vpop.eup %2474  ;;  %v895_v36 = vmul.f32 0.6931472, %v2473_v55  ;;  %2500 = vlog2.f32 %v4304_v32  ;;  %v1122_v24 = vsub.f32 %v891_v49, %v6935_v22  ;;  %v4309_v59 = vmul.f32 %v4178_v42, %v1120_v2  ;;  %v4318_v39 = vld [vmem:[#allocation2 + $0x150] sm:$0xff]  ;;  %v6939_v49 = vld [vmem:[#allocation30_spill] sm:$0xff] }
  0xee   :  { %6934 = vst [vmem:[#allocation144_spill] sm:$0xff] %v4302_v20  ;;  %v2477_v63 = vpop.eup %2476  ;;  %v897_v35 = vmul.f32 0.6931472, %v2475_v11  ;;  %2502 = vlog2.f32 %v4311_v28  ;;  %v1123_v34 = vsub.f32 %v893_v18, %v6937_v40  ;;  %v4316_v16 = vmul.f32 %v4185_v25, %v1121_v21  ;;  %v4325_v22 = vld [vmem:[#allocation2 + $0x158] sm:$0xff]  ;;  %v6941_v18 = vld [vmem:[#allocation31_spill] sm:$0xff] }
  0xef   :  { %6936 = vst [vmem:[#allocation145_spill] sm:$0xff] %v4309_v59  ;;  %v2479_v55 = vpop.eup %2478  ;;  %v899_v20 = vmul.f32 0.6931472, %v2477_v63  ;;  %2504 = vlog2.f32 %v4318_v39  ;;  %v1124_v42 = vsub.f32 %v895_v36, %v6939_v49  ;;  %v4323_v2 = vmul.f32 %v4192_v6, %v1122_v24  ;;  %v4332_v40 = vld [vmem:[#allocation2 + $0x160] sm:$0xff]  ;;  %v6943_v36 = vld [vmem:[#allocation32_spill] sm:$0xff] }
  0xf0   :  { %6938 = vst [vmem:[#allocation146_spill] sm:$0xff] %v4316_v16  ;;  %v2481_v11 = vpop.eup %2480  ;;  %v901_v59 = vmul.f32 0.6931472, %v2479_v55  ;;  %2506 = vlog2.f32 %v4325_v22  ;;  %v1125_v25 = vsub.f32 %v897_v35, %v6941_v18  ;;  %v4330_v21 = vmul.f32 %v4199_v12, %v1123_v34  ;;  %v4339_v49 = vld [vmem:[#allocation2 + $0x168] sm:$0xff]  ;;  %v6945_v35 = vld [vmem:[#allocation33_spill] sm:$0xff] }
  0xf1   :  { %6940 = vst [vmem:[#allocation147_spill] sm:$0xff] %v4323_v2  ;;  %v2483_v63 = vpop.eup %2482  ;;  %v903_v16 = vmul.f32 0.6931472, %v2481_v11  ;;  %2508 = vlog2.f32 %v4332_v40  ;;  %v1126_v6 = vsub.f32 %v899_v20, %v6943_v36  ;;  %v4337_v24 = vmul.f32 %v4206_v7, %v1124_v42  ;;  %v4346_v18 = vld [vmem:[#allocation2 + $0x170] sm:$0xff]  ;;  %v6947_v20 = vld [vmem:[#allocation34_spill] sm:$0xff] }
  0xf2   :  { %6942 = vst [vmem:[#allocation148_spill] sm:$0xff] %v4330_v21  ;;  %v2485_v55 = vpop.eup %2484  ;;  %v905_v2 = vmul.f32 0.6931472, %v2483_v63  ;;  %2510 = vlog2.f32 %v4339_v49  ;;  %v1127_v12 = vsub.f32 %v901_v59, %v6945_v35  ;;  %v4344_v34 = vmul.f32 %v4213_v1, %v1125_v25  ;;  %v4353_v36 = vld [vmem:[#allocation2 + $0x178] sm:$0xff]  ;;  %v6949_v59 = vld [vmem:[#allocation35_spill] sm:$0xff] }
  0xf3   :  { %6944 = vst [vmem:[#allocation149_spill] sm:$0xff] %v4337_v24  ;;  %v2487_v11 = vpop.eup %2486  ;;  %v907_v21 = vmul.f32 0.6931472, %v2485_v55  ;;  %2512 = vlog2.f32 %v4346_v18  ;;  %v1128_v7 = vsub.f32 %v903_v16, %v6947_v20  ;;  %v4351_v42 = vmul.f32 %v4220_v13, %v1126_v6  ;;  %v4360_v35 = vld [vmem:[#allocation2 + $0x180] sm:$0xff]  ;;  %v6951_v16 = vld [vmem:[#allocation36_spill] sm:$0xff] }
  0xf4   :  { %6946 = vst [vmem:[#allocation150_spill] sm:$0xff] %v4344_v34  ;;  %v2489_v63 = vpop.eup %2488  ;;  %v909_v24 = vmul.f32 0.6931472, %v2487_v11  ;;  %2514 = vlog2.f32 %v4353_v36  ;;  %v1129_v1 = vsub.f32 %v905_v2, %v6949_v59  ;;  %v4358_v25 = vmul.f32 %v4227_v60, %v1127_v12  ;;  %v4367_v20 = vld [vmem:[#allocation2 + $0x188] sm:$0xff]  ;;  %v6953_v2 = vld [vmem:[#allocation37_spill] sm:$0xff] }
  0xf5   :  { %6948 = vst [vmem:[#allocation151_spill] sm:$0xff] %v4351_v42  ;;  %v2491_v55 = vpop.eup %2490  ;;  %v911_v34 = vmul.f32 0.6931472, %v2489_v63  ;;  %2516 = vlog2.f32 %v4360_v35  ;;  %v1130_v13 = vsub.f32 %v907_v21, %v6951_v16  ;;  %v4365_v6 = vmul.f32 %v4234_v37, %v1128_v7  ;;  %v4374_v59 = vld [vmem:[#allocation2 + $0x190] sm:$0xff]  ;;  %v6955_v21 = vld [vmem:[#allocation38_spill] sm:$0xff] }
  0xf6   :  { %6950 = vst [vmem:[#allocation152_spill] sm:$0xff] %v4358_v25  ;;  %v2493_v11 = vpop.eup %2492  ;;  %v913_v42 = vmul.f32 0.6931472, %v2491_v55  ;;  %2518 = vlog2.f32 %v4367_v20  ;;  %v1131_v60 = vsub.f32 %v909_v24, %v6953_v2  ;;  %v4372_v12 = vmul.f32 %v4241_v27, %v1129_v1  ;;  %v4381_v16 = vld [vmem:[#allocation2 + $0x198] sm:$0xff]  ;;  %v6957_v24 = vld [vmem:[#allocation39_spill] sm:$0xff] }
  0xf7   :  { %6952 = vst [vmem:[#allocation153_spill] sm:$0xff] %v4365_v6  ;;  %v2495_v63 = vpop.eup %2494  ;;  %v915_v25 = vmul.f32 0.6931472, %v2493_v11  ;;  %2520 = vlog2.f32 %v4374_v59  ;;  %v1132_v37 = vsub.f32 %v911_v34, %v6955_v21  ;;  %v4379_v7 = vmul.f32 %v4248_v33, %v1130_v13  ;;  %v4388_v2 = vld [vmem:[#allocation2 + $0x1a0] sm:$0xff]  ;;  %v6959_v34 = vld [vmem:[#allocation40_spill] sm:$0xff] }
  0xf8   :  { %6954 = vst [vmem:[#allocation154_spill] sm:$0xff] %v4372_v12  ;;  %v2497_v55 = vpop.eup %2496  ;;  %v917_v6 = vmul.f32 0.6931472, %v2495_v63  ;;  %2522 = vlog2.f32 %v4381_v16  ;;  %v1133_v27 = vsub.f32 %v913_v42, %v6957_v24  ;;  %v4386_v1 = vmul.f32 %v4255_v57, %v1131_v60  ;;  %v4395_v21 = vld [vmem:[#allocation2 + $0x1a8] sm:$0xff]  ;;  %v6961_v42 = vld [vmem:[#allocation41_spill] sm:$0xff] }
  0xf9   :  { %6956 = vst [vmem:[#allocation155_spill] sm:$0xff] %v4379_v7  ;;  %v2499_v11 = vpop.eup %2498  ;;  %v919_v12 = vmul.f32 0.6931472, %v2497_v55  ;;  %2524 = vlog2.f32 %v4388_v2  ;;  %v1134_v33 = vsub.f32 %v915_v25, %v6959_v34  ;;  %v4393_v13 = vmul.f32 %v4262_v8, %v1132_v37  ;;  %v4402_v24 = vld [vmem:[#allocation2 + $0x1b0] sm:$0xff]  ;;  %v6963_v25 = vld [vmem:[#allocation42_spill] sm:$0xff] }
  0xfa   :  { %6958 = vst [vmem:[#allocation156_spill] sm:$0xff] %v4386_v1  ;;  %v2501_v63 = vpop.eup %2500  ;;  %v921_v7 = vmul.f32 0.6931472, %v2499_v11  ;;  %2526 = vlog2.f32 %v4395_v21  ;;  %v1135_v57 = vsub.f32 %v917_v6, %v6961_v42  ;;  %v4400_v60 = vmul.f32 %v4269_v10, %v1133_v27  ;;  %v4409_v34 = vld [vmem:[#allocation2 + $0x1b8] sm:$0xff]  ;;  %v6965_v6 = vld [vmem:[#allocation43_spill] sm:$0xff] }
  0xfb   :  { %6960 = vst [vmem:[#allocation157_spill] sm:$0xff] %v4393_v13  ;;  %v2503_v55 = vpop.eup %2502  ;;  %v923_v1 = vmul.f32 0.6931472, %v2501_v63  ;;  %2528 = vlog2.f32 %v4402_v24  ;;  %v1136_v8 = vsub.f32 %v919_v12, %v6963_v25  ;;  %v4407_v37 = vmul.f32 %v4276_v44, %v1134_v33  ;;  %v4416_v42 = vld [vmem:[#allocation2 + $0x1c0] sm:$0xff]  ;;  %v6967_v12 = vld [vmem:[#allocation44_spill] sm:$0xff] }
  0xfc   :  { %6962 = vst [vmem:[#allocation158_spill] sm:$0xff] %v4400_v60  ;;  %v2505_v11 = vpop.eup %2504  ;;  %v925_v13 = vmul.f32 0.6931472, %v2503_v55  ;;  %2530 = vlog2.f32 %v4409_v34  ;;  %v1137_v10 = vsub.f32 %v921_v7, %v6965_v6  ;;  %v4414_v27 = vmul.f32 %v4283_v54, %v1135_v57  ;;  %v4423_v25 = vld [vmem:[#allocation2 + $0x1c8] sm:$0xff]  ;;  %v6969_v7 = vld [vmem:[#allocation45_spill] sm:$0xff] }
  0xfd   :  { %6964 = vst [vmem:[#allocation159_spill] sm:$0xff] %v4407_v37  ;;  %v2507_v63 = vpop.eup %2506  ;;  %v927_v60 = vmul.f32 0.6931472, %v2505_v11  ;;  %2532 = vlog2.f32 %v4416_v42  ;;  %v1138_v44 = vsub.f32 %v923_v1, %v6967_v12  ;;  %v4421_v33 = vmul.f32 %v4290_v15, %v1136_v8  ;;  %v4430_v6 = vld [vmem:[#allocation2 + $0x1d0] sm:$0xff]  ;;  %v6971_v1 = vld [vmem:[#allocation46_spill] sm:$0xff] }
  0xfe   :  { %6966 = vst [vmem:[#allocation160_spill] sm:$0xff] %v4414_v27  ;;  %v2509_v55 = vpop.eup %2508  ;;  %v929_v37 = vmul.f32 0.6931472, %v2507_v63  ;;  %2534 = vlog2.f32 %v4423_v25  ;;  %v1139_v54 = vsub.f32 %v925_v13, %v6969_v7  ;;  %v4428_v57 = vmul.f32 %v4297_v4, %v1137_v10  ;;  %v4437_v12 = vld [vmem:[#allocation2 + $0x1d8] sm:$0xff]  ;;  %v6973_v13 = vld [vmem:[#allocation47_spill] sm:$0xff] }
  0xff   :  { %6968 = vst [vmem:[#allocation161_spill] sm:$0xff] %v4421_v33  ;;  %v2511_v11 = vpop.eup %2510  ;;  %v931_v27 = vmul.f32 0.6931472, %v2509_v55  ;;  %2536 = vlog2.f32 %v4430_v6  ;;  %v1140_v15 = vsub.f32 %v927_v60, %v6971_v1  ;;  %v4435_v8 = vmul.f32 %v4304_v32, %v1138_v44  ;;  %v4444_v7 = vld [vmem:[#allocation2 + $0x1e0] sm:$0xff]  ;;  %v6975_v60 = vld [vmem:[#allocation48_spill] sm:$0xff] }
 0x100   :  { %6970 = vst [vmem:[#allocation162_spill] sm:$0xff] %v4428_v57  ;;  %v2513_v63 = vpop.eup %2512  ;;  %v933_v33 = vmul.f32 0.6931472, %v2511_v11  ;;  %2538 = vlog2.f32 %v4437_v12  ;;  %v1141_v4 = vsub.f32 %v929_v37, %v6973_v13  ;;  %v4442_v10 = vmul.f32 %v4311_v28, %v1139_v54  ;;  %v4451_v1 = vld [vmem:[#allocation2 + $0x1e8] sm:$0xff]  ;;  %v6977_v37 = vld [vmem:[#allocation49_spill] sm:$0xff] }
 0x101   :  { %6972 = vst [vmem:[#allocation163_spill] sm:$0xff] %v4435_v8  ;;  %v2515_v55 = vpop.eup %2514  ;;  %v935_v57 = vmul.f32 0.6931472, %v2513_v63  ;;  %2540 = vlog2.f32 %v4444_v7  ;;  %v1142_v32 = vsub.f32 %v931_v27, %v6975_v60  ;;  %v4449_v44 = vmul.f32 %v4318_v39, %v1140_v15  ;;  %v4458_v13 = vld [vmem:[#allocation2 + $0x1f0] sm:$0xff]  ;;  %v6979_v27 = vld [vmem:[#allocation50_spill] sm:$0xff] }
 0x102   :  { %6974 = vst [vmem:[#allocation164_spill] sm:$0xff] %v4442_v10  ;;  %v2517_v11 = vpop.eup %2516  ;;  %v937_v8 = vmul.f32 0.6931472, %v2515_v55  ;;  %2542 = vlog2.f32 %v4451_v1  ;;  %v1143_v28 = vsub.f32 %v933_v33, %v6977_v37  ;;  %v4456_v54 = vmul.f32 %v4325_v22, %v1141_v4  ;;  %v4465_v60 = vld [vmem:[#allocation2 + $0x1f8] sm:$0xff]  ;;  %v6981_v33 = vld [vmem:[#allocation51_spill] sm:$0xff] }
 0x103   :  { %6976 = vst [vmem:[#allocation165_spill] sm:$0xff] %v4449_v44  ;;  %v2519_v63 = vpop.eup %2518  ;;  %v939_v10 = vmul.f32 0.6931472, %v2517_v11  ;;  %2544 = vlog2.f32 %v4458_v13  ;;  %v1144_v39 = vsub.f32 %v935_v57, %v6979_v27  ;;  %v4463_v15 = vmul.f32 %v4332_v40, %v1142_v32  ;;  %v4472_v37 = vld [vmem:[#allocation2 + $0x200] sm:$0xff]  ;;  %v6983_v57 = vld [vmem:[#allocation52_spill] sm:$0xff] }
 0x104   :  { %6978 = vst [vmem:[#allocation166_spill] sm:$0xff] %v4456_v54  ;;  %v2521_v55 = vpop.eup %2520  ;;  %v941_v44 = vmul.f32 0.6931472, %v2519_v63  ;;  %2546 = vlog2.f32 %v4465_v60  ;;  %v1145_v22 = vsub.f32 %v937_v8, %v6981_v33  ;;  %v4470_v4 = vmul.f32 %v4339_v49, %v1143_v28  ;;  %v4479_v27 = vld [vmem:[#allocation2 + $0x208] sm:$0xff]  ;;  %v6985_v8 = vld [vmem:[#allocation53_spill] sm:$0xff] }
 0x105   :  { %6980 = vst [vmem:[#allocation167_spill] sm:$0xff] %v4463_v15  ;;  %v2523_v11 = vpop.eup %2522  ;;  %v943_v54 = vmul.f32 0.6931472, %v2521_v55  ;;  %2548 = vlog2.f32 %v4472_v37  ;;  %v1146_v40 = vsub.f32 %v939_v10, %v6983_v57  ;;  %v4477_v32 = vmul.f32 %v4346_v18, %v1144_v39  ;;  %v4486_v33 = vld [vmem:[#allocation2 + $0x210] sm:$0xff]  ;;  %v6987_v10 = vld [vmem:[#allocation54_spill] sm:$0xff] }
 0x106   :  { %6982 = vst [vmem:[#allocation168_spill] sm:$0xff] %v4470_v4  ;;  %v2525_v63 = vpop.eup %2524  ;;  %v945_v15 = vmul.f32 0.6931472, %v2523_v11  ;;  %2550 = vlog2.f32 %v4479_v27  ;;  %v1147_v49 = vsub.f32 %v941_v44, %v6985_v8  ;;  %v4484_v28 = vmul.f32 %v4353_v36, %v1145_v22  ;;  %v4493_v57 = vld [vmem:[#allocation2 + $0x218] sm:$0xff]  ;;  %v6989_v44 = vld [vmem:[#allocation55_spill] sm:$0xff] }
 0x107   :  { %6984 = vst [vmem:[#allocation169_spill] sm:$0xff] %v4477_v32  ;;  %v2527_v55 = vpop.eup %2526  ;;  %v947_v4 = vmul.f32 0.6931472, %v2525_v63  ;;  %2552 = vlog2.f32 %v4486_v33  ;;  %v1148_v18 = vsub.f32 %v943_v54, %v6987_v10  ;;  %v4491_v39 = vmul.f32 %v4360_v35, %v1146_v40  ;;  %v4500_v8 = vld [vmem:[#allocation2 + $0x220] sm:$0xff]  ;;  %v6991_v54 = vld [vmem:[#allocation56_spill] sm:$0xff] }
 0x108   :  { %6986 = vst [vmem:[#allocation170_spill] sm:$0xff] %v4484_v28  ;;  %v2529_v11 = vpop.eup %2528  ;;  %v949_v32 = vmul.f32 0.6931472, %v2527_v55  ;;  %2554 = vlog2.f32 %v4493_v57  ;;  %v1149_v36 = vsub.f32 %v945_v15, %v6989_v44  ;;  %v4498_v22 = vmul.f32 %v4367_v20, %v1147_v49  ;;  %v4507_v10 = vld [vmem:[#allocation2 + $0x228] sm:$0xff]  ;;  %v6993_v15 = vld [vmem:[#allocation57_spill] sm:$0xff] }
 0x109   :  { %6988 = vst [vmem:[#allocation171_spill] sm:$0xff] %v4491_v39  ;;  %v2531_v63 = vpop.eup %2530  ;;  %v951_v28 = vmul.f32 0.6931472, %v2529_v11  ;;  %2556 = vlog2.f32 %v4500_v8  ;;  %v1150_v35 = vsub.f32 %v947_v4, %v6991_v54  ;;  %v4505_v40 = vmul.f32 %v4374_v59, %v1148_v18  ;;  %v4514_v44 = vld [vmem:[#allocation2 + $0x230] sm:$0xff]  ;;  %v6995_v4 = vld [vmem:[#allocation58_spill] sm:$0xff] }
 0x10a   :  { %6990 = vst [vmem:[#allocation172_spill] sm:$0xff] %v4498_v22  ;;  %v2533_v55 = vpop.eup %2532  ;;  %v953_v39 = vmul.f32 0.6931472, %v2531_v63  ;;  %2558 = vlog2.f32 %v4507_v10  ;;  %v1151_v20 = vsub.f32 %v949_v32, %v6993_v15  ;;  %v4512_v49 = vmul.f32 %v4381_v16, %v1149_v36  ;;  %v4521_v54 = vld [vmem:[#allocation2 + $0x238] sm:$0xff]  ;;  %v6997_v32 = vld [vmem:[#allocation59_spill] sm:$0xff] }
 0x10b   :  { %6992 = vst [vmem:[#allocation173_spill] sm:$0xff] %v4505_v40  ;;  %v2535_v11 = vpop.eup %2534  ;;  %v955_v22 = vmul.f32 0.6931472, %v2533_v55  ;;  %2560 = vlog2.f32 %v4514_v44  ;;  %v1152_v59 = vsub.f32 %v951_v28, %v6995_v4  ;;  %v4519_v18 = vmul.f32 %v4388_v2, %v1150_v35  ;;  %v4528_v15 = vld [vmem:[#allocation2 + $0x240] sm:$0xff]  ;;  %v6999_v28 = vld [vmem:[#allocation60_spill] sm:$0xff] }
 0x10c   :  { %6994 = vst [vmem:[#allocation174_spill] sm:$0xff] %v4512_v49  ;;  %v2537_v63 = vpop.eup %2536  ;;  %v957_v40 = vmul.f32 0.6931472, %v2535_v11  ;;  %2562 = vlog2.f32 %v4521_v54  ;;  %v1153_v16 = vsub.f32 %v953_v39, %v6997_v32  ;;  %v4526_v36 = vmul.f32 %v4395_v21, %v1151_v20  ;;  %v4535_v4 = vld [vmem:[#allocation2 + $0x248] sm:$0xff]  ;;  %v7001_v39 = vld [vmem:[#allocation61_spill] sm:$0xff] }
 0x10d   :  { %6996 = vst [vmem:[#allocation175_spill] sm:$0xff] %v4519_v18  ;;  %v2539_v55 = vpop.eup %2538  ;;  %v959_v49 = vmul.f32 0.6931472, %v2537_v63  ;;  %2564 = vlog2.f32 %v4528_v15  ;;  %v1154_v2 = vsub.f32 %v955_v22, %v6999_v28  ;;  %v4533_v35 = vmul.f32 %v4402_v24, %v1152_v59  ;;  %v4542_v32 = vld [vmem:[#allocation2 + $0x250] sm:$0xff]  ;;  %v7003_v22 = vld [vmem:[#allocation62_spill] sm:$0xff] }
 0x10e   :  { %6998 = vst [vmem:[#allocation176_spill] sm:$0xff] %v4526_v36  ;;  %v2541_v11 = vpop.eup %2540  ;;  %v961_v18 = vmul.f32 0.6931472, %v2539_v55  ;;  %2566 = vlog2.f32 %v4535_v4  ;;  %v1155_v21 = vsub.f32 %v957_v40, %v7001_v39  ;;  %v4540_v20 = vmul.f32 %v4409_v34, %v1153_v16  ;;  %v4549_v28 = vld [vmem:[#allocation2 + $0x258] sm:$0xff]  ;;  %v7005_v40 = vld [vmem:[#allocation63_spill] sm:$0xff] }
 0x10f   :  { %7000 = vst [vmem:[#allocation177_spill] sm:$0xff] %v4533_v35  ;;  %v2543_v63 = vpop.eup %2542  ;;  %v963_v36 = vmul.f32 0.6931472, %v2541_v11  ;;  %2568 = vlog2.f32 %v4542_v32  ;;  %v1156_v24 = vsub.f32 %v959_v49, %v7003_v22  ;;  %v4547_v59 = vmul.f32 %v4416_v42, %v1154_v2  ;;  %v4556_v39 = vld [vmem:[#allocation2 + $0x260] sm:$0xff]  ;;  %v7007_v49 = vld [vmem:[#allocation64_spill] sm:$0xff] }
 0x110   :  { %7002 = vst [vmem:[#allocation178_spill] sm:$0xff] %v4540_v20  ;;  %v2545_v55 = vpop.eup %2544  ;;  %v965_v35 = vmul.f32 0.6931472, %v2543_v63  ;;  %2570 = vlog2.f32 %v4549_v28  ;;  %v1157_v34 = vsub.f32 %v961_v18, %v7005_v40  ;;  %v4554_v16 = vmul.f32 %v4423_v25, %v1155_v21  ;;  %v4563_v22 = vld [vmem:[#allocation2 + $0x268] sm:$0xff]  ;;  %v7009_v18 = vld [vmem:[#allocation65_spill] sm:$0xff] }
 0x111   :  { %7004 = vst [vmem:[#allocation179_spill] sm:$0xff] %v4547_v59  ;;  %v2547_v11 = vpop.eup %2546  ;;  %v967_v20 = vmul.f32 0.6931472, %v2545_v55  ;;  %2572 = vlog2.f32 %v4556_v39  ;;  %v1158_v42 = vsub.f32 %v963_v36, %v7007_v49  ;;  %v4561_v2 = vmul.f32 %v4430_v6, %v1156_v24  ;;  %v4570_v40 = vld [vmem:[#allocation2 + $0x270] sm:$0xff]  ;;  %v7011_v36 = vld [vmem:[#allocation66_spill] sm:$0xff] }
 0x112   :  { %7006 = vst [vmem:[#allocation180_spill] sm:$0xff] %v4554_v16  ;;  %v2549_v63 = vpop.eup %2548  ;;  %v969_v59 = vmul.f32 0.6931472, %v2547_v11  ;;  %2574 = vlog2.f32 %v4563_v22  ;;  %v1159_v25 = vsub.f32 %v965_v35, %v7009_v18  ;;  %v4568_v21 = vmul.f32 %v4437_v12, %v1157_v34  ;;  %v4577_v49 = vld [vmem:[#allocation2 + $0x278] sm:$0xff]  ;;  %v7013_v35 = vld [vmem:[#allocation67_spill] sm:$0xff] }
 0x113   :  { %7008 = vst [vmem:[#allocation181_spill] sm:$0xff] %v4561_v2  ;;  %v2551_v55 = vpop.eup %2550  ;;  %v971_v16 = vmul.f32 0.6931472, %v2549_v63  ;;  %2576 = vlog2.f32 %v4570_v40  ;;  %v1160_v6 = vsub.f32 %v967_v20, %v7011_v36  ;;  %v4575_v24 = vmul.f32 %v4444_v7, %v1158_v42  ;;  %v4584_v18 = vld [vmem:[#allocation2 + $0x280] sm:$0xff]  ;;  %v7015_v20 = vld [vmem:[#allocation68_spill] sm:$0xff] }
 0x114   :  { %7010 = vst [vmem:[#allocation182_spill] sm:$0xff] %v4568_v21  ;;  %v2553_v11 = vpop.eup %2552  ;;  %v973_v2 = vmul.f32 0.6931472, %v2551_v55  ;;  %2578 = vlog2.f32 %v4577_v49  ;;  %v1161_v12 = vsub.f32 %v969_v59, %v7013_v35  ;;  %v4582_v34 = vmul.f32 %v4451_v1, %v1159_v25  ;;  %v4591_v36 = vld [vmem:[#allocation2 + $0x288] sm:$0xff]  ;;  %v7017_v59 = vld [vmem:[#allocation69_spill] sm:$0xff] }
 0x115   :  { %7012 = vst [vmem:[#allocation183_spill] sm:$0xff] %v4575_v24  ;;  %v2555_v63 = vpop.eup %2554  ;;  %v975_v21 = vmul.f32 0.6931472, %v2553_v11  ;;  %2580 = vlog2.f32 %v4584_v18  ;;  %v1162_v7 = vsub.f32 %v971_v16, %v7015_v20  ;;  %v4589_v42 = vmul.f32 %v4458_v13, %v1160_v6  ;;  %v4598_v35 = vld [vmem:[#allocation2 + $0x290] sm:$0xff]  ;;  %v7019_v16 = vld [vmem:[#allocation70_spill] sm:$0xff] }
 0x116   :  { %7014 = vst [vmem:[#allocation184_spill] sm:$0xff] %v4582_v34  ;;  %v2557_v55 = vpop.eup %2556  ;;  %v977_v24 = vmul.f32 0.6931472, %v2555_v63  ;;  %2582 = vlog2.f32 %v4591_v36  ;;  %v1163_v1 = vsub.f32 %v973_v2, %v7017_v59  ;;  %v4596_v25 = vmul.f32 %v4465_v60, %v1161_v12  ;;  %v4605_v20 = vld [vmem:[#allocation2 + $0x298] sm:$0xff]  ;;  %v7021_v2 = vld [vmem:[#allocation71_spill] sm:$0xff] }
 0x117   :  { %7016 = vst [vmem:[#allocation185_spill] sm:$0xff] %v4589_v42  ;;  %v2559_v11 = vpop.eup %2558  ;;  %v979_v34 = vmul.f32 0.6931472, %v2557_v55  ;;  %2584 = vlog2.f32 %v4598_v35  ;;  %v1164_v13 = vsub.f32 %v975_v21, %v7019_v16  ;;  %v4603_v6 = vmul.f32 %v4472_v37, %v1162_v7  ;;  %v4612_v59 = vld [vmem:[#allocation2 + $0x2a0] sm:$0xff] }
 0x118   :  { %7018 = vst [vmem:[#allocation186_spill] sm:$0xff] %v4596_v25  ;;  %v2561_v63 = vpop.eup %2560  ;;  %v981_v42 = vmul.f32 0.6931472, %v2559_v11  ;;  %2586 = vlog2.f32 %v4605_v20  ;;  %v1165_v60 = vsub.f32 %v977_v24, %v7021_v2  ;;  %v4610_v12 = vmul.f32 %v4479_v27, %v1163_v1 }
 0x119   :  { %7020 = vst [vmem:[#allocation70_spill] sm:$0xff] %v4603_v6  ;;  %v2563_v55 = vpop.eup %2562  ;;  %v983_v25 = vmul.f32 0.6931472, %v2561_v63  ;;  %2588 = vlog2.f32 %v4612_v59  ;;  %v1166_v37 = vsub.f32 %v979_v34, %v3912_v50  ;;  %v4617_v21 = vmul.f32 %v4486_v33, %v1164_v13  ;;  %v4619_v6 = vld [vmem:[#allocation2 + $0x2a8] sm:$0xff] }
 0x11a   :  { %7022 = vst [vmem:[#allocation71_spill] sm:$0xff] %v4610_v12  ;;  %v2565_v7 = vpop.eup %2564  ;;  %v985_v11 = vmul.f32 0.6931472, %v2563_v55  ;;  %2590 = vlog2.f32 %v4619_v6  ;;  %v1167_v27 = vsub.f32 %v981_v42, %v3915_v51  ;;  %v4624_v24 = vmul.f32 %v4493_v57, %v1165_v60  ;;  %v4626_v12 = vld [vmem:[#allocation2 + $0x2b0] sm:$0xff] }
 0x11b   :  { %7023 = vst [vmem:[#allocation187_spill] sm:$0xff] %v4617_v21  ;;  %v2567_v1 = vpop.eup %2566  ;;  %v987_v63 = vmul.f32 0.6931472, %v2565_v7  ;;  %2592 = vlog2.f32 %v4626_v12  ;;  %v1168_v33 = vsub.f32 %v983_v25, %v3918_v38  ;;  %v4631_v34 = vmul.f32 %v4500_v8, %v1166_v37  ;;  %v4633_v21 = vld [vmem:[#allocation2 + $0x2b8] sm:$0xff] }
 0x11c   :  { %7024 = vst [vmem:[#allocation188_spill] sm:$0xff] %v4624_v24  ;;  %v2569_v13 = vpop.eup %2568  ;;  %v989_v55 = vmul.f32 0.6931472, %v2567_v1  ;;  %2594 = vlog2.f32 %v4633_v21  ;;  %v1169_v57 = vsub.f32 %v985_v11, %v3924_v26  ;;  %v4638_v42 = vmul.f32 %v4507_v10, %v1167_v27  ;;  %v4640_v24 = vld [vmem:[#allocation2 + $0x2c0] sm:$0xff] }
 0x11d   :  { %7025 = vst [vmem:[#allocation189_spill] sm:$0xff] %v4631_v34  ;;  %v2571_v60 = vpop.eup %2570  ;;  %v991_v7 = vmul.f32 0.6931472, %v2569_v13  ;;  %2596 = vlog2.f32 %v4640_v24  ;;  %v1170_v8 = vsub.f32 %v987_v63, %v3927_v62  ;;  %v4645_v25 = vmul.f32 %v4514_v44, %v1168_v33  ;;  %v4647_v34 = vld [vmem:[#allocation2 + $0x2c8] sm:$0xff] }
 0x11e   :  { %7026 = vst [vmem:[#allocation190_spill] sm:$0xff] %v4638_v42  ;;  %v2573_v37 = vpop.eup %2572  ;;  %v993_v1 = vmul.f32 0.6931472, %v2571_v60  ;;  %2598 = vlog2.f32 %v4647_v34  ;;  %v1171_v10 = vsub.f32 %v989_v55, %v3930_v58  ;;  %v4652_v11 = vmul.f32 %v4521_v54, %v1169_v57  ;;  %v4654_v42 = vld [vmem:[#allocation2 + $0x2d0] sm:$0xff] }
 0x11f   :  { %7027 = vst [vmem:[#allocation191_spill] sm:$0xff] %v4645_v25  ;;  %v2575_v27 = vpop.eup %2574  ;;  %v995_v13 = vmul.f32 0.6931472, %v2573_v37  ;;  %2600 = vlog2.f32 %v4654_v42  ;;  %v1172_v44 = vsub.f32 %v991_v7, %v3936_v23  ;;  %v4659_v63 = vmul.f32 %v4528_v15, %v1170_v8  ;;  %v4661_v25 = vld [vmem:[#allocation2 + $0x2d8] sm:$0xff] }
 0x120   :  { %7028 = vst [vmem:[#allocation192_spill] sm:$0xff] %v4652_v11  ;;  %v2577_v33 = vpop.eup %2576  ;;  %v997_v60 = vmul.f32 0.6931472, %v2575_v27  ;;  %2602 = vlog2.f32 %v4661_v25  ;;  %v1173_v54 = vsub.f32 %v993_v1, %v3939_v31  ;;  %v4666_v55 = vmul.f32 %v4535_v4, %v1171_v10  ;;  %v4668_v11 = vld [vmem:[#allocation2 + $0x2e0] sm:$0xff] }
 0x121   :  { %7029 = vst [vmem:[#allocation193_spill] sm:$0xff] %v4659_v63  ;;  %v2579_v57 = vpop.eup %2578  ;;  %v999_v37 = vmul.f32 0.6931472, %v2577_v33  ;;  %2604 = vlog2.f32 %v4668_v11  ;;  %v1174_v15 = vsub.f32 %v995_v13, %v3942_v17  ;;  %v4673_v7 = vmul.f32 %v4542_v32, %v1172_v44  ;;  %v4675_v63 = vld [vmem:[#allocation2 + $0x2e8] sm:$0xff] }
 0x122   :  { %7030 = vst [vmem:[#allocation194_spill] sm:$0xff] %v4666_v55  ;;  %v2581_v8 = vpop.eup %2580  ;;  %v1001_v27 = vmul.f32 0.6931472, %v2579_v57  ;;  %2606 = vlog2.f32 %v4675_v63  ;;  %v1175_v4 = vsub.f32 %v997_v60, %v3948_v0  ;;  %v4680_v1 = vmul.f32 %v4549_v28, %v1173_v54  ;;  %v4682_v55 = vld [vmem:[#allocation2 + $0x2f0] sm:$0xff] }
 0x123   :  { %7031 = vst [vmem:[#allocation195_spill] sm:$0xff] %v4673_v7  ;;  %v2583_v10 = vpop.eup %2582  ;;  %v1003_v33 = vmul.f32 0.6931472, %v2581_v8  ;;  %2608 = vlog2.f32 %v4682_v55  ;;  %v1176_v32 = vsub.f32 %v999_v37, %v3951_v41  ;;  %v4687_v13 = vmul.f32 %v4556_v39, %v1174_v15  ;;  %v4689_v7 = vld [vmem:[#allocation2 + $0x2f8] sm:$0xff] }
 0x124   :  { %7032 = vst [vmem:[#allocation196_spill] sm:$0xff] %v4680_v1  ;;  %v2585_v44 = vpop.eup %2584  ;;  %v1005_v57 = vmul.f32 0.6931472, %v2583_v10  ;;  %2610 = vlog2.f32 %v4689_v7  ;;  %v1177_v28 = vsub.f32 %v1001_v27, %v3954_v56  ;;  %v4694_v60 = vmul.f32 %v4563_v22, %v1175_v4  ;;  %v4696_v1 = vld [vmem:[#allocation2 + $0x300] sm:$0xff]  ;;  %v7036_v27 = vld [vmem:[#allocation74_spill] sm:$0xff]  ;;  %v4710_v56 = vld [vmem:[#allocation2 + $0x310] sm:$0xff] }
 0x125   :  { %7033 = vst [vmem:[#allocation197_spill] sm:$0xff] %v4687_v13  ;;  %v2587_v54 = vpop.eup %2586  ;;  %v1007_v8 = vmul.f32 0.6931472, %v2585_v44  ;;  %2612 = vlog2.f32 %v4696_v1  ;;  %v1178_v39 = vsub.f32 %v1003_v33, %v3960_v29  ;;  %v4701_v37 = vmul.f32 %v4570_v40, %v1176_v32  ;;  %v4703_v13 = vld [vmem:[#allocation2 + $0x308] sm:$0xff]  ;;  %v7038_v33 = vld [vmem:[#allocation75_spill] sm:$0xff]  ;;  %v4717_v29 = vld [vmem:[#allocation2 + $0x318] sm:$0xff] }
 0x126   :  { %7034 = vst [vmem:[#allocation198_spill] sm:$0xff] %v4694_v60  ;;  %v2589_v15 = vpop.eup %2588  ;;  %v1009_v10 = vmul.f32 0.6931472, %v2587_v54  ;;  %2614 = vlog2.f32 %v4703_v13  ;;  %v1179_v22 = vsub.f32 %v1005_v57, %v7036_v27  ;;  %v4708_v4 = vmul.f32 %v4577_v49, %v1177_v28  ;;  %v7040_v57 = vld [vmem:[#allocation76_spill] sm:$0xff]  ;;  %v4724_v27 = vld [vmem:[#allocation2 + $0x320] sm:$0xff] }
 0x127   :  { %7035 = vst [vmem:[#allocation199_spill] sm:$0xff] %v4701_v37  ;;  %v2591_v44 = vpop.eup %2590  ;;  %v1011_v60 = vmul.f32 0.6931472, %v2589_v15  ;;  %2616 = vlog2.f32 %v4710_v56  ;;  %v1180_v40 = vsub.f32 %v1007_v8, %v7038_v33  ;;  %v4715_v32 = vmul.f32 %v4584_v18, %v1178_v39 }
 0x128   :  { %7037 = vst [vmem:[#allocation200_spill] sm:$0xff] %v4708_v4  ;;  %v2593_v54 = vpop.eup %2592  ;;  %v1013_v37 = vmul.f32 0.6931472, %v2591_v44  ;;  %2618 = vlog2.f32 %v4717_v29  ;;  %v1181_v49 = vsub.f32 %v1009_v10, %v7040_v57  ;;  %v4722_v28 = vmul.f32 %v4591_v36, %v1179_v22  ;;  %v7043_v10 = vld [vmem:[#allocation78_spill] sm:$0xff]  ;;  %v4738_v57 = vld [vmem:[#allocation2 + $0x330] sm:$0xff] }
 0x129   :  { %7039 = vst [vmem:[#allocation75_spill] sm:$0xff] %v4715_v32  ;;  %v2595_v15 = vpop.eup %2594  ;;  %v1015_v4 = vmul.f32 0.6931472, %v2593_v54  ;;  %2620 = vlog2.f32 %v4724_v27  ;;  %v1182_v18 = vsub.f32 %v1011_v60, %v3977_v19  ;;  %v4729_v8 = vmul.f32 %v4598_v35, %v1180_v40  ;;  %v4731_v32 = vld [vmem:[#allocation2 + $0x328] sm:$0xff]  ;;  %v7045_v60 = vld [vmem:[#allocation79_spill] sm:$0xff]  ;;  %v4745_v19 = vld [vmem:[#allocation2 + $0x338] sm:$0xff] }
 0x12a   :  { %7041 = vst [vmem:[#allocation201_spill] sm:$0xff] %v4722_v28  ;;  %v2597_v39 = vpop.eup %2596  ;;  %v1017_v44 = vmul.f32 0.6931472, %v2595_v15  ;;  %2622 = vlog2.f32 %v4731_v32  ;;  %v1183_v36 = vsub.f32 %v1013_v37, %v7043_v10  ;;  %v4736_v22 = vmul.f32 %v4605_v20, %v1181_v49 }
 0x12b   :  { %7042 = vst [vmem:[#allocation202_spill] sm:$0xff] %v4729_v8  ;;  %v2599_v54 = vpop.eup %2598  ;;  %v1019_v28 = vmul.f32 0.6931472, %v2597_v39  ;;  %2624 = vlog2.f32 %v4738_v57  ;;  %v1184_v35 = vsub.f32 %v1015_v4, %v7045_v60  ;;  %v4743_v40 = vmul.f32 %v4612_v59, %v1182_v18  ;;  %v7048_v4 = vld [vmem:[#allocation81_spill] sm:$0xff]  ;;  %v4759_v60 = vld [vmem:[#allocation2 + $0x348] sm:$0xff] }
 0x12c   :  { %7044 = vst [vmem:[#allocation78_spill] sm:$0xff] %v4736_v22  ;;  %v2601_v15 = vpop.eup %2600  ;;  %v1021_v8 = vmul.f32 0.6931472, %v2599_v54  ;;  %2626 = vlog2.f32 %v4745_v19  ;;  %v1185_v20 = vsub.f32 %v1017_v44, %v3989_v53  ;;  %v4750_v37 = vmul.f32 %v4619_v6, %v1183_v36  ;;  %v4752_v22 = vld [vmem:[#allocation2 + $0x340] sm:$0xff]  ;;  %v7050_v44 = vld [vmem:[#allocation84_spill] sm:$0xff]  ;;  %v4766_v53 = vld [vmem:[#allocation2 + $0x350] sm:$0xff] }
 0x12d   :  { %7046 = vst [vmem:[#allocation203_spill] sm:$0xff] %v4743_v40  ;;  %v2603_v49 = vpop.eup %2602  ;;  %v1023_v39 = vmul.f32 0.6931472, %v2601_v15  ;;  %2628 = vlog2.f32 %v4752_v22  ;;  %v1186_v59 = vsub.f32 %v1019_v28, %v7048_v4  ;;  %v4757_v18 = vmul.f32 %v4626_v12, %v1184_v35 }
 0x12e   :  { %7047 = vst [vmem:[#allocation204_spill] sm:$0xff] %v4750_v37  ;;  %v2605_v54 = vpop.eup %2604  ;;  %v1025_v40 = vmul.f32 0.6931472, %v2603_v49  ;;  %2630 = vlog2.f32 %v4759_v60  ;;  %v1187_v6 = vsub.f32 %v1021_v8, %v7050_v44  ;;  %v4764_v36 = vmul.f32 %v4633_v21, %v1185_v20  ;;  %v7053_v8 = vld [vmem:[#allocation86_spill] sm:$0xff]  ;;  %v4780_v44 = vld [vmem:[#allocation2 + $0x360] sm:$0xff] }
 0x12f   :  { %7049 = vst [vmem:[#allocation81_spill] sm:$0xff] %v4757_v18  ;;  %v2607_v15 = vpop.eup %2606  ;;  %v1027_v37 = vmul.f32 0.6931472, %v2605_v54  ;;  %2632 = vlog2.f32 %v4766_v53  ;;  %v1188_v12 = vsub.f32 %v1023_v39, %v4001_v61  ;;  %v4771_v28 = vmul.f32 %v4640_v24, %v1186_v59  ;;  %v4773_v18 = vld [vmem:[#allocation2 + $0x358] sm:$0xff]  ;;  %v7055_v39 = vld [vmem:[#allocation87_spill] sm:$0xff]  ;;  %v4787_v61 = vld [vmem:[#allocation2 + $0x368] sm:$0xff] }
 0x130   :  { %7051 = vst [vmem:[#allocation205_spill] sm:$0xff] %v4764_v36  ;;  %v2609_v35 = vpop.eup %2608  ;;  %v1029_v49 = vmul.f32 0.6931472, %v2607_v15  ;;  %2634 = vlog2.f32 %v4773_v18  ;;  %v1189_v21 = vsub.f32 %v1025_v40, %v7053_v8  ;;  %v4778_v20 = vmul.f32 %v4647_v34, %v1187_v6 }
 0x131   :  { %7052 = vst [vmem:[#allocation206_spill] sm:$0xff] %v4771_v28  ;;  %v2611_v54 = vpop.eup %2610  ;;  %v1031_v36 = vmul.f32 0.6931472, %v2609_v35  ;;  %2636 = vlog2.f32 %v4780_v44  ;;  %v1190_v24 = vsub.f32 %v1027_v37, %v7055_v39  ;;  %v4785_v59 = vmul.f32 %v4654_v42, %v1188_v12  ;;  %v7058_v37 = vld [vmem:[#allocation89_spill] sm:$0xff]  ;;  %v4801_v39 = vld [vmem:[#allocation2 + $0x378] sm:$0xff] }
 0x132   :  { %7054 = vst [vmem:[#allocation86_spill] sm:$0xff] %v4778_v20  ;;  %v2613_v15 = vpop.eup %2612  ;;  %v1033_v28 = vmul.f32 0.6931472, %v2611_v54  ;;  %2638 = vlog2.f32 %v4787_v61  ;;  %v1191_v34 = vsub.f32 %v1029_v49, %v4013_v30  ;;  %v4792_v40 = vmul.f32 %v4661_v25, %v1189_v21  ;;  %v4794_v20 = vld [vmem:[#allocation2 + $0x370] sm:$0xff]  ;;  %v7060_v49 = vld [vmem:[#allocation90_spill] sm:$0xff]  ;;  %v4808_v30 = vld [vmem:[#allocation2 + $0x380] sm:$0xff] }
 0x133   :  { %7056 = vst [vmem:[#allocation207_spill] sm:$0xff] %v4785_v59  ;;  %v2615_v6 = vpop.eup %2614  ;;  %v1035_v35 = vmul.f32 0.6931472, %v2613_v15  ;;  %2640 = vlog2.f32 %v4794_v20  ;;  %v1192_v42 = vsub.f32 %v1031_v36, %v7058_v37  ;;  %v4799_v12 = vmul.f32 %v4668_v11, %v1190_v24 }
 0x134   :  { %7057 = vst [vmem:[#allocation208_spill] sm:$0xff] %v4792_v40  ;;  %v2617_v54 = vpop.eup %2616  ;;  %v1037_v59 = vmul.f32 0.6931472, %v2615_v6  ;;  %2642 = vlog2.f32 %v4801_v39  ;;  %v1193_v25 = vsub.f32 %v1033_v28, %v7060_v49  ;;  %v4806_v21 = vmul.f32 %v4675_v63, %v1191_v34  ;;  %v7063_v28 = vld [vmem:[#allocation92_spill] sm:$0xff]  ;;  %v4822_v49 = vld [vmem:[#allocation2 + $0x390] sm:$0xff] }
 0x135   :  { %7059 = vst [vmem:[#allocation89_spill] sm:$0xff] %v4799_v12  ;;  %v2619_v15 = vpop.eup %2618  ;;  %v1039_v40 = vmul.f32 0.6931472, %v2617_v54  ;;  %2644 = vlog2.f32 %v4808_v30  ;;  %v1194_v11 = vsub.f32 %v1035_v35, %v4025_v3  ;;  %v4813_v36 = vmul.f32 %v4682_v55, %v1192_v42  ;;  %v4815_v12 = vld [vmem:[#allocation2 + $0x388] sm:$0xff]  ;;  %v7065_v35 = vld [vmem:[#allocation93_spill] sm:$0xff]  ;;  %v4829_v3 = vld [vmem:[#allocation2 + $0x398] sm:$0xff] }
 0x136   :  { %7061 = vst [vmem:[#allocation209_spill] sm:$0xff] %v4806_v21  ;;  %v2621_v24 = vpop.eup %2620  ;;  %v1041_v6 = vmul.f32 0.6931472, %v2619_v15  ;;  %2646 = vlog2.f32 %v4815_v12  ;;  %v1195_v63 = vsub.f32 %v1037_v59, %v7063_v28  ;;  %v4820_v34 = vmul.f32 %v4689_v7, %v1193_v25 }
 0x137   :  { %7062 = vst [vmem:[#allocation210_spill] sm:$0xff] %v4813_v36  ;;  %v2623_v54 = vpop.eup %2622  ;;  %v1043_v21 = vmul.f32 0.6931472, %v2621_v24  ;;  %2648 = vlog2.f32 %v4822_v49  ;;  %v1196_v55 = vsub.f32 %v1039_v40, %v7065_v35  ;;  %v4827_v42 = vmul.f32 %v4696_v1, %v1194_v11  ;;  %v7068_v40 = vld [vmem:[#allocation95_spill] sm:$0xff]  ;;  %v4843_v35 = vld [vmem:[#allocation2 + $0x3a8] sm:$0xff] }
 0x138   :  { %7064 = vst [vmem:[#allocation92_spill] sm:$0xff] %v4820_v34  ;;  %v2625_v15 = vpop.eup %2624  ;;  %v1045_v36 = vmul.f32 0.6931472, %v2623_v54  ;;  %2650 = vlog2.f32 %v4829_v3  ;;  %v1197_v7 = vsub.f32 %v1041_v6, %v4037_v48  ;;  %v4834_v59 = vmul.f32 %v4703_v13, %v1195_v63  ;;  %v4836_v34 = vld [vmem:[#allocation2 + $0x3a0] sm:$0xff]  ;;  %v7070_v6 = vld [vmem:[#allocation96_spill] sm:$0xff]  ;;  %v4850_v48 = vld [vmem:[#allocation2 + $0x3b0] sm:$0xff] }
 0x139   :  { %7066 = vst [vmem:[#allocation211_spill] sm:$0xff] %v4827_v42  ;;  %v2627_v25 = vpop.eup %2626  ;;  %v1047_v24 = vmul.f32 0.6931472, %v2625_v15  ;;  %2652 = vlog2.f32 %v4836_v34  ;;  %v1198_v1 = vsub.f32 %v1043_v21, %v7068_v40  ;;  %v4841_v11 = vmul.f32 %v4710_v56, %v1196_v55 }
 0x13a   :  { %7067 = vst [vmem:[#allocation212_spill] sm:$0xff] %v4834_v59  ;;  %v2629_v54 = vpop.eup %2628  ;;  %v1049_v42 = vmul.f32 0.6931472, %v2627_v25  ;;  %2654 = vlog2.f32 %v4843_v35  ;;  %v1199_v13 = vsub.f32 %v1045_v36, %v7070_v6  ;;  %v4848_v63 = vmul.f32 %v4717_v29, %v1197_v7  ;;  %v7073_v36 = vld [vmem:[#allocation98_spill] sm:$0xff]  ;;  %v4864_v6 = vld [vmem:[#allocation2 + $0x3c0] sm:$0xff] }
 0x13b   :  { %7069 = vst [vmem:[#allocation95_spill] sm:$0xff] %v4841_v11  ;;  %v2631_v15 = vpop.eup %2630  ;;  %v1051_v59 = vmul.f32 0.6931472, %v2629_v54  ;;  %2656 = vlog2.f32 %v4850_v48  ;;  %v1200_v56 = vsub.f32 %v1047_v24, %v4049_v45  ;;  %v4855_v21 = vmul.f32 %v4724_v27, %v1198_v1  ;;  %v4857_v11 = vld [vmem:[#allocation2 + $0x3b8] sm:$0xff]  ;;  %v7075_v24 = vld [vmem:[#allocation99_spill] sm:$0xff]  ;;  %v4871_v45 = vld [vmem:[#allocation2 + $0x3c8] sm:$0xff] }
 0x13c   :  { %7071 = vst [vmem:[#allocation213_spill] sm:$0xff] %v4848_v63  ;;  %v2633_v55 = vpop.eup %2632  ;;  %v1053_v25 = vmul.f32 0.6931472, %v2631_v15  ;;  %2658 = vlog2.f32 %v4857_v11  ;;  %v1201_v29 = vsub.f32 %v1049_v42, %v7073_v36  ;;  %v4862_v7 = vmul.f32 %v4731_v32, %v1199_v13 }
 0x13d   :  { %7072 = vst [vmem:[#allocation214_spill] sm:$0xff] %v4855_v21  ;;  %v2635_v54 = vpop.eup %2634  ;;  %v1055_v63 = vmul.f32 0.6931472, %v2633_v55  ;;  %2660 = vlog2.f32 %v4864_v6  ;;  %v1202_v27 = vsub.f32 %v1051_v59, %v7075_v24  ;;  %v4869_v1 = vmul.f32 %v4738_v57, %v1200_v56  ;;  %v7078_v59 = vld [vmem:[#allocation101_spill] sm:$0xff]  ;;  %v4885_v24 = vld [vmem:[#allocation2 + $0x3d8] sm:$0xff] }
 0x13e   :  { %7074 = vst [vmem:[#allocation98_spill] sm:$0xff] %v4862_v7  ;;  %v2637_v15 = vpop.eup %2636  ;;  %v1057_v21 = vmul.f32 0.6931472, %v2635_v54  ;;  %2662 = vlog2.f32 %v4871_v45  ;;  %v1203_v32 = vsub.f32 %v1053_v25, %v4061_v43  ;;  %v4876_v42 = vmul.f32 %v4745_v19, %v1201_v29  ;;  %v4878_v7 = vld [vmem:[#allocation2 + $0x3d0] sm:$0xff]  ;;  %v7080_v25 = vld [vmem:[#allocation102_spill] sm:$0xff]  ;;  %v4892_v43 = vld [vmem:[#allocation2 + $0x3e0] sm:$0xff] }
 0x13f   :  { %7076 = vst [vmem:[#allocation215_spill] sm:$0xff] %v4869_v1  ;;  %v2639_v13 = vpop.eup %2638  ;;  %v1059_v55 = vmul.f32 0.6931472, %v2637_v15  ;;  %2664 = vlog2.f32 %v4878_v7  ;;  %v1204_v57 = vsub.f32 %v1055_v63, %v7078_v59  ;;  %v4883_v56 = vmul.f32 %v4752_v22, %v1202_v27 }
 0x140   :  { %7077 = vst [vmem:[#allocation216_spill] sm:$0xff] %v4876_v42  ;;  %v2641_v54 = vpop.eup %2640  ;;  %v1061_v1 = vmul.f32 0.6931472, %v2639_v13  ;;  %2666 = vlog2.f32 %v4885_v24  ;;  %v1205_v19 = vsub.f32 %v1057_v21, %v7080_v25  ;;  %v4890_v29 = vmul.f32 %v4759_v60, %v1203_v32  ;;  %v7083_v21 = vld [vmem:[#allocation104_spill] sm:$0xff]  ;;  %v4906_v25 = vld [vmem:[#allocation2 + $0x3f0] sm:$0xff] }
 0x141   :  { %7079 = vst [vmem:[#allocation217_spill] sm:$0xff] %v4883_v56  ;;  %v2643_v15 = vpop.eup %2642  ;;  %v1063_v42 = vmul.f32 0.6931472, %v2641_v54  ;;  %2668 = vlog2.f32 %v4892_v43  ;;  %v1206_v22 = vsub.f32 %v1059_v55, %v4073_v9  ;;  %v4897_v63 = vmul.f32 %v4766_v53, %v1204_v57  ;;  %v4899_v56 = vld [vmem:[#allocation2 + $0x3e8] sm:$0xff]  ;;  %v7085_v55 = vld [vmem:[#allocation105_spill] sm:$0xff]  ;;  %v4913_v9 = vld [vmem:[#allocation2 + $0x3f8] sm:$0xff] }
 0x142   :  { %7081 = vst [vmem:[#allocation218_spill] sm:$0xff] %v4890_v29  ;;  %v2645_v27 = vpop.eup %2644  ;;  %v1065_v13 = vmul.f32 0.6931472, %v2643_v15  ;;  %2670 = vlog2.f32 %v4899_v56  ;;  %v1207_v60 = vsub.f32 %v1061_v1, %v7083_v21  ;;  %v4904_v32 = vmul.f32 %v4773_v18, %v1205_v19  ;;  %v7087_v1 = vld [vmem:[#allocation106_spill] sm:$0xff]  ;;  %v7089_v21 = vld [vmem:[#allocation107_spill] sm:$0xff] }
 0x143   :  { %7082 = vst [vmem:[#allocation219_spill] sm:$0xff] %v4897_v63  ;;  %v2647_v54 = vpop.eup %2646  ;;  %v1067_v29 = vmul.f32 0.6931472, %v2645_v27  ;;  %2672 = vlog2.f32 %v4906_v25  ;;  %v1208_v53 = vsub.f32 %v1063_v42, %v7085_v55  ;;  %v4911_v57 = vmul.f32 %v4780_v44, %v1206_v22  ;;  %v4924_v44 = vld [vmem:[#allocation5] sm:$0xff] }
 0x144   :  { %7084 = vst [vmem:[#allocation220_spill] sm:$0xff] %v4904_v32  ;;  %v2649_v15 = vpop.eup %2648  ;;  %v1069_v63 = vmul.f32 0.6931472, %v2647_v54  ;;  %2674 = vlog2.f32 %v4913_v9  ;;  %v1209_v18 = vsub.f32 %v1065_v13, %v7087_v1  ;;  %v4918_v19 = vmul.f32 %v4787_v61, %v1207_v60  ;;  %v4931_v61 = vld [vmem:[#allocation5 + $0x8] sm:$0xff] }
 0x145   :  { %7086 = vst [vmem:[#allocation221_spill] sm:$0xff] %v4911_v57  ;;  %v2651_v27 = vpop.eup %2650  ;;  %v1071_v32 = vmul.f32 0.6931472, %v2649_v15  ;;  %v1210_v59 = vsub.f32 %v1067_v29, %v7089_v21  ;;  %v4922_v42 = vmul.f32 %v4794_v20, %v1208_v53  ;;  %2676 = vlog2.f32 %v4924_v44  ;;  %v7091_v57 = vld [vmem:[#allocation108_spill] sm:$0xff]  ;;  %v7093_v15 = vld [vmem:[#allocation109_spill] sm:$0xff] }
 0x146   :  { %7088 = vst [vmem:[#allocation106_spill] sm:$0xff] %v4918_v19  ;;  %v2653_v22 = vpop.eup %2652  ;;  %v1073_v54 = vmul.f32 0.6931472, %v2651_v27  ;;  %v1211_v55 = vsub.f32 %v1069_v63, %v7091_v57  ;;  %v4929_v13 = vmul.f32 %v4801_v39, %v1209_v18  ;;  %2678 = vlog2.f32 %v4931_v61  ;;  %v7095_v19 = vld [vmem:[#allocation110_spill] sm:$0xff] }
 0x147   :  { %7090 = vst [vmem:[#allocation107_spill] sm:$0xff] %v4922_v42  ;;  %v2655_v60 = vpop.eup %2654  ;;  %v1075_v29 = vmul.f32 0.6931472, %v2653_v22  ;;  %v1212_v20 = vsub.f32 %v1071_v32, %v7093_v15  ;;  %v4936_v53 = vmul.f32 %v4808_v30, %v1210_v59  ;;  %v4938_v42 = vld [vmem:[#allocation5 + $0x10] sm:$0xff]  ;;  %v7097_v15 = vld [vmem:[#allocation111_spill] sm:$0xff] }
 0x148   :  { %7092 = vst [vmem:[#allocation108_spill] sm:$0xff] %v4929_v13  ;;  %2680 = vlog2.f32 %v4938_v42  ;;  %v2657_v27 = vpop.eup %2656  ;;  %v1077_v63 = vmul.f32 0.6931472, %v2655_v60  ;;  %v1213_v39 = vsub.f32 %v1073_v54, %v7095_v19  ;;  %v4943_v18 = vmul.f32 %v4815_v12, %v1211_v55  ;;  %v4945_v13 = vld [vmem:[#allocation5 + $0x18] sm:$0xff]  ;;  %v7099_v19 = vld [vmem:[#allocation112_spill] sm:$0xff] }
 0x149   :  { %7094 = vst [vmem:[#allocation222_spill] sm:$0xff] %v4936_v53  ;;  %2682 = vlog2.f32 %v4945_v13  ;;  %v2659_v22 = vpop.eup %2658  ;;  %v1079_v32 = vmul.f32 0.6931472, %v2657_v27  ;;  %v1214_v30 = vsub.f32 %v1075_v29, %v7097_v15  ;;  %v4950_v59 = vmul.f32 %v4822_v49, %v1212_v20  ;;  %v4952_v53 = vld [vmem:[#allocation5 + $0x20] sm:$0xff]  ;;  %v7101_v15 = vld [vmem:[#allocation113_spill] sm:$0xff] }
 0x14a   :  { %7096 = vst [vmem:[#allocation223_spill] sm:$0xff] %v4943_v18  ;;  %2684 = vlog2.f32 %v4952_v53  ;;  %v2661_v60 = vpop.eup %2660  ;;  %v1081_v54 = vmul.f32 0.6931472, %v2659_v22  ;;  %v1215_v12 = vsub.f32 %v1077_v63, %v7099_v19  ;;  %v4957_v55 = vmul.f32 %v4829_v3, %v1213_v39  ;;  %v4959_v18 = vld [vmem:[#allocation5 + $0x28] sm:$0xff]  ;;  %v7103_v19 = vld [vmem:[#allocation114_spill] sm:$0xff] }
 0x14b   :  { %7098 = vst [vmem:[#allocation224_spill] sm:$0xff] %v4950_v59  ;;  %2686 = vlog2.f32 %v4959_v18  ;;  %v2663_v27 = vpop.eup %2662  ;;  %v1083_v29 = vmul.f32 0.6931472, %v2661_v60  ;;  %v1216_v49 = vsub.f32 %v1079_v32, %v7101_v15  ;;  %v4964_v20 = vmul.f32 %v4836_v34, %v1214_v30  ;;  %v4966_v59 = vld [vmem:[#allocation5 + $0x30] sm:$0xff]  ;;  %v7105_v15 = vld [vmem:[#allocation115_spill] sm:$0xff] }
 0x14c   :  { %7100 = vst [vmem:[#allocation225_spill] sm:$0xff] %v4957_v55  ;;  %2688 = vlog2.f32 %v4966_v59  ;;  %v2665_v22 = vpop.eup %2664  ;;  %v1085_v63 = vmul.f32 0.6931472, %v2663_v27  ;;  %v1217_v3 = vsub.f32 %v1081_v54, %v7103_v19  ;;  %v4971_v39 = vmul.f32 %v4843_v35, %v1215_v12  ;;  %v4973_v55 = vld [vmem:[#allocation5 + $0x38] sm:$0xff]  ;;  %v7107_v19 = vld [vmem:[#allocation116_spill] sm:$0xff] }
 0x14d   :  { %7102 = vst [vmem:[#allocation226_spill] sm:$0xff] %v4964_v20  ;;  %2690 = vlog2.f32 %v4973_v55  ;;  %v2667_v60 = vpop.eup %2666  ;;  %v1087_v32 = vmul.f32 0.6931472, %v2665_v22  ;;  %v1218_v34 = vsub.f32 %v1083_v29, %v7105_v15  ;;  %v4978_v30 = vmul.f32 %v4850_v48, %v1216_v49  ;;  %v4980_v20 = vld [vmem:[#allocation5 + $0x40] sm:$0xff]  ;;  %v7109_v15 = vld [vmem:[#allocation117_spill] sm:$0xff] }
 0x14e   :  { %7104 = vst [vmem:[#allocation227_spill] sm:$0xff] %v4971_v39  ;;  %2692 = vlog2.f32 %v4980_v20  ;;  %v2669_v27 = vpop.eup %2668  ;;  %v1089_v54 = vmul.f32 0.6931472, %v2667_v60  ;;  %v1219_v35 = vsub.f32 %v1085_v63, %v7107_v19  ;;  %v4985_v12 = vmul.f32 %v4857_v11, %v1217_v3  ;;  %v4987_v39 = vld [vmem:[#allocation5 + $0x48] sm:$0xff]  ;;  %v7111_v19 = vld [vmem:[#allocation118_spill] sm:$0xff] }
 0x14f   :  { %7106 = vst [vmem:[#allocation228_spill] sm:$0xff] %v4978_v30  ;;  %2694 = vlog2.f32 %v4987_v39  ;;  %v2671_v22 = vpop.eup %2670  ;;  %v1091_v29 = vmul.f32 0.6931472, %v2669_v27  ;;  %v1220_v48 = vsub.f32 %v1087_v32, %v7109_v15  ;;  %v4992_v49 = vmul.f32 %v4864_v6, %v1218_v34  ;;  %v4994_v30 = vld [vmem:[#allocation5 + $0x50] sm:$0xff]  ;;  %v7113_v15 = vld [vmem:[#allocation119_spill] sm:$0xff] }
 0x150   :  { %7108 = vst [vmem:[#allocation229_spill] sm:$0xff] %v4985_v12  ;;  %2696 = vlog2.f32 %v4994_v30  ;;  %v2673_v60 = vpop.eup %2672  ;;  %v1093_v63 = vmul.f32 0.6931472, %v2671_v22  ;;  %v1221_v11 = vsub.f32 %v1089_v54, %v7111_v19  ;;  %v4999_v3 = vmul.f32 %v4871_v45, %v1219_v35  ;;  %v5001_v12 = vld [vmem:[#allocation5 + $0x58] sm:$0xff]  ;;  %v7115_v19 = vld [vmem:[#allocation120_spill] sm:$0xff] }
 0x151   :  { %7110 = vst [vmem:[#allocation230_spill] sm:$0xff] %v4992_v49  ;;  %2698 = vlog2.f32 %v5001_v12  ;;  %v2675_v27 = vpop.eup %2674  ;;  %v1095_v32 = vmul.f32 0.6931472, %v2673_v60  ;;  %v1222_v6 = vsub.f32 %v1091_v29, %v7113_v15  ;;  %v5006_v34 = vmul.f32 %v4878_v7, %v1220_v48  ;;  %v5008_v49 = vld [vmem:[#allocation5 + $0x60] sm:$0xff]  ;;  %v7117_v29 = vld [vmem:[#allocation121_spill] sm:$0xff] }
 0x152   :  { %7112 = vst [vmem:[#allocation231_spill] sm:$0xff] %v4999_v3  ;;  %2700 = vlog2.f32 %v5008_v49  ;;  %v2677_v22 = vpop.eup %2676  ;;  %v1097_v54 = vmul.f32 0.6931472, %v2675_v27  ;;  %v1223_v45 = vsub.f32 %v1093_v63, %v7115_v19  ;;  %v5013_v35 = vmul.f32 %v4885_v24, %v1221_v11  ;;  %v5015_v3 = vld [vmem:[#allocation5 + $0x68] sm:$0xff]  ;;  %v7119_v63 = vld [vmem:[#allocation122_spill] sm:$0xff] }
 0x153   :  { %7114 = vst [vmem:[#allocation232_spill] sm:$0xff] %v5006_v34  ;;  %2702 = vlog2.f32 %v5015_v3  ;;  %v2679_v60 = vpop.eup %2678  ;;  %v1224_v15 = vsub.f32 %v1095_v32, %v7117_v29  ;;  %v5020_v7 = vmul.f32 %v4892_v43, %v1222_v6  ;;  %v1355_v48 = vmul.f32 0.6931472, %v2677_v22  ;;  %v5022_v34 = vld [vmem:[#allocation5 + $0x70] sm:$0xff]  ;;  %v5035_v22 = vld [vmem:[#allocation5 + $0x80] sm:$0xff] }
 0x154   :  { %7116 = vst [vmem:[#allocation233_spill] sm:$0xff] %v5013_v35  ;;  %2704 = vlog2.f32 %v5022_v34  ;;  %v1225_v19 = vsub.f32 %v1097_v54, %v7119_v63  ;;  %v5027_v24 = vmul.f32 %v4899_v56, %v1223_v45  ;;  %v1357_v11 = vmul.f32 0.6931472, %v2679_v60  ;;  %v5029_v35 = vld [vmem:[#allocation5 + $0x78] sm:$0xff]  ;;  %v5042_v60 = vld [vmem:[#allocation5 + $0x88] sm:$0xff] }
 0x155   :  { %7118 = vst [vmem:[#allocation234_spill] sm:$0xff] %v5020_v7  ;;  %v2681_v27 = vpop.eup %2680  ;;  %2706 = vlog2.f32 %v5029_v35  ;;  %v5033_v43 = vmul.f32 %v4906_v25, %v1224_v15  ;;  %v7122_v7 = vld [vmem:[#allocation82_spill] sm:$0xff] }
 0x156   :  { %7120 = vst [vmem:[#allocation235_spill] sm:$0xff] %v5027_v24  ;;  %v2683_v32 = vpop.eup %2682  ;;  %v1359_v6 = vmul.f32 0.6931472, %v2681_v27  ;;  %2708 = vlog2.f32 %v5035_v22  ;;  %v1610_v29 = vsub.f32 %v1355_v48, %v7122_v7  ;;  %v5040_v56 = vmul.f32 %v4913_v9, %v1225_v19  ;;  %v7124_v24 = vld [vmem:[#allocation83_spill] sm:$0xff]  ;;  %v5046_v27 = vld [vmem:[#allocation5 + $0x90] sm:$0xff]  ;;  %v5053_v48 = vld [vmem:[#allocation5 + $0x98] sm:$0xff] }
 0x157   :  { %7121 = vst [vmem:[#allocation236_spill] sm:$0xff] %v5033_v43  ;;  %v2685_v54 = vpop.eup %2684  ;;  %v1361_v45 = vmul.f32 0.6931472, %v2683_v32  ;;  %2710 = vlog2.f32 %v5042_v60  ;;  %v1611_v63 = vsub.f32 %v1357_v11, %v7124_v24 }
 0x158   :  { %7123 = vst [vmem:[#allocation82_spill] sm:$0xff] %v5040_v56  ;;  %v2687_v25 = vpop.eup %2686  ;;  %v1363_v15 = vmul.f32 0.6931472, %v2685_v54  ;;  %2712 = vlog2.f32 %v5046_v27  ;;  %v1612_v43 = vsub.f32 %v1359_v6, %v3653_v52  ;;  %v5051_v7 = vmul.f32 %v4924_v44, %v1610_v29  ;;  %v5060_v56 = vld [vmem:[#allocation5 + $0xa0] sm:$0xff] }
 0x159   :  { %v2689_v9 = vpop.eup %2688  ;;  %v1365_v19 = vmul.f32 0.6931472, %v2687_v25  ;;  %2714 = vlog2.f32 %v5053_v48  ;;  %v1613_v32 = vsub.f32 %v1361_v45, %v3656_v46  ;;  %v5058_v24 = vmul.f32 %v4931_v61, %v1611_v63  ;;  %v5067_v25 = vld [vmem:[#allocation5 + $0xa8] sm:$0xff] }
 0x15a   :  { %v2691_v11 = vpop.eup %2690  ;;  %v1367_v54 = vmul.f32 0.6931472, %v2689_v9  ;;  %2716 = vlog2.f32 %v5060_v56  ;;  %v1614_v52 = vsub.f32 %v1363_v15, %v3659_v47  ;;  %v5065_v44 = vmul.f32 %v4938_v42, %v1612_v43  ;;  %v5074_v9 = vld [vmem:[#allocation5 + $0xb0] sm:$0xff] }
 0x15b   :  { %v2693_v29 = vpop.eup %2692  ;;  %v1369_v6 = vmul.f32 0.6931472, %v2691_v11  ;;  %2718 = vlog2.f32 %v5067_v25  ;;  %v1615_v46 = vsub.f32 %v1365_v19, %v3664_v5  ;;  %v5072_v61 = vmul.f32 %v4945_v13, %v1613_v32  ;;  %v5081_v11 = vld [vmem:[#allocation5 + $0xb8] sm:$0xff]  ;;  %v7127_v5 = vld [vmem:[#allocation11_spill] sm:$0xff] }
 0x15c   :  { %v2695_v63 = vpop.eup %2694  ;;  %v1371_v45 = vmul.f32 0.6931472, %v2693_v29  ;;  %2720 = vlog2.f32 %v5074_v9  ;;  %v1616_v47 = vsub.f32 %v1367_v54, %v3667_v14  ;;  %v5079_v42 = vmul.f32 %v4952_v53, %v1614_v52  ;;  %v7129_v14 = vld [vmem:[#allocation12_spill] sm:$0xff] }
 0x15d   :  { %7125 = vst [vmem:[#allocation83_spill] sm:$0xff] %v5072_v61  ;;  %v2697_v43 = vpop.eup %2696  ;;  %v1373_v15 = vmul.f32 0.6931472, %v2695_v63  ;;  %2722 = vlog2.f32 %v5081_v11  ;;  %v1617_v13 = vsub.f32 %v1369_v6, %v7127_v5  ;;  %v5086_v19 = vmul.f32 %v4959_v18, %v1615_v46  ;;  %v5088_v61 = vld [vmem:[#allocation5 + $0xc0] sm:$0xff]  ;;  %v7131_v6 = vld [vmem:[#allocation13_spill] sm:$0xff] }
 0x15e   :  { %7126 = vst [vmem:[#allocation237_spill] sm:$0xff] %v5079_v42  ;;  %v2699_v32 = vpop.eup %2698  ;;  %v1375_v29 = vmul.f32 0.6931472, %v2697_v43  ;;  %2724 = vlog2.f32 %v5088_v61  ;;  %v1618_v53 = vsub.f32 %v1371_v45, %v7129_v14  ;;  %v5093_v54 = vmul.f32 %v4966_v59, %v1616_v47  ;;  %v5095_v42 = vld [vmem:[#allocation5 + $0xc8] sm:$0xff]  ;;  %v7133_v45 = vld [vmem:[#allocation14_spill] sm:$0xff] }
 0x15f   :  { %7128 = vst [vmem:[#allocation11_spill] sm:$0xff] %v5086_v19  ;;  %v2701_v52 = vpop.eup %2700  ;;  %v1377_v63 = vmul.f32 0.6931472, %v2699_v32  ;;  %2726 = vlog2.f32 %v5095_v42  ;;  %v1619_v18 = vsub.f32 %v1373_v15, %v7131_v6  ;;  %v5100_v46 = vmul.f32 %v4973_v55, %v1617_v13  ;;  %v5102_v19 = vld [vmem:[#allocation5 + $0xd0] sm:$0xff]  ;;  %v7135_v15 = vld [vmem:[#allocation15_spill] sm:$0xff] }
 0x160   :  { %7130 = vst [vmem:[#allocation12_spill] sm:$0xff] %v5093_v54  ;;  %v2703_v43 = vpop.eup %2702  ;;  %v1379_v5 = vmul.f32 0.6931472, %v2701_v52  ;;  %2728 = vlog2.f32 %v5102_v19  ;;  %v1620_v59 = vsub.f32 %v1375_v29, %v7133_v45  ;;  %v5107_v47 = vmul.f32 %v4980_v20, %v1618_v53  ;;  %v5109_v54 = vld [vmem:[#allocation5 + $0xd8] sm:$0xff]  ;;  %v7137_v29 = vld [vmem:[#allocation16_spill] sm:$0xff] }
 0x161   :  { %7132 = vst [vmem:[#allocation13_spill] sm:$0xff] %v5100_v46  ;;  %v2705_v32 = vpop.eup %2704  ;;  %v1381_v14 = vmul.f32 0.6931472, %v2703_v43  ;;  %2730 = vlog2.f32 %v5109_v54  ;;  %v1621_v55 = vsub.f32 %v1377_v63, %v7135_v15  ;;  %v5114_v13 = vmul.f32 %v4987_v39, %v1619_v18  ;;  %v5116_v46 = vld [vmem:[#allocation5 + $0xe0] sm:$0xff]  ;;  %v7139_v63 = vld [vmem:[#allocation17_spill] sm:$0xff] }
 0x162   :  { %7134 = vst [vmem:[#allocation14_spill] sm:$0xff] %v5107_v47  ;;  %v2707_v52 = vpop.eup %2706  ;;  %v1383_v6 = vmul.f32 0.6931472, %v2705_v32  ;;  %2732 = vlog2.f32 %v5116_v46  ;;  %v1622_v20 = vsub.f32 %v1379_v5, %v7137_v29  ;;  %v5121_v53 = vmul.f32 %v4994_v30, %v1620_v59  ;;  %v5123_v47 = vld [vmem:[#allocation5 + $0xe8] sm:$0xff]  ;;  %v7141_v5 = vld [vmem:[#allocation18_spill] sm:$0xff] }
 0x163   :  { %7136 = vst [vmem:[#allocation15_spill] sm:$0xff] %v5114_v13  ;;  %v2709_v43 = vpop.eup %2708  ;;  %v1385_v45 = vmul.f32 0.6931472, %v2707_v52  ;;  %2734 = vlog2.f32 %v5123_v47  ;;  %v1623_v39 = vsub.f32 %v1381_v14, %v7139_v63  ;;  %v5128_v18 = vmul.f32 %v5001_v12, %v1621_v55  ;;  %v5130_v13 = vld [vmem:[#allocation5 + $0xf0] sm:$0xff]  ;;  %v7143_v14 = vld [vmem:[#allocation19_spill] sm:$0xff] }
 0x164   :  { %7138 = vst [vmem:[#allocation16_spill] sm:$0xff] %v5121_v53  ;;  %v2711_v32 = vpop.eup %2710  ;;  %v1387_v15 = vmul.f32 0.6931472, %v2709_v43  ;;  %2736 = vlog2.f32 %v5130_v13  ;;  %v1624_v30 = vsub.f32 %v1383_v6, %v7141_v5  ;;  %v5135_v59 = vmul.f32 %v5008_v49, %v1622_v20  ;;  %v5137_v53 = vld [vmem:[#allocation5 + $0xf8] sm:$0xff]  ;;  %v7145_v6 = vld [vmem:[#allocation20_spill] sm:$0xff] }
 0x165   :  { %7140 = vst [vmem:[#allocation17_spill] sm:$0xff] %v5128_v18  ;;  %v2713_v52 = vpop.eup %2712  ;;  %v1389_v29 = vmul.f32 0.6931472, %v2711_v32  ;;  %2738 = vlog2.f32 %v5137_v53  ;;  %v1625_v12 = vsub.f32 %v1385_v45, %v7143_v14  ;;  %v5142_v55 = vmul.f32 %v5015_v3, %v1623_v39  ;;  %v5144_v18 = vld [vmem:[#allocation5 + $0x100] sm:$0xff]  ;;  %v7147_v45 = vld [vmem:[#allocation21_spill] sm:$0xff] }
 0x166   :  { %7142 = vst [vmem:[#allocation18_spill] sm:$0xff] %v5135_v59  ;;  %v2715_v43 = vpop.eup %2714  ;;  %v1391_v63 = vmul.f32 0.6931472, %v2713_v52  ;;  %2740 = vlog2.f32 %v5144_v18  ;;  %v1626_v49 = vsub.f32 %v1387_v15, %v7145_v6  ;;  %v5149_v20 = vmul.f32 %v5022_v34, %v1624_v30  ;;  %v5151_v59 = vld [vmem:[#allocation5 + $0x108] sm:$0xff]  ;;  %v7149_v15 = vld [vmem:[#allocation22_spill] sm:$0xff] }
 0x167   :  { %7144 = vst [vmem:[#allocation19_spill] sm:$0xff] %v5142_v55  ;;  %v2717_v32 = vpop.eup %2716  ;;  %v1393_v5 = vmul.f32 0.6931472, %v2715_v43  ;;  %2742 = vlog2.f32 %v5151_v59  ;;  %v1627_v3 = vsub.f32 %v1389_v29, %v7147_v45  ;;  %v5156_v39 = vmul.f32 %v5029_v35, %v1625_v12  ;;  %v5158_v55 = vld [vmem:[#allocation5 + $0x110] sm:$0xff]  ;;  %v7151_v29 = vld [vmem:[#allocation23_spill] sm:$0xff] }
 0x168   :  { %7146 = vst [vmem:[#allocation20_spill] sm:$0xff] %v5149_v20  ;;  %v2719_v52 = vpop.eup %2718  ;;  %v1395_v14 = vmul.f32 0.6931472, %v2717_v32  ;;  %2744 = vlog2.f32 %v5158_v55  ;;  %v1628_v34 = vsub.f32 %v1391_v63, %v7149_v15  ;;  %v5163_v30 = vmul.f32 %v5035_v22, %v1626_v49  ;;  %v5165_v20 = vld [vmem:[#allocation5 + $0x118] sm:$0xff]  ;;  %v7153_v63 = vld [vmem:[#allocation24_spill] sm:$0xff] }
 0x169   :  { %7148 = vst [vmem:[#allocation21_spill] sm:$0xff] %v5156_v39  ;;  %v2721_v43 = vpop.eup %2720  ;;  %v1397_v6 = vmul.f32 0.6931472, %v2719_v52  ;;  %2746 = vlog2.f32 %v5165_v20  ;;  %v1629_v35 = vsub.f32 %v1393_v5, %v7151_v29  ;;  %v5170_v12 = vmul.f32 %v5042_v60, %v1627_v3  ;;  %v5172_v39 = vld [vmem:[#allocation5 + $0x120] sm:$0xff]  ;;  %v7155_v5 = vld [vmem:[#allocation25_spill] sm:$0xff] }
 0x16a   :  { %7150 = vst [vmem:[#allocation22_spill] sm:$0xff] %v5163_v30  ;;  %v2723_v32 = vpop.eup %2722  ;;  %v1399_v45 = vmul.f32 0.6931472, %v2721_v43  ;;  %2748 = vlog2.f32 %v5172_v39  ;;  %v1630_v22 = vsub.f32 %v1395_v14, %v7153_v63  ;;  %v5177_v49 = vmul.f32 %v5046_v27, %v1628_v34  ;;  %v5179_v30 = vld [vmem:[#allocation5 + $0x128] sm:$0xff]  ;;  %v7157_v14 = vld [vmem:[#allocation26_spill] sm:$0xff] }
 0x16b   :  { %7152 = vst [vmem:[#allocation23_spill] sm:$0xff] %v5170_v12  ;;  %v2725_v52 = vpop.eup %2724  ;;  %v1401_v15 = vmul.f32 0.6931472, %v2723_v32  ;;  %2750 = vlog2.f32 %v5179_v30  ;;  %v1631_v60 = vsub.f32 %v1397_v6, %v7155_v5  ;;  %v5184_v3 = vmul.f32 %v5053_v48, %v1629_v35  ;;  %v5186_v12 = vld [vmem:[#allocation5 + $0x130] sm:$0xff]  ;;  %v7159_v6 = vld [vmem:[#allocation27_spill] sm:$0xff] }
 0x16c   :  { %7154 = vst [vmem:[#allocation24_spill] sm:$0xff] %v5177_v49  ;;  %v2727_v43 = vpop.eup %2726  ;;  %v1403_v29 = vmul.f32 0.6931472, %v2725_v52  ;;  %2752 = vlog2.f32 %v5186_v12  ;;  %v1632_v27 = vsub.f32 %v1399_v45, %v7157_v14  ;;  %v5191_v34 = vmul.f32 %v5060_v56, %v1630_v22  ;;  %v5193_v49 = vld [vmem:[#allocation5 + $0x138] sm:$0xff]  ;;  %v7161_v45 = vld [vmem:[#allocation28_spill] sm:$0xff] }
 0x16d   :  { %7156 = vst [vmem:[#allocation25_spill] sm:$0xff] %v5184_v3  ;;  %v2729_v32 = vpop.eup %2728  ;;  %v1405_v63 = vmul.f32 0.6931472, %v2727_v43  ;;  %2754 = vlog2.f32 %v5193_v49  ;;  %v1633_v48 = vsub.f32 %v1401_v15, %v7159_v6  ;;  %v5198_v35 = vmul.f32 %v5067_v25, %v1631_v60  ;;  %v5200_v3 = vld [vmem:[#allocation5 + $0x140] sm:$0xff]  ;;  %v7163_v15 = vld [vmem:[#allocation29_spill] sm:$0xff] }
 0x16e   :  { %7158 = vst [vmem:[#allocation26_spill] sm:$0xff] %v5191_v34  ;;  %v2731_v52 = vpop.eup %2730  ;;  %v1407_v5 = vmul.f32 0.6931472, %v2729_v32  ;;  %2756 = vlog2.f32 %v5200_v3  ;;  %v1634_v56 = vsub.f32 %v1403_v29, %v7161_v45  ;;  %v5205_v22 = vmul.f32 %v5074_v9, %v1632_v27  ;;  %v5207_v34 = vld [vmem:[#allocation5 + $0x148] sm:$0xff]  ;;  %v7165_v29 = vld [vmem:[#allocation30_spill] sm:$0xff] }
 0x16f   :  { %7160 = vst [vmem:[#allocation27_spill] sm:$0xff] %v5198_v35  ;;  %v2733_v43 = vpop.eup %2732  ;;  %v1409_v14 = vmul.f32 0.6931472, %v2731_v52  ;;  %2758 = vlog2.f32 %v5207_v34  ;;  %v1635_v25 = vsub.f32 %v1405_v63, %v7163_v15  ;;  %v5212_v60 = vmul.f32 %v5081_v11, %v1633_v48  ;;  %v5214_v35 = vld [vmem:[#allocation5 + $0x150] sm:$0xff]  ;;  %v7167_v63 = vld [vmem:[#allocation31_spill] sm:$0xff] }
 0x170   :  { %7162 = vst [vmem:[#allocation28_spill] sm:$0xff] %v5205_v22  ;;  %v2735_v32 = vpop.eup %2734  ;;  %v1411_v6 = vmul.f32 0.6931472, %v2733_v43  ;;  %2760 = vlog2.f32 %v5214_v35  ;;  %v1636_v9 = vsub.f32 %v1407_v5, %v7165_v29  ;;  %v5219_v27 = vmul.f32 %v5088_v61, %v1634_v56  ;;  %v5221_v22 = vld [vmem:[#allocation5 + $0x158] sm:$0xff]  ;;  %v7169_v5 = vld [vmem:[#allocation32_spill] sm:$0xff] }
 0x171   :  { %7164 = vst [vmem:[#allocation29_spill] sm:$0xff] %v5212_v60  ;;  %v2737_v52 = vpop.eup %2736  ;;  %v1413_v45 = vmul.f32 0.6931472, %v2735_v32  ;;  %2762 = vlog2.f32 %v5221_v22  ;;  %v1637_v11 = vsub.f32 %v1409_v14, %v7167_v63  ;;  %v5226_v48 = vmul.f32 %v5095_v42, %v1635_v25  ;;  %v5228_v60 = vld [vmem:[#allocation5 + $0x160] sm:$0xff]  ;;  %v7171_v14 = vld [vmem:[#allocation33_spill] sm:$0xff] }
 0x172   :  { %7166 = vst [vmem:[#allocation30_spill] sm:$0xff] %v5219_v27  ;;  %v2739_v43 = vpop.eup %2738  ;;  %v1415_v15 = vmul.f32 0.6931472, %v2737_v52  ;;  %2764 = vlog2.f32 %v5228_v60  ;;  %v1638_v61 = vsub.f32 %v1411_v6, %v7169_v5  ;;  %v5233_v56 = vmul.f32 %v5102_v19, %v1636_v9  ;;  %v5235_v27 = vld [vmem:[#allocation5 + $0x168] sm:$0xff]  ;;  %v7173_v6 = vld [vmem:[#allocation34_spill] sm:$0xff] }
 0x173   :  { %7168 = vst [vmem:[#allocation31_spill] sm:$0xff] %v5226_v48  ;;  %v2741_v32 = vpop.eup %2740  ;;  %v1417_v29 = vmul.f32 0.6931472, %v2739_v43  ;;  %2766 = vlog2.f32 %v5235_v27  ;;  %v1639_v42 = vsub.f32 %v1413_v45, %v7171_v14  ;;  %v5240_v25 = vmul.f32 %v5109_v54, %v1637_v11  ;;  %v5242_v48 = vld [vmem:[#allocation5 + $0x170] sm:$0xff]  ;;  %v7175_v45 = vld [vmem:[#allocation35_spill] sm:$0xff] }
 0x174   :  { %7170 = vst [vmem:[#allocation32_spill] sm:$0xff] %v5233_v56  ;;  %v2743_v52 = vpop.eup %2742  ;;  %v1419_v63 = vmul.f32 0.6931472, %v2741_v32  ;;  %2768 = vlog2.f32 %v5242_v48  ;;  %v1640_v19 = vsub.f32 %v1415_v15, %v7173_v6  ;;  %v5247_v9 = vmul.f32 %v5116_v46, %v1638_v61  ;;  %v5249_v56 = vld [vmem:[#allocation5 + $0x178] sm:$0xff]  ;;  %v7177_v15 = vld [vmem:[#allocation36_spill] sm:$0xff] }
 0x175   :  { %7172 = vst [vmem:[#allocation33_spill] sm:$0xff] %v5240_v25  ;;  %v2745_v43 = vpop.eup %2744  ;;  %v1421_v5 = vmul.f32 0.6931472, %v2743_v52  ;;  %2770 = vlog2.f32 %v5249_v56  ;;  %v1641_v54 = vsub.f32 %v1417_v29, %v7175_v45  ;;  %v5254_v11 = vmul.f32 %v5123_v47, %v1639_v42  ;;  %v5256_v25 = vld [vmem:[#allocation5 + $0x180] sm:$0xff]  ;;  %v7179_v29 = vld [vmem:[#allocation37_spill] sm:$0xff] }
 0x176   :  { %7174 = vst [vmem:[#allocation34_spill] sm:$0xff] %v5247_v9  ;;  %v2747_v32 = vpop.eup %2746  ;;  %v1423_v14 = vmul.f32 0.6931472, %v2745_v43  ;;  %2772 = vlog2.f32 %v5256_v25  ;;  %v1642_v46 = vsub.f32 %v1419_v63, %v7177_v15  ;;  %v5261_v61 = vmul.f32 %v5130_v13, %v1640_v19  ;;  %v5263_v9 = vld [vmem:[#allocation5 + $0x188] sm:$0xff]  ;;  %v7181_v63 = vld [vmem:[#allocation38_spill] sm:$0xff] }
 0x177   :  { %7176 = vst [vmem:[#allocation35_spill] sm:$0xff] %v5254_v11  ;;  %v2749_v52 = vpop.eup %2748  ;;  %v1425_v6 = vmul.f32 0.6931472, %v2747_v32  ;;  %2774 = vlog2.f32 %v5263_v9  ;;  %v1643_v47 = vsub.f32 %v1421_v5, %v7179_v29  ;;  %v5268_v42 = vmul.f32 %v5137_v53, %v1641_v54  ;;  %v5270_v11 = vld [vmem:[#allocation5 + $0x190] sm:$0xff]  ;;  %v7183_v5 = vld [vmem:[#allocation39_spill] sm:$0xff] }
 0x178   :  { %7178 = vst [vmem:[#allocation36_spill] sm:$0xff] %v5261_v61  ;;  %v2751_v43 = vpop.eup %2750  ;;  %v1427_v45 = vmul.f32 0.6931472, %v2749_v52  ;;  %2776 = vlog2.f32 %v5270_v11  ;;  %v1644_v13 = vsub.f32 %v1423_v14, %v7181_v63  ;;  %v5275_v19 = vmul.f32 %v5144_v18, %v1642_v46  ;;  %v5277_v61 = vld [vmem:[#allocation5 + $0x198] sm:$0xff]  ;;  %v7185_v14 = vld [vmem:[#allocation40_spill] sm:$0xff] }
 0x179   :  { %7180 = vst [vmem:[#allocation37_spill] sm:$0xff] %v5268_v42  ;;  %v2753_v32 = vpop.eup %2752  ;;  %v1429_v15 = vmul.f32 0.6931472, %v2751_v43  ;;  %2778 = vlog2.f32 %v5277_v61  ;;  %v1645_v53 = vsub.f32 %v1425_v6, %v7183_v5  ;;  %v5282_v54 = vmul.f32 %v5151_v59, %v1643_v47  ;;  %v5284_v42 = vld [vmem:[#allocation5 + $0x1a0] sm:$0xff]  ;;  %v7187_v6 = vld [vmem:[#allocation41_spill] sm:$0xff] }
 0x17a   :  { %7182 = vst [vmem:[#allocation38_spill] sm:$0xff] %v5275_v19  ;;  %v2755_v52 = vpop.eup %2754  ;;  %v1431_v29 = vmul.f32 0.6931472, %v2753_v32  ;;  %2780 = vlog2.f32 %v5284_v42  ;;  %v1646_v18 = vsub.f32 %v1427_v45, %v7185_v14  ;;  %v5289_v46 = vmul.f32 %v5158_v55, %v1644_v13  ;;  %v5291_v19 = vld [vmem:[#allocation5 + $0x1a8] sm:$0xff]  ;;  %v7189_v45 = vld [vmem:[#allocation42_spill] sm:$0xff] }
 0x17b   :  { %7184 = vst [vmem:[#allocation39_spill] sm:$0xff] %v5282_v54  ;;  %v2757_v43 = vpop.eup %2756  ;;  %v1433_v63 = vmul.f32 0.6931472, %v2755_v52  ;;  %2782 = vlog2.f32 %v5291_v19  ;;  %v1647_v59 = vsub.f32 %v1429_v15, %v7187_v6  ;;  %v5296_v47 = vmul.f32 %v5165_v20, %v1645_v53  ;;  %v5298_v54 = vld [vmem:[#allocation5 + $0x1b0] sm:$0xff]  ;;  %v7191_v15 = vld [vmem:[#allocation43_spill] sm:$0xff] }
 0x17c   :  { %7186 = vst [vmem:[#allocation40_spill] sm:$0xff] %v5289_v46  ;;  %v2759_v32 = vpop.eup %2758  ;;  %v1435_v5 = vmul.f32 0.6931472, %v2757_v43  ;;  %2784 = vlog2.f32 %v5298_v54  ;;  %v1648_v55 = vsub.f32 %v1431_v29, %v7189_v45  ;;  %v5303_v13 = vmul.f32 %v5172_v39, %v1646_v18  ;;  %v5305_v46 = vld [vmem:[#allocation5 + $0x1b8] sm:$0xff]  ;;  %v7193_v29 = vld [vmem:[#allocation44_spill] sm:$0xff] }
 0x17d   :  { %7188 = vst [vmem:[#allocation41_spill] sm:$0xff] %v5296_v47  ;;  %v2761_v52 = vpop.eup %2760  ;;  %v1437_v14 = vmul.f32 0.6931472, %v2759_v32  ;;  %2786 = vlog2.f32 %v5305_v46  ;;  %v1649_v20 = vsub.f32 %v1433_v63, %v7191_v15  ;;  %v5310_v53 = vmul.f32 %v5179_v30, %v1647_v59  ;;  %v5312_v47 = vld [vmem:[#allocation5 + $0x1c0] sm:$0xff]  ;;  %v7195_v63 = vld [vmem:[#allocation45_spill] sm:$0xff] }
 0x17e   :  { %7190 = vst [vmem:[#allocation42_spill] sm:$0xff] %v5303_v13  ;;  %v2763_v43 = vpop.eup %2762  ;;  %v1439_v6 = vmul.f32 0.6931472, %v2761_v52  ;;  %2788 = vlog2.f32 %v5312_v47  ;;  %v1650_v39 = vsub.f32 %v1435_v5, %v7193_v29  ;;  %v5317_v18 = vmul.f32 %v5186_v12, %v1648_v55  ;;  %v5319_v13 = vld [vmem:[#allocation5 + $0x1c8] sm:$0xff]  ;;  %v7197_v5 = vld [vmem:[#allocation46_spill] sm:$0xff] }
 0x17f   :  { %7192 = vst [vmem:[#allocation43_spill] sm:$0xff] %v5310_v53  ;;  %v2765_v32 = vpop.eup %2764  ;;  %v1441_v45 = vmul.f32 0.6931472, %v2763_v43  ;;  %2790 = vlog2.f32 %v5319_v13  ;;  %v1651_v30 = vsub.f32 %v1437_v14, %v7195_v63  ;;  %v5324_v59 = vmul.f32 %v5193_v49, %v1649_v20  ;;  %v5326_v53 = vld [vmem:[#allocation5 + $0x1d0] sm:$0xff]  ;;  %v7199_v14 = vld [vmem:[#allocation47_spill] sm:$0xff] }
 0x180   :  { %7194 = vst [vmem:[#allocation44_spill] sm:$0xff] %v5317_v18  ;;  %v2767_v52 = vpop.eup %2766  ;;  %v1443_v15 = vmul.f32 0.6931472, %v2765_v32  ;;  %2792 = vlog2.f32 %v5326_v53  ;;  %v1652_v12 = vsub.f32 %v1439_v6, %v7197_v5  ;;  %v5331_v55 = vmul.f32 %v5200_v3, %v1650_v39  ;;  %v5333_v18 = vld [vmem:[#allocation5 + $0x1d8] sm:$0xff]  ;;  %v7201_v6 = vld [vmem:[#allocation48_spill] sm:$0xff] }
 0x181   :  { %7196 = vst [vmem:[#allocation45_spill] sm:$0xff] %v5324_v59  ;;  %v2769_v43 = vpop.eup %2768  ;;  %v1445_v29 = vmul.f32 0.6931472, %v2767_v52  ;;  %2794 = vlog2.f32 %v5333_v18  ;;  %v1653_v49 = vsub.f32 %v1441_v45, %v7199_v14  ;;  %v5338_v20 = vmul.f32 %v5207_v34, %v1651_v30  ;;  %v5340_v59 = vld [vmem:[#allocation5 + $0x1e0] sm:$0xff]  ;;  %v7203_v45 = vld [vmem:[#allocation49_spill] sm:$0xff] }
 0x182   :  { %7198 = vst [vmem:[#allocation46_spill] sm:$0xff] %v5331_v55  ;;  %v2771_v32 = vpop.eup %2770  ;;  %v1447_v63 = vmul.f32 0.6931472, %v2769_v43  ;;  %2796 = vlog2.f32 %v5340_v59  ;;  %v1654_v3 = vsub.f32 %v1443_v15, %v7201_v6  ;;  %v5345_v39 = vmul.f32 %v5214_v35, %v1652_v12  ;;  %v5347_v55 = vld [vmem:[#allocation5 + $0x1e8] sm:$0xff]  ;;  %v7205_v15 = vld [vmem:[#allocation50_spill] sm:$0xff] }
 0x183   :  { %7200 = vst [vmem:[#allocation47_spill] sm:$0xff] %v5338_v20  ;;  %v2773_v52 = vpop.eup %2772  ;;  %v1449_v5 = vmul.f32 0.6931472, %v2771_v32  ;;  %2798 = vlog2.f32 %v5347_v55  ;;  %v1655_v34 = vsub.f32 %v1445_v29, %v7203_v45  ;;  %v5352_v30 = vmul.f32 %v5221_v22, %v1653_v49  ;;  %v5354_v20 = vld [vmem:[#allocation5 + $0x1f0] sm:$0xff]  ;;  %v7207_v29 = vld [vmem:[#allocation51_spill] sm:$0xff] }
 0x184   :  { %7202 = vst [vmem:[#allocation48_spill] sm:$0xff] %v5345_v39  ;;  %v2775_v43 = vpop.eup %2774  ;;  %v1451_v14 = vmul.f32 0.6931472, %v2773_v52  ;;  %2800 = vlog2.f32 %v5354_v20  ;;  %v1656_v35 = vsub.f32 %v1447_v63, %v7205_v15  ;;  %v5359_v12 = vmul.f32 %v5228_v60, %v1654_v3  ;;  %v5361_v39 = vld [vmem:[#allocation5 + $0x1f8] sm:$0xff]  ;;  %v7209_v63 = vld [vmem:[#allocation52_spill] sm:$0xff] }
 0x185   :  { %7204 = vst [vmem:[#allocation49_spill] sm:$0xff] %v5352_v30  ;;  %v2777_v32 = vpop.eup %2776  ;;  %v1453_v6 = vmul.f32 0.6931472, %v2775_v43  ;;  %2802 = vlog2.f32 %v5361_v39  ;;  %v1657_v22 = vsub.f32 %v1449_v5, %v7207_v29  ;;  %v5366_v49 = vmul.f32 %v5235_v27, %v1655_v34  ;;  %v5368_v30 = vld [vmem:[#allocation5 + $0x200] sm:$0xff]  ;;  %v7211_v5 = vld [vmem:[#allocation53_spill] sm:$0xff] }
 0x186   :  { %7206 = vst [vmem:[#allocation50_spill] sm:$0xff] %v5359_v12  ;;  %v2779_v52 = vpop.eup %2778  ;;  %v1455_v45 = vmul.f32 0.6931472, %v2777_v32  ;;  %2804 = vlog2.f32 %v5368_v30  ;;  %v1658_v60 = vsub.f32 %v1451_v14, %v7209_v63  ;;  %v5373_v3 = vmul.f32 %v5242_v48, %v1656_v35  ;;  %v5375_v12 = vld [vmem:[#allocation5 + $0x208] sm:$0xff]  ;;  %v7213_v14 = vld [vmem:[#allocation54_spill] sm:$0xff] }
 0x187   :  { %7208 = vst [vmem:[#allocation51_spill] sm:$0xff] %v5366_v49  ;;  %v2781_v43 = vpop.eup %2780  ;;  %v1457_v15 = vmul.f32 0.6931472, %v2779_v52  ;;  %2806 = vlog2.f32 %v5375_v12  ;;  %v1659_v27 = vsub.f32 %v1453_v6, %v7211_v5  ;;  %v5380_v34 = vmul.f32 %v5249_v56, %v1657_v22  ;;  %v5382_v49 = vld [vmem:[#allocation5 + $0x210] sm:$0xff]  ;;  %v7215_v6 = vld [vmem:[#allocation55_spill] sm:$0xff] }
 0x188   :  { %7210 = vst [vmem:[#allocation52_spill] sm:$0xff] %v5373_v3  ;;  %v2783_v32 = vpop.eup %2782  ;;  %v1459_v29 = vmul.f32 0.6931472, %v2781_v43  ;;  %2808 = vlog2.f32 %v5382_v49  ;;  %v1660_v48 = vsub.f32 %v1455_v45, %v7213_v14  ;;  %v5387_v35 = vmul.f32 %v5256_v25, %v1658_v60  ;;  %v5389_v3 = vld [vmem:[#allocation5 + $0x218] sm:$0xff]  ;;  %v7217_v45 = vld [vmem:[#allocation56_spill] sm:$0xff] }
 0x189   :  { %7212 = vst [vmem:[#allocation53_spill] sm:$0xff] %v5380_v34  ;;  %v2785_v52 = vpop.eup %2784  ;;  %v1461_v63 = vmul.f32 0.6931472, %v2783_v32  ;;  %2810 = vlog2.f32 %v5389_v3  ;;  %v1661_v56 = vsub.f32 %v1457_v15, %v7215_v6  ;;  %v5394_v22 = vmul.f32 %v5263_v9, %v1659_v27  ;;  %v5396_v34 = vld [vmem:[#allocation5 + $0x220] sm:$0xff]  ;;  %v7219_v15 = vld [vmem:[#allocation57_spill] sm:$0xff] }
 0x18a   :  { %7214 = vst [vmem:[#allocation54_spill] sm:$0xff] %v5387_v35  ;;  %v2787_v43 = vpop.eup %2786  ;;  %v1463_v5 = vmul.f32 0.6931472, %v2785_v52  ;;  %2812 = vlog2.f32 %v5396_v34  ;;  %v1662_v25 = vsub.f32 %v1459_v29, %v7217_v45  ;;  %v5401_v60 = vmul.f32 %v5270_v11, %v1660_v48  ;;  %v5403_v35 = vld [vmem:[#allocation5 + $0x228] sm:$0xff]  ;;  %v7221_v29 = vld [vmem:[#allocation58_spill] sm:$0xff] }
 0x18b   :  { %7216 = vst [vmem:[#allocation55_spill] sm:$0xff] %v5394_v22  ;;  %v2789_v32 = vpop.eup %2788  ;;  %v1465_v14 = vmul.f32 0.6931472, %v2787_v43  ;;  %2814 = vlog2.f32 %v5403_v35  ;;  %v1663_v9 = vsub.f32 %v1461_v63, %v7219_v15  ;;  %v5408_v27 = vmul.f32 %v5277_v61, %v1661_v56  ;;  %v5410_v22 = vld [vmem:[#allocation5 + $0x230] sm:$0xff]  ;;  %v7223_v63 = vld [vmem:[#allocation59_spill] sm:$0xff] }
 0x18c   :  { %7218 = vst [vmem:[#allocation56_spill] sm:$0xff] %v5401_v60  ;;  %v2791_v52 = vpop.eup %2790  ;;  %v1467_v6 = vmul.f32 0.6931472, %v2789_v32  ;;  %2816 = vlog2.f32 %v5410_v22  ;;  %v1664_v11 = vsub.f32 %v1463_v5, %v7221_v29  ;;  %v5415_v48 = vmul.f32 %v5284_v42, %v1662_v25  ;;  %v5417_v60 = vld [vmem:[#allocation5 + $0x238] sm:$0xff]  ;;  %v7225_v5 = vld [vmem:[#allocation60_spill] sm:$0xff] }
 0x18d   :  { %7220 = vst [vmem:[#allocation57_spill] sm:$0xff] %v5408_v27  ;;  %v2793_v43 = vpop.eup %2792  ;;  %v1469_v45 = vmul.f32 0.6931472, %v2791_v52  ;;  %2818 = vlog2.f32 %v5417_v60  ;;  %v1665_v61 = vsub.f32 %v1465_v14, %v7223_v63  ;;  %v5422_v56 = vmul.f32 %v5291_v19, %v1663_v9  ;;  %v5424_v27 = vld [vmem:[#allocation5 + $0x240] sm:$0xff]  ;;  %v7227_v14 = vld [vmem:[#allocation61_spill] sm:$0xff] }
 0x18e   :  { %7222 = vst [vmem:[#allocation58_spill] sm:$0xff] %v5415_v48  ;;  %v2795_v32 = vpop.eup %2794  ;;  %v1471_v15 = vmul.f32 0.6931472, %v2793_v43  ;;  %2820 = vlog2.f32 %v5424_v27  ;;  %v1666_v42 = vsub.f32 %v1467_v6, %v7225_v5  ;;  %v5429_v25 = vmul.f32 %v5298_v54, %v1664_v11  ;;  %v5431_v48 = vld [vmem:[#allocation5 + $0x248] sm:$0xff]  ;;  %v7229_v6 = vld [vmem:[#allocation62_spill] sm:$0xff] }
 0x18f   :  { %7224 = vst [vmem:[#allocation59_spill] sm:$0xff] %v5422_v56  ;;  %v2797_v52 = vpop.eup %2796  ;;  %v1473_v29 = vmul.f32 0.6931472, %v2795_v32  ;;  %2822 = vlog2.f32 %v5431_v48  ;;  %v1667_v19 = vsub.f32 %v1469_v45, %v7227_v14  ;;  %v5436_v9 = vmul.f32 %v5305_v46, %v1665_v61  ;;  %v5438_v56 = vld [vmem:[#allocation5 + $0x250] sm:$0xff]  ;;  %v7231_v45 = vld [vmem:[#allocation63_spill] sm:$0xff] }
 0x190   :  { %7226 = vst [vmem:[#allocation60_spill] sm:$0xff] %v5429_v25  ;;  %v2799_v43 = vpop.eup %2798  ;;  %v1475_v63 = vmul.f32 0.6931472, %v2797_v52  ;;  %2824 = vlog2.f32 %v5438_v56  ;;  %v1668_v54 = vsub.f32 %v1471_v15, %v7229_v6  ;;  %v5443_v11 = vmul.f32 %v5312_v47, %v1666_v42  ;;  %v5445_v25 = vld [vmem:[#allocation5 + $0x258] sm:$0xff]  ;;  %v7233_v15 = vld [vmem:[#allocation64_spill] sm:$0xff] }
 0x191   :  { %7228 = vst [vmem:[#allocation61_spill] sm:$0xff] %v5436_v9  ;;  %v2801_v32 = vpop.eup %2800  ;;  %v1477_v5 = vmul.f32 0.6931472, %v2799_v43  ;;  %2826 = vlog2.f32 %v5445_v25  ;;  %v1669_v46 = vsub.f32 %v1473_v29, %v7231_v45  ;;  %v5450_v61 = vmul.f32 %v5319_v13, %v1667_v19  ;;  %v5452_v9 = vld [vmem:[#allocation5 + $0x260] sm:$0xff]  ;;  %v7235_v29 = vld [vmem:[#allocation65_spill] sm:$0xff] }
 0x192   :  { %7230 = vst [vmem:[#allocation62_spill] sm:$0xff] %v5443_v11  ;;  %v2803_v52 = vpop.eup %2802  ;;  %v1479_v14 = vmul.f32 0.6931472, %v2801_v32  ;;  %2828 = vlog2.f32 %v5452_v9  ;;  %v1670_v47 = vsub.f32 %v1475_v63, %v7233_v15  ;;  %v5457_v42 = vmul.f32 %v5326_v53, %v1668_v54  ;;  %v5459_v11 = vld [vmem:[#allocation5 + $0x268] sm:$0xff]  ;;  %v7237_v63 = vld [vmem:[#allocation66_spill] sm:$0xff] }
 0x193   :  { %7232 = vst [vmem:[#allocation63_spill] sm:$0xff] %v5450_v61  ;;  %v2805_v43 = vpop.eup %2804  ;;  %v1481_v6 = vmul.f32 0.6931472, %v2803_v52  ;;  %2830 = vlog2.f32 %v5459_v11  ;;  %v1671_v13 = vsub.f32 %v1477_v5, %v7235_v29  ;;  %v5464_v19 = vmul.f32 %v5333_v18, %v1669_v46  ;;  %v5466_v61 = vld [vmem:[#allocation5 + $0x270] sm:$0xff]  ;;  %v7239_v5 = vld [vmem:[#allocation67_spill] sm:$0xff] }
 0x194   :  { %7234 = vst [vmem:[#allocation64_spill] sm:$0xff] %v5457_v42  ;;  %v2807_v32 = vpop.eup %2806  ;;  %v1483_v45 = vmul.f32 0.6931472, %v2805_v43  ;;  %2832 = vlog2.f32 %v5466_v61  ;;  %v1672_v53 = vsub.f32 %v1479_v14, %v7237_v63  ;;  %v5471_v54 = vmul.f32 %v5340_v59, %v1670_v47  ;;  %v5473_v42 = vld [vmem:[#allocation5 + $0x278] sm:$0xff]  ;;  %v7241_v14 = vld [vmem:[#allocation68_spill] sm:$0xff] }
 0x195   :  { %7236 = vst [vmem:[#allocation65_spill] sm:$0xff] %v5464_v19  ;;  %v2809_v52 = vpop.eup %2808  ;;  %v1485_v15 = vmul.f32 0.6931472, %v2807_v32  ;;  %2834 = vlog2.f32 %v5473_v42  ;;  %v1673_v18 = vsub.f32 %v1481_v6, %v7239_v5  ;;  %v5478_v46 = vmul.f32 %v5347_v55, %v1671_v13  ;;  %v5480_v19 = vld [vmem:[#allocation5 + $0x280] sm:$0xff]  ;;  %v7242_v6 = vld [vmem:[#allocation69_spill] sm:$0xff] }
 0x196   :  { %7238 = vst [vmem:[#allocation66_spill] sm:$0xff] %v5471_v54  ;;  %v2811_v43 = vpop.eup %2810  ;;  %v1487_v29 = vmul.f32 0.6931472, %v2809_v52  ;;  %2836 = vlog2.f32 %v5480_v19  ;;  %v1674_v59 = vsub.f32 %v1483_v45, %v7241_v14  ;;  %v5485_v47 = vmul.f32 %v5354_v20, %v1672_v53  ;;  %v5487_v54 = vld [vmem:[#allocation5 + $0x288] sm:$0xff]  ;;  %v5501_v14 = vld [vmem:[#allocation5 + $0x298] sm:$0xff] }
 0x197   :  { %7240 = vst [vmem:[#allocation67_spill] sm:$0xff] %v5478_v46  ;;  %v2813_v32 = vpop.eup %2812  ;;  %v1489_v63 = vmul.f32 0.6931472, %v2811_v43  ;;  %2838 = vlog2.f32 %v5487_v54  ;;  %v1675_v55 = vsub.f32 %v1485_v15, %v7242_v6  ;;  %v5492_v13 = vmul.f32 %v5361_v39, %v1673_v18  ;;  %v5494_v46 = vld [vmem:[#allocation5 + $0x290] sm:$0xff]  ;;  %v5508_v6 = vld [vmem:[#allocation5 + $0x2a0] sm:$0xff] }
 0x198   :  { %v2815_v52 = vpop.eup %2814  ;;  %v1491_v5 = vmul.f32 0.6931472, %v2813_v32  ;;  %2840 = vlog2.f32 %v5494_v46  ;;  %v1676_v20 = vsub.f32 %v1487_v29, %v7019_v16  ;;  %v5499_v45 = vmul.f32 %v5368_v30, %v1674_v59 }
 0x199   :  { %v2817_v53 = vpop.eup %2816  ;;  %v1493_v43 = vmul.f32 0.6931472, %v2815_v52  ;;  %2842 = vlog2.f32 %v5501_v14  ;;  %v1677_v39 = vsub.f32 %v1489_v63, %v7021_v2  ;;  %v5506_v15 = vmul.f32 %v5375_v12, %v1675_v55  ;;  %v5515_v52 = vld [vmem:[#allocation5 + $0x2a8] sm:$0xff] }
 0x19a   :  { %v2819_v18 = vpop.eup %2818  ;;  %v1495_v32 = vmul.f32 0.6931472, %v2817_v53  ;;  %2844 = vlog2.f32 %v5508_v6  ;;  %v1678_v16 = vsub.f32 %v1491_v5, %v3912_v50  ;;  %v5513_v30 = vmul.f32 %v5382_v49, %v1676_v20  ;;  %v5522_v53 = vld [vmem:[#allocation5 + $0x2b0] sm:$0xff] }
 0x19b   :  { %v2821_v29 = vpop.eup %2820  ;;  %v1497_v59 = vmul.f32 0.6931472, %v2819_v18  ;;  %2846 = vlog2.f32 %v5515_v52  ;;  %v1679_v2 = vsub.f32 %v1493_v43, %v3915_v51  ;;  %v5520_v12 = vmul.f32 %v5389_v3, %v1677_v39  ;;  %v5529_v18 = vld [vmem:[#allocation5 + $0x2b8] sm:$0xff] }
 0x19c   :  { %v2823_v63 = vpop.eup %2822  ;;  %v1499_v55 = vmul.f32 0.6931472, %v2821_v29  ;;  %2848 = vlog2.f32 %v5522_v53  ;;  %v1680_v50 = vsub.f32 %v1495_v32, %v3918_v38  ;;  %v5527_v49 = vmul.f32 %v5396_v34, %v1678_v16  ;;  %v5536_v29 = vld [vmem:[#allocation5 + $0x2c0] sm:$0xff] }
 0x19d   :  { %v2825_v5 = vpop.eup %2824  ;;  %v1501_v20 = vmul.f32 0.6931472, %v2823_v63  ;;  %2850 = vlog2.f32 %v5529_v18  ;;  %v1681_v51 = vsub.f32 %v1497_v59, %v3924_v26  ;;  %v5534_v3 = vmul.f32 %v5403_v35, %v1679_v2  ;;  %v5543_v63 = vld [vmem:[#allocation5 + $0x2c8] sm:$0xff] }
 0x19e   :  { %v2827_v43 = vpop.eup %2826  ;;  %v1503_v39 = vmul.f32 0.6931472, %v2825_v5  ;;  %2852 = vlog2.f32 %v5536_v29  ;;  %v1682_v38 = vsub.f32 %v1499_v55, %v3927_v62  ;;  %v5541_v34 = vmul.f32 %v5410_v22, %v1680_v50  ;;  %v5550_v5 = vld [vmem:[#allocation5 + $0x2d0] sm:$0xff] }
 0x19f   :  { %v2829_v32 = vpop.eup %2828  ;;  %v1505_v16 = vmul.f32 0.6931472, %v2827_v43  ;;  %2854 = vlog2.f32 %v5543_v63  ;;  %v1683_v26 = vsub.f32 %v1501_v20, %v3930_v58  ;;  %v5548_v35 = vmul.f32 %v5417_v60, %v1681_v51  ;;  %v5557_v43 = vld [vmem:[#allocation5 + $0x2d8] sm:$0xff] }
 0x1a0   :  { %v2831_v59 = vpop.eup %2830  ;;  %v1507_v2 = vmul.f32 0.6931472, %v2829_v32  ;;  %2856 = vlog2.f32 %v5550_v5  ;;  %v1684_v62 = vsub.f32 %v1503_v39, %v3936_v23  ;;  %v5555_v22 = vmul.f32 %v5424_v27, %v1682_v38  ;;  %v5564_v32 = vld [vmem:[#allocation5 + $0x2e0] sm:$0xff] }
 0x1a1   :  { %v2833_v55 = vpop.eup %2832  ;;  %v1509_v50 = vmul.f32 0.6931472, %v2831_v59  ;;  %2858 = vlog2.f32 %v5557_v43  ;;  %v1685_v58 = vsub.f32 %v1505_v16, %v3939_v31  ;;  %v5562_v60 = vmul.f32 %v5431_v48, %v1683_v26  ;;  %v5571_v59 = vld [vmem:[#allocation5 + $0x2e8] sm:$0xff] }
 0x1a2   :  { %v2835_v20 = vpop.eup %2834  ;;  %v1511_v51 = vmul.f32 0.6931472, %v2833_v55  ;;  %2860 = vlog2.f32 %v5564_v32  ;;  %v1686_v23 = vsub.f32 %v1507_v2, %v3942_v17  ;;  %v5569_v27 = vmul.f32 %v5438_v56, %v1684_v62  ;;  %v5578_v55 = vld [vmem:[#allocation5 + $0x2f0] sm:$0xff] }
 0x1a3   :  { %v2837_v39 = vpop.eup %2836  ;;  %v1513_v38 = vmul.f32 0.6931472, %v2835_v20  ;;  %2862 = vlog2.f32 %v5571_v59  ;;  %v1687_v31 = vsub.f32 %v1509_v50, %v3948_v0  ;;  %v5576_v48 = vmul.f32 %v5445_v25, %v1685_v58  ;;  %v5585_v20 = vld [vmem:[#allocation5 + $0x2f8] sm:$0xff]  ;;  %v7245_v0 = vld [vmem:[#allocation72_spill] sm:$0xff] }
 0x1a4   :  { %v2839_v16 = vpop.eup %2838  ;;  %v1515_v26 = vmul.f32 0.6931472, %v2837_v39  ;;  %2864 = vlog2.f32 %v5578_v55  ;;  %v1688_v17 = vsub.f32 %v1511_v51, %v3951_v41  ;;  %v5583_v56 = vmul.f32 %v5452_v9, %v1686_v23  ;;  %v7247_v41 = vld [vmem:[#allocation73_spill] sm:$0xff] }
 0x1a5   :  { %7243 = vst [vmem:[#allocation68_spill] sm:$0xff] %v5576_v48  ;;  %v2841_v2 = vpop.eup %2840  ;;  %v1517_v62 = vmul.f32 0.6931472, %v2839_v16  ;;  %2866 = vlog2.f32 %v5585_v20  ;;  %v1689_v25 = vsub.f32 %v1513_v38, %v7245_v0  ;;  %v5590_v50 = vmul.f32 %v5459_v11, %v1687_v31  ;;  %v5592_v48 = vld [vmem:[#allocation5 + $0x300] sm:$0xff]  ;;  %v7248_v38 = vld [vmem:[#allocation74_spill] sm:$0xff] }
 0x1a6   :  { %7244 = vst [vmem:[#allocation69_spill] sm:$0xff] %v5583_v56  ;;  %v2843_v58 = vpop.eup %2842  ;;  %v1519_v39 = vmul.f32 0.6931472, %v2841_v2  ;;  %2868 = vlog2.f32 %v5592_v48  ;;  %v1690_v9 = vsub.f32 %v1515_v26, %v7247_v41  ;;  %v5597_v51 = vmul.f32 %v5466_v61, %v1688_v17  ;;  %v5599_v56 = vld [vmem:[#allocation5 + $0x308] sm:$0xff]  ;;  %v5613_v41 = vld [vmem:[#allocation5 + $0x318] sm:$0xff] }
 0x1a7   :  { %7246 = vst [vmem:[#allocation72_spill] sm:$0xff] %v5590_v50  ;;  %v2845_v23 = vpop.eup %2844  ;;  %v1521_v16 = vmul.f32 0.6931472, %v2843_v58  ;;  %2870 = vlog2.f32 %v5599_v56  ;;  %v1691_v11 = vsub.f32 %v1517_v62, %v7248_v38  ;;  %v5604_v31 = vmul.f32 %v5473_v42, %v1689_v25  ;;  %v5606_v50 = vld [vmem:[#allocation5 + $0x310] sm:$0xff]  ;;  %v7251_v62 = vld [vmem:[#allocation76_spill] sm:$0xff] }
 0x1a8   :  { %v2847_v2 = vpop.eup %2846  ;;  %v1523_v0 = vmul.f32 0.6931472, %v2845_v23  ;;  %2872 = vlog2.f32 %v5606_v50  ;;  %v1692_v61 = vsub.f32 %v1519_v39, %v7038_v33  ;;  %v5611_v26 = vmul.f32 %v5480_v19, %v1690_v9  ;;  %v7252_v33 = vld [vmem:[#allocation77_spill] sm:$0xff] }
 0x1a9   :  { %7249 = vst [vmem:[#allocation73_spill] sm:$0xff] %v5604_v31  ;;  %v2849_v17 = vpop.eup %2848  ;;  %v1525_v58 = vmul.f32 0.6931472, %v2847_v2  ;;  %2874 = vlog2.f32 %v5613_v41  ;;  %v1693_v42 = vsub.f32 %v1521_v16, %v7251_v62  ;;  %v5618_v25 = vmul.f32 %v5487_v54, %v1691_v11  ;;  %v5620_v31 = vld [vmem:[#allocation5 + $0x320] sm:$0xff]  ;;  %v5634_v62 = vld [vmem:[#allocation5 + $0x330] sm:$0xff] }
 0x1aa   :  { %7250 = vst [vmem:[#allocation74_spill] sm:$0xff] %v5611_v26  ;;  %v2851_v23 = vpop.eup %2850  ;;  %v1527_v38 = vmul.f32 0.6931472, %v2849_v17  ;;  %2876 = vlog2.f32 %v5620_v31  ;;  %v1694_v19 = vsub.f32 %v1523_v0, %v7252_v33  ;;  %v5625_v39 = vmul.f32 %v5494_v46, %v1692_v61  ;;  %v5627_v26 = vld [vmem:[#allocation5 + $0x328] sm:$0xff]  ;;  %v7255_v0 = vld [vmem:[#allocation79_spill] sm:$0xff] }
 0x1ab   :  { %v2853_v9 = vpop.eup %2852  ;;  %v1529_v2 = vmul.f32 0.6931472, %v2851_v23  ;;  %2878 = vlog2.f32 %v5627_v26  ;;  %v1695_v54 = vsub.f32 %v1525_v58, %v7043_v10  ;;  %v5632_v16 = vmul.f32 %v5501_v14, %v1693_v42  ;;  %v7256_v10 = vld [vmem:[#allocation80_spill] sm:$0xff] }
 0x1ac   :  { %7253 = vst [vmem:[#allocation76_spill] sm:$0xff] %v5625_v39  ;;  %v2855_v11 = vpop.eup %2854  ;;  %v1531_v17 = vmul.f32 0.6931472, %v2853_v9  ;;  %2880 = vlog2.f32 %v5634_v62  ;;  %v1696_v46 = vsub.f32 %v1527_v38, %v7255_v0  ;;  %v5639_v61 = vmul.f32 %v5508_v6, %v1694_v19  ;;  %v5641_v39 = vld [vmem:[#allocation5 + $0x338] sm:$0xff]  ;;  %v5655_v0 = vld [vmem:[#allocation5 + $0x348] sm:$0xff] }
 0x1ad   :  { %7254 = vst [vmem:[#allocation77_spill] sm:$0xff] %v5632_v16  ;;  %v2857_v23 = vpop.eup %2856  ;;  %v1533_v33 = vmul.f32 0.6931472, %v2855_v11  ;;  %2882 = vlog2.f32 %v5641_v39  ;;  %v1697_v14 = vsub.f32 %v1529_v2, %v7256_v10  ;;  %v5646_v58 = vmul.f32 %v5515_v52, %v1695_v54  ;;  %v5648_v16 = vld [vmem:[#allocation5 + $0x340] sm:$0xff]  ;;  %v7259_v2 = vld [vmem:[#allocation84_spill] sm:$0xff] }
 0x1ae   :  { %v2859_v42 = vpop.eup %2858  ;;  %v1535_v9 = vmul.f32 0.6931472, %v2857_v23  ;;  %2884 = vlog2.f32 %v5648_v16  ;;  %v1698_v6 = vsub.f32 %v1531_v17, %v7048_v4  ;;  %v5653_v38 = vmul.f32 %v5522_v53, %v1696_v46  ;;  %v7260_v4 = vld [vmem:[#allocation85_spill] sm:$0xff] }
 0x1af   :  { %7257 = vst [vmem:[#allocation79_spill] sm:$0xff] %v5646_v58  ;;  %v2861_v19 = vpop.eup %2860  ;;  %v1537_v11 = vmul.f32 0.6931472, %v2859_v42  ;;  %2886 = vlog2.f32 %v5655_v0  ;;  %v1699_v52 = vsub.f32 %v1533_v33, %v7259_v2  ;;  %v5660_v54 = vmul.f32 %v5529_v18, %v1697_v14  ;;  %v5662_v58 = vld [vmem:[#allocation5 + $0x350] sm:$0xff]  ;;  %v5676_v2 = vld [vmem:[#allocation5 + $0x360] sm:$0xff] }
 0x1b0   :  { %7258 = vst [vmem:[#allocation80_spill] sm:$0xff] %v5653_v38  ;;  %v2863_v23 = vpop.eup %2862  ;;  %v1539_v10 = vmul.f32 0.6931472, %v2861_v19  ;;  %2888 = vlog2.f32 %v5662_v58  ;;  %v1700_v53 = vsub.f32 %v1535_v9, %v7260_v4  ;;  %v5667_v17 = vmul.f32 %v5536_v29, %v1698_v6  ;;  %v5669_v38 = vld [vmem:[#allocation5 + $0x358] sm:$0xff]  ;;  %v7263_v9 = vld [vmem:[#allocation87_spill] sm:$0xff] }
 0x1b1   :  { %v2865_v46 = vpop.eup %2864  ;;  %v1541_v42 = vmul.f32 0.6931472, %v2863_v23  ;;  %2890 = vlog2.f32 %v5669_v38  ;;  %v1701_v18 = vsub.f32 %v1537_v11, %v7053_v8  ;;  %v5674_v33 = vmul.f32 %v5543_v63, %v1699_v52  ;;  %v7264_v8 = vld [vmem:[#allocation88_spill] sm:$0xff] }
 0x1b2   :  { %7261 = vst [vmem:[#allocation84_spill] sm:$0xff] %v5667_v17  ;;  %v2867_v14 = vpop.eup %2866  ;;  %v1543_v19 = vmul.f32 0.6931472, %v2865_v46  ;;  %2892 = vlog2.f32 %v5676_v2  ;;  %v1702_v29 = vsub.f32 %v1539_v10, %v7263_v9  ;;  %v5681_v6 = vmul.f32 %v5550_v5, %v1700_v53  ;;  %v5683_v17 = vld [vmem:[#allocation5 + $0x368] sm:$0xff]  ;;  %v5697_v9 = vld [vmem:[#allocation5 + $0x378] sm:$0xff] }
 0x1b3   :  { %7262 = vst [vmem:[#allocation85_spill] sm:$0xff] %v5674_v33  ;;  %v2869_v23 = vpop.eup %2868  ;;  %v1545_v4 = vmul.f32 0.6931472, %v2867_v14  ;;  %2894 = vlog2.f32 %v5683_v17  ;;  %v1703_v63 = vsub.f32 %v1541_v42, %v7264_v8  ;;  %v5688_v11 = vmul.f32 %v5557_v43, %v1701_v18  ;;  %v5690_v33 = vld [vmem:[#allocation5 + $0x370] sm:$0xff]  ;;  %v7267_v42 = vld [vmem:[#allocation90_spill] sm:$0xff] }
 0x1b4   :  { %v2871_v52 = vpop.eup %2870  ;;  %v1547_v46 = vmul.f32 0.6931472, %v2869_v23  ;;  %2896 = vlog2.f32 %v5690_v33  ;;  %v1704_v5 = vsub.f32 %v1543_v19, %v7058_v37  ;;  %v5695_v10 = vmul.f32 %v5564_v32, %v1702_v29  ;;  %v7268_v37 = vld [vmem:[#allocation91_spill] sm:$0xff] }
 0x1b5   :  { %7265 = vst [vmem:[#allocation87_spill] sm:$0xff] %v5688_v11  ;;  %v2873_v53 = vpop.eup %2872  ;;  %v1549_v14 = vmul.f32 0.6931472, %v2871_v52  ;;  %2898 = vlog2.f32 %v5697_v9  ;;  %v1705_v43 = vsub.f32 %v1545_v4, %v7267_v42  ;;  %v5702_v18 = vmul.f32 %v5571_v59, %v1703_v63  ;;  %v5704_v11 = vld [vmem:[#allocation5 + $0x380] sm:$0xff]  ;;  %v5718_v42 = vld [vmem:[#allocation5 + $0x390] sm:$0xff] }
 0x1b6   :  { %7266 = vst [vmem:[#allocation88_spill] sm:$0xff] %v5695_v10  ;;  %v2875_v23 = vpop.eup %2874  ;;  %v1551_v8 = vmul.f32 0.6931472, %v2873_v53  ;;  %2900 = vlog2.f32 %v5704_v11  ;;  %v1706_v32 = vsub.f32 %v1547_v46, %v7268_v37  ;;  %v5709_v19 = vmul.f32 %v5578_v55, %v1704_v5  ;;  %v5711_v10 = vld [vmem:[#allocation5 + $0x388] sm:$0xff]  ;;  %v7271_v46 = vld [vmem:[#allocation93_spill] sm:$0xff] }
 0x1b7   :  { %v2877_v29 = vpop.eup %2876  ;;  %v1553_v52 = vmul.f32 0.6931472, %v2875_v23  ;;  %2902 = vlog2.f32 %v5711_v10  ;;  %v1707_v59 = vsub.f32 %v1549_v14, %v7063_v28  ;;  %v5716_v4 = vmul.f32 %v5585_v20, %v1705_v43  ;;  %v7272_v28 = vld [vmem:[#allocation94_spill] sm:$0xff] }
 0x1b8   :  { %7269 = vst [vmem:[#allocation90_spill] sm:$0xff] %v5709_v19  ;;  %v2879_v63 = vpop.eup %2878  ;;  %v1555_v53 = vmul.f32 0.6931472, %v2877_v29  ;;  %2904 = vlog2.f32 %v5718_v42  ;;  %v1708_v55 = vsub.f32 %v1551_v8, %v7271_v46  ;;  %v5723_v5 = vmul.f32 %v5592_v48, %v1706_v32  ;;  %v5725_v19 = vld [vmem:[#allocation5 + $0x398] sm:$0xff]  ;;  %v5739_v46 = vld [vmem:[#allocation5 + $0x3a8] sm:$0xff] }
 0x1b9   :  { %7270 = vst [vmem:[#allocation91_spill] sm:$0xff] %v5716_v4  ;;  %v2881_v23 = vpop.eup %2880  ;;  %v1557_v37 = vmul.f32 0.6931472, %v2879_v63  ;;  %2906 = vlog2.f32 %v5725_v19  ;;  %v1709_v20 = vsub.f32 %v1553_v52, %v7272_v28  ;;  %v5730_v14 = vmul.f32 %v5599_v56, %v1707_v59  ;;  %v5732_v4 = vld [vmem:[#allocation5 + $0x3a0] sm:$0xff]  ;;  %v7275_v52 = vld [vmem:[#allocation96_spill] sm:$0xff] }
 0x1ba   :  { %v2883_v43 = vpop.eup %2882  ;;  %v1559_v29 = vmul.f32 0.6931472, %v2881_v23  ;;  %2908 = vlog2.f32 %v5732_v4  ;;  %v1710_v48 = vsub.f32 %v1555_v53, %v7068_v40  ;;  %v5737_v8 = vmul.f32 %v5606_v50, %v1708_v55  ;;  %v7276_v40 = vld [vmem:[#allocation97_spill] sm:$0xff] }
 0x1bb   :  { %7273 = vst [vmem:[#allocation93_spill] sm:$0xff] %v5730_v14  ;;  %v2885_v32 = vpop.eup %2884  ;;  %v1561_v63 = vmul.f32 0.6931472, %v2883_v43  ;;  %2910 = vlog2.f32 %v5739_v46  ;;  %v1711_v56 = vsub.f32 %v1557_v37, %v7275_v52  ;;  %v5744_v59 = vmul.f32 %v5613_v41, %v1709_v20  ;;  %v5746_v14 = vld [vmem:[#allocation5 + $0x3b0] sm:$0xff]  ;;  %v5760_v52 = vld [vmem:[#allocation5 + $0x3c0] sm:$0xff] }
 0x1bc   :  { %7274 = vst [vmem:[#allocation94_spill] sm:$0xff] %v5737_v8  ;;  %v2887_v23 = vpop.eup %2886  ;;  %v1563_v28 = vmul.f32 0.6931472, %v2885_v32  ;;  %2912 = vlog2.f32 %v5746_v14  ;;  %v1712_v50 = vsub.f32 %v1559_v29, %v7276_v40  ;;  %v5751_v53 = vmul.f32 %v5620_v31, %v1710_v48  ;;  %v5753_v8 = vld [vmem:[#allocation5 + $0x3b8] sm:$0xff]  ;;  %v7279_v29 = vld [vmem:[#allocation99_spill] sm:$0xff] }
 0x1bd   :  { %v2889_v55 = vpop.eup %2888  ;;  %v1565_v43 = vmul.f32 0.6931472, %v2887_v23  ;;  %2914 = vlog2.f32 %v5753_v8  ;;  %v1713_v41 = vsub.f32 %v1561_v63, %v7073_v36  ;;  %v5758_v37 = vmul.f32 %v5627_v26, %v1711_v56  ;;  %v7281_v36 = vld [vmem:[#allocation100_spill] sm:$0xff] }
 0x1be   :  { %7277 = vst [vmem:[#allocation96_spill] sm:$0xff] %v5751_v53  ;;  %v2891_v20 = vpop.eup %2890  ;;  %v1567_v32 = vmul.f32 0.6931472, %v2889_v55  ;;  %2916 = vlog2.f32 %v5760_v52  ;;  %v1714_v31 = vsub.f32 %v1563_v28, %v7279_v29  ;;  %v5765_v48 = vmul.f32 %v5634_v62, %v1712_v50  ;;  %v5767_v53 = vld [vmem:[#allocation5 + $0x3c8] sm:$0xff]  ;;  %v7283_v28 = vld [vmem:[#allocation101_spill] sm:$0xff] }
 0x1bf   :  { %7278 = vst [vmem:[#allocation97_spill] sm:$0xff] %v5758_v37  ;;  %v2893_v23 = vpop.eup %2892  ;;  %v1569_v40 = vmul.f32 0.6931472, %v2891_v20  ;;  %2918 = vlog2.f32 %v5767_v53  ;;  %v1715_v26 = vsub.f32 %v1565_v43, %v7281_v36  ;;  %v5772_v63 = vmul.f32 %v5641_v39, %v1713_v41  ;;  %v5774_v37 = vld [vmem:[#allocation5 + $0x3d0] sm:$0xff]  ;;  %v7285_v43 = vld [vmem:[#allocation102_spill] sm:$0xff] }
 0x1c0   :  { %7280 = vst [vmem:[#allocation99_spill] sm:$0xff] %v5765_v48  ;;  %v2895_v56 = vpop.eup %2894  ;;  %v1571_v55 = vmul.f32 0.6931472, %v2893_v23  ;;  %2920 = vlog2.f32 %v5774_v37  ;;  %v1716_v62 = vsub.f32 %v1567_v32, %v7283_v28  ;;  %v5779_v50 = vmul.f32 %v5648_v16, %v1714_v31  ;;  %v5781_v48 = vld [vmem:[#allocation5 + $0x3d8] sm:$0xff]  ;;  %v7287_v32 = vld [vmem:[#allocation103_spill] sm:$0xff] }
 0x1c1   :  { %7282 = vst [vmem:[#allocation100_spill] sm:$0xff] %v5772_v63  ;;  %v2897_v20 = vpop.eup %2896  ;;  %v1573_v29 = vmul.f32 0.6931472, %v2895_v56  ;;  %2922 = vlog2.f32 %v5781_v48  ;;  %v1717_v39 = vsub.f32 %v1569_v40, %v7285_v43  ;;  %v5786_v41 = vmul.f32 %v5655_v0, %v1715_v26  ;;  %v5788_v63 = vld [vmem:[#allocation5 + $0x3e0] sm:$0xff]  ;;  %v7289_v40 = vld [vmem:[#allocation104_spill] sm:$0xff] }
 0x1c2   :  { %7284 = vst [vmem:[#allocation101_spill] sm:$0xff] %v5779_v50  ;;  %v2899_v23 = vpop.eup %2898  ;;  %v1575_v36 = vmul.f32 0.6931472, %v2897_v20  ;;  %2924 = vlog2.f32 %v5788_v63  ;;  %v1718_v16 = vsub.f32 %v1571_v55, %v7287_v32  ;;  %v5793_v31 = vmul.f32 %v5662_v58, %v1716_v62  ;;  %v5795_v50 = vld [vmem:[#allocation5 + $0x3e8] sm:$0xff]  ;;  %v7290_v55 = vld [vmem:[#allocation105_spill] sm:$0xff] }
 0x1c3   :  { %7286 = vst [vmem:[#allocation102_spill] sm:$0xff] %v5786_v41  ;;  %v2901_v56 = vpop.eup %2900  ;;  %v1577_v28 = vmul.f32 0.6931472, %v2899_v23  ;;  %2926 = vlog2.f32 %v5795_v50  ;;  %v1719_v0 = vsub.f32 %v1573_v29, %v7289_v40  ;;  %v5800_v26 = vmul.f32 %v5669_v38, %v1717_v39  ;;  %v5802_v41 = vld [vmem:[#allocation5 + $0x3f0] sm:$0xff] }
 0x1c4   :  { %7288 = vst [vmem:[#allocation103_spill] sm:$0xff] %v5793_v31  ;;  %v2903_v20 = vpop.eup %2902  ;;  %v1579_v43 = vmul.f32 0.6931472, %v2901_v56  ;;  %2928 = vlog2.f32 %v5802_v41  ;;  %v1720_v58 = vsub.f32 %v1575_v36, %v7290_v55  ;;  %v5807_v62 = vmul.f32 %v5676_v2, %v1718_v16  ;;  %v5809_v31 = vld [vmem:[#allocation5 + $0x3f8] sm:$0xff]  ;;  %v7292_v2 = vld [vmem:[#allocation123_spill] sm:$0xff] }
 0x1c5   :  { %v2905_v23 = vpop.eup %2904  ;;  %v1581_v32 = vmul.f32 0.6931472, %v2903_v20  ;;  %2930 = vlog2.f32 %v5809_v31  ;;  %v1721_v38 = vsub.f32 %v1577_v28, %v7087_v1  ;;  %v5814_v29 = vmul.f32 %v5683_v17, %v1719_v0  ;;  %v7293_v17 = vld [vmem:[#allocation124_spill] sm:$0xff] }
 0x1c6   :  { %7291 = vst [vmem:[#allocation104_spill] sm:$0xff] %v5807_v62  ;;  %v2907_v39 = vpop.eup %2906  ;;  %v1583_v56 = vmul.f32 0.6931472, %v2905_v23  ;;  %v1722_v40 = vsub.f32 %v1579_v43, %v7089_v21  ;;  %v5818_v36 = vmul.f32 %v5690_v33, %v1720_v58  ;;  %v5822_v16 = vadd.f32 %v5051_v7, %v7292_v2  ;;  %v7295_v43 = vld [vmem:[#allocation109_spill] sm:$0xff]  ;;  %v7300_v2 = vld [vmem:[#allocation83_spill] sm:$0xff] }
 0x1c7   :  { %v2909_v20 = vpop.eup %2908  ;;  %v1585_v55 = vmul.f32 0.6931472, %v2907_v39  ;;  %v1723_v62 = vsub.f32 %v1581_v32, %v7091_v57  ;;  %v5826_v1 = vmul.f32 %v5697_v9, %v1721_v38  ;;  %v5830_v28 = vadd.f32 %v5058_v24, %v7293_v17  ;;  %v7296_v7 = vld [vmem:[#allocation125_spill] sm:$0xff]  ;;  %v7298_v32 = vld [vmem:[#allocation110_spill] sm:$0xff] }
 0x1c8   :  { %v2911_v0 = vpop.eup %2910  ;;  %v1587_v21 = vmul.f32 0.6931472, %v2909_v20  ;;  %v1724_v33 = vsub.f32 %v1583_v56, %v7295_v43  ;;  %v5834_v58 = vmul.f32 %v5704_v11, %v1722_v40  ;;  %v5838_v23 = vadd.f32 %v5065_v44, %v7296_v7  ;;  %v7299_v24 = vld [vmem:[#allocation126_spill] sm:$0xff]  ;;  %v7302_v43 = vld [vmem:[#allocation111_spill] sm:$0xff]  ;;  %v7304_v7 = vld [vmem:[#allocation237_spill] sm:$0xff] }
 0x1c9   :  { %7294 = vst [vmem:[#allocation105_spill] sm:$0xff] %v5830_v28  ;;  %v2913_v39 = vpop.eup %2912  ;;  %v1589_v57 = vmul.f32 0.6931472, %v2911_v0  ;;  %v1725_v9 = vsub.f32 %v1585_v55, %v7298_v32  ;;  %v5842_v38 = vmul.f32 %v5711_v10, %v1723_v62  ;;  %v5846_v17 = vadd.f32 %v7300_v2, %v7299_v24  ;;  %v7303_v44 = vld [vmem:[#allocation127_spill] sm:$0xff]  ;;  %v7306_v32 = vld [vmem:[#allocation112_spill] sm:$0xff] }
 0x1ca   :  { %7297 = vst [vmem:[#allocation123_spill] sm:$0xff] %v5838_v23  ;;  %v2915_v20 = vpop.eup %2914  ;;  %v1591_v56 = vmul.f32 0.6931472, %v2913_v39  ;;  %v1726_v11 = vsub.f32 %v1587_v21, %v7302_v43  ;;  %v5850_v40 = vmul.f32 %v5718_v42, %v1724_v33  ;;  %v5854_v23 = vadd.f32 %v7304_v7, %v7303_v44  ;;  %v7307_v24 = vld [vmem:[#allocation128_spill] sm:$0xff]  ;;  %v7308_v2 = vld [vmem:[#allocation11_spill] sm:$0xff]  ;;  %v7310_v43 = vld [vmem:[#allocation113_spill] sm:$0xff] }
 0x1cb   :  { %7301 = vst [vmem:[#allocation124_spill] sm:$0xff] %v5846_v17  ;;  %v2917_v0 = vpop.eup %2916  ;;  %v1593_v55 = vmul.f32 0.6931472, %v2915_v20  ;;  %v1727_v10 = vsub.f32 %v1589_v57, %v7306_v32  ;;  %v5858_v62 = vmul.f32 %v5725_v19, %v1725_v9  ;;  %v5862_v17 = vadd.f32 %v7308_v2, %v7307_v24  ;;  %v7311_v44 = vld [vmem:[#allocation129_spill] sm:$0xff]  ;;  %v7312_v7 = vld [vmem:[#allocation12_spill] sm:$0xff]  ;;  %v7314_v32 = vld [vmem:[#allocation114_spill] sm:$0xff] }
 0x1cc   :  { %7305 = vst [vmem:[#allocation109_spill] sm:$0xff] %v5854_v23  ;;  %v2919_v39 = vpop.eup %2918  ;;  %v1595_v21 = vmul.f32 0.6931472, %v2917_v0  ;;  %v1728_v42 = vsub.f32 %v1591_v56, %v7310_v43  ;;  %v5866_v33 = vmul.f32 %v5732_v4, %v1726_v11  ;;  %v5870_v23 = vadd.f32 %v7312_v7, %v7311_v44  ;;  %v7315_v24 = vld [vmem:[#allocation130_spill] sm:$0xff]  ;;  %v7316_v2 = vld [vmem:[#allocation13_spill] sm:$0xff]  ;;  %v7318_v43 = vld [vmem:[#allocation115_spill] sm:$0xff] }
 0x1cd   :  { %7309 = vst [vmem:[#allocation125_spill] sm:$0xff] %v5862_v17  ;;  %v2921_v20 = vpop.eup %2920  ;;  %v1597_v57 = vmul.f32 0.6931472, %v2919_v39  ;;  %v1729_v19 = vsub.f32 %v1593_v55, %v7314_v32  ;;  %v5874_v9 = vmul.f32 %v5739_v46, %v1727_v10  ;;  %v5878_v17 = vadd.f32 %v7316_v2, %v7315_v24  ;;  %v7319_v44 = vld [vmem:[#allocation131_spill] sm:$0xff]  ;;  %v7320_v7 = vld [vmem:[#allocation14_spill] sm:$0xff]  ;;  %v7321_v32 = vld [vmem:[#allocation116_spill] sm:$0xff] }
 0x1ce   :  { %7313 = vst [vmem:[#allocation110_spill] sm:$0xff] %v5870_v23  ;;  %v2923_v0 = vpop.eup %2922  ;;  %v1599_v56 = vmul.f32 0.6931472, %v2921_v20  ;;  %v1730_v4 = vsub.f32 %v1595_v21, %v7318_v43  ;;  %v5882_v11 = vmul.f32 %v5746_v14, %v1728_v42  ;;  %v5886_v23 = vadd.f32 %v7320_v7, %v7319_v44  ;;  %v7322_v24 = vld [vmem:[#allocation132_spill] sm:$0xff]  ;;  %v7323_v2 = vld [vmem:[#allocation15_spill] sm:$0xff]  ;;  %v7325_v43 = vld [vmem:[#allocation117_spill] sm:$0xff] }
 0x1cf   :  { %7317 = vst [vmem:[#allocation126_spill] sm:$0xff] %v5878_v17  ;;  %v2925_v39 = vpop.eup %2924  ;;  %v1601_v55 = vmul.f32 0.6931472, %v2923_v0  ;;  %v1731_v46 = vsub.f32 %v1597_v57, %v7321_v32  ;;  %v5890_v10 = vmul.f32 %v5753_v8, %v1729_v19  ;;  %v5894_v17 = vadd.f32 %v7323_v2, %v7322_v24  ;;  %v7326_v44 = vld [vmem:[#allocation133_spill] sm:$0xff]  ;;  %v7327_v7 = vld [vmem:[#allocation16_spill] sm:$0xff]  ;;  %v7329_v32 = vld [vmem:[#allocation118_spill] sm:$0xff] }
 0x1d0   :  { %v2927_v20 = vpop.eup %2926  ;;  %v1603_v21 = vmul.f32 0.6931472, %v2925_v39  ;;  %v1732_v14 = vsub.f32 %v1599_v56, %v7325_v43  ;;  %v5898_v42 = vmul.f32 %v5760_v52, %v1730_v4  ;;  %v5902_v28 = vadd.f32 %v7327_v7, %v7326_v44  ;;  %v7330_v24 = vld [vmem:[#allocation134_spill] sm:$0xff]  ;;  %v7331_v2 = vld [vmem:[#allocation17_spill] sm:$0xff]  ;;  %v7333_v43 = vld [vmem:[#allocation119_spill] sm:$0xff] }
 0x1d1   :  { %7324 = vst [vmem:[#allocation83_spill] sm:$0xff] %v5894_v17  ;;  %v2929_v0 = vpop.eup %2928  ;;  %v1605_v57 = vmul.f32 0.6931472, %v2927_v20  ;;  %v1733_v8 = vsub.f32 %v1601_v55, %v7329_v32  ;;  %v5906_v19 = vmul.f32 %v5767_v53, %v1731_v46  ;;  %v5910_v17 = vadd.f32 %v7331_v2, %v7330_v24  ;;  %v7334_v44 = vld [vmem:[#allocation135_spill] sm:$0xff]  ;;  %v7335_v7 = vld [vmem:[#allocation18_spill] sm:$0xff]  ;;  %v7336_v55 = vld [vmem:[#allocation120_spill] sm:$0xff] }
 0x1d2   :  { %7328 = vst [vmem:[#allocation111_spill] sm:$0xff] %v5902_v28  ;;  %v2931_v39 = vpop.eup %2930  ;;  %v1607_v56 = vmul.f32 0.6931472, %v2929_v0  ;;  %v1734_v52 = vsub.f32 %v1603_v21, %v7333_v43  ;;  %v5914_v4 = vmul.f32 %v5774_v37, %v1732_v14  ;;  %v5918_v28 = vadd.f32 %v7335_v7, %v7334_v44  ;;  %v7337_v46 = vld [vmem:[#allocation136_spill] sm:$0xff]  ;;  %v7338_v24 = vld [vmem:[#allocation19_spill] sm:$0xff]  ;;  %v7339_v0 = vld [vmem:[#allocation121_spill] sm:$0xff] }
 0x1d3   :  { %7332 = vst [vmem:[#allocation127_spill] sm:$0xff] %v5910_v17  ;;  %v1609_v20 = vmul.f32 0.6931472, %v2931_v39  ;;  %v1735_v32 = vsub.f32 %v1605_v57, %v7336_v55  ;;  %v5922_v53 = vmul.f32 %v5781_v48, %v1733_v8  ;;  %v5926_v2 = vadd.f32 %v7338_v24, %v7337_v46  ;;  %v7340_v37 = vld [vmem:[#allocation137_spill] sm:$0xff]  ;;  %v7341_v14 = vld [vmem:[#allocation20_spill] sm:$0xff]  ;;  %v7342_v44 = vld [vmem:[#allocation138_spill] sm:$0xff] }
 0x1d4   :  { %v1736_v17 = vsub.f32 %v1607_v56, %v7339_v0  ;;  %v5930_v21 = vmul.f32 %v5788_v63, %v1734_v52  ;;  %v5934_v43 = vadd.f32 %v7341_v14, %v7340_v37  ;;  %v7343_v39 = vld [vmem:[#allocation21_spill] sm:$0xff]  ;;  %v7345_v57 = vld [vmem:[#allocation122_spill] sm:$0xff]  ;;  %v7346_v55 = vld [vmem:[#allocation139_spill] sm:$0xff] }
 0x1d5   :  { %v5938_v7 = vadd.f32 %v7343_v39, %v7342_v44  ;;  %v1737_v48 = vsub.f32 %v1609_v20, %v7345_v57  ;;  %v5942_v8 = vmul.f32 %v5795_v50, %v1735_v32  ;;  %v7347_v46 = vld [vmem:[#allocation22_spill] sm:$0xff]  ;;  %v7348_v56 = vld [vmem:[#allocation140_spill] sm:$0xff]  ;;  %v7349_v63 = vld [vmem:[#allocation23_spill] sm:$0xff] }
 0x1d6   :  { %v5946_v24 = vadd.f32 %v7347_v46, %v7346_v55  ;;  %v5950_v52 = vadd.f32 %v7349_v63, %v7348_v56  ;;  %v5953_v0 = vmul.f32 %v5802_v41, %v1736_v17  ;;  %v7351_v37 = vld [vmem:[#allocation141_spill] sm:$0xff]  ;;  %v7352_v14 = vld [vmem:[#allocation24_spill] sm:$0xff]  ;;  %v7354_v39 = vld [vmem:[#allocation142_spill] sm:$0xff] }
 0x1d7   :  { %7344 = vst [vmem:[#allocation237_spill] sm:$0xff] %v5938_v7  ;;  %v5957_v44 = vadd.f32 %v7352_v14, %v7351_v37  ;;  %v7355_v20 = vld [vmem:[#allocation25_spill] sm:$0xff]  ;;  %v7357_v50 = vld [vmem:[#allocation143_spill] sm:$0xff]  ;;  %v7358_v32 = vld [vmem:[#allocation26_spill] sm:$0xff]  ;;  %v5968_v55 = vmul.f32 %v5809_v31, %v1737_v48 }
 0x1d8   :  { %7350 = vst [vmem:[#allocation112_spill] sm:$0xff] %v5950_v52  ;;  %v5961_v57 = vadd.f32 %v7355_v20, %v7354_v39  ;;  %v5965_v7 = vadd.f32 %v7358_v32, %v7357_v50  ;;  %v7360_v46 = vld [vmem:[#allocation144_spill] sm:$0xff]  ;;  %v7361_v56 = vld [vmem:[#allocation27_spill] sm:$0xff]  ;;  %v7363_v41 = vld [vmem:[#allocation145_spill] sm:$0xff] }
 0x1d9   :  { %7353 = vst [vmem:[#allocation128_spill] sm:$0xff] %v5957_v44  ;;  %v5972_v63 = vadd.f32 %v7361_v56, %v7360_v46  ;;  %v7364_v17 = vld [vmem:[#allocation28_spill] sm:$0xff]  ;;  %v7366_v37 = vld [vmem:[#allocation146_spill] sm:$0xff]  ;;  %v7367_v14 = vld [vmem:[#allocation29_spill] sm:$0xff] }
 0x1da   :  { %7356 = vst [vmem:[#allocation11_spill] sm:$0xff] %v5961_v57  ;;  %7359 = vst [vmem:[#allocation113_spill] sm:$0xff] %v5965_v7  ;;  %v5976_v52 = vadd.f32 %v7364_v17, %v7363_v41  ;;  %v5980_v44 = vadd.f32 %v7367_v14, %v7366_v37  ;;  %v7369_v39 = vld [vmem:[#allocation147_spill] sm:$0xff]  ;;  %v7370_v20 = vld [vmem:[#allocation30_spill] sm:$0xff] }
 0x1db   :  { %7362 = vst [vmem:[#allocation129_spill] sm:$0xff] %v5972_v63  ;;  %v5984_v57 = vadd.f32 %v7370_v20, %v7369_v39  ;;  %v7372_v50 = vld [vmem:[#allocation148_spill] sm:$0xff]  ;;  %v7373_v32 = vld [vmem:[#allocation31_spill] sm:$0xff]  ;;  %v7375_v48 = vld [vmem:[#allocation149_spill] sm:$0xff] }
 0x1dc   :  { %7365 = vst [vmem:[#allocation12_spill] sm:$0xff] %v5976_v52  ;;  %7368 = vst [vmem:[#allocation114_spill] sm:$0xff] %v5980_v44  ;;  %v5988_v31 = vadd.f32 %v7373_v32, %v7372_v50  ;;  %v7376_v7 = vld [vmem:[#allocation32_spill] sm:$0xff]  ;;  %v7378_v56 = vld [vmem:[#allocation150_spill] sm:$0xff] }
 0x1dd   :  { %7371 = vst [vmem:[#allocation130_spill] sm:$0xff] %v5984_v57  ;;  %v5992_v46 = vadd.f32 %v7376_v7, %v7375_v48  ;;  %v7379_v63 = vld [vmem:[#allocation33_spill] sm:$0xff]  ;;  %v7381_v17 = vld [vmem:[#allocation151_spill] sm:$0xff]  ;;  %v7382_v52 = vld [vmem:[#allocation34_spill] sm:$0xff] }
 0x1de   :  { %7374 = vst [vmem:[#allocation13_spill] sm:$0xff] %v5988_v31  ;;  %v5996_v41 = vadd.f32 %v7379_v63, %v7378_v56  ;;  %v6000_v37 = vadd.f32 %v7382_v52, %v7381_v17  ;;  %v7384_v14 = vld [vmem:[#allocation152_spill] sm:$0xff]  ;;  %v7385_v44 = vld [vmem:[#allocation35_spill] sm:$0xff]  ;;  %v7387_v20 = vld [vmem:[#allocation153_spill] sm:$0xff] }
 0x1df   :  { %7377 = vst [vmem:[#allocation115_spill] sm:$0xff] %v5992_v46  ;;  %v6004_v39 = vadd.f32 %v7385_v44, %v7384_v14  ;;  %v7388_v57 = vld [vmem:[#allocation36_spill] sm:$0xff]  ;;  %v7390_v32 = vld [vmem:[#allocation154_spill] sm:$0xff]  ;;  %v7391_v31 = vld [vmem:[#allocation37_spill] sm:$0xff] }
 0x1e0   :  { %7380 = vst [vmem:[#allocation131_spill] sm:$0xff] %v5996_v41  ;;  %7383 = vst [vmem:[#allocation14_spill] sm:$0xff] %v6000_v37  ;;  %v6008_v50 = vadd.f32 %v7388_v57, %v7387_v20  ;;  %v6012_v7 = vadd.f32 %v7391_v31, %v7390_v32  ;;  %v7393_v48 = vld [vmem:[#allocation155_spill] sm:$0xff]  ;;  %v7394_v46 = vld [vmem:[#allocation38_spill] sm:$0xff] }
 0x1e1   :  { %7386 = vst [vmem:[#allocation116_spill] sm:$0xff] %v6004_v39  ;;  %v6016_v63 = vadd.f32 %v7394_v46, %v7393_v48  ;;  %v7396_v56 = vld [vmem:[#allocation156_spill] sm:$0xff]  ;;  %v7397_v41 = vld [vmem:[#allocation39_spill] sm:$0xff]  ;;  %v7399_v17 = vld [vmem:[#allocation157_spill] sm:$0xff] }
 0x1e2   :  { %7389 = vst [vmem:[#allocation132_spill] sm:$0xff] %v6008_v50  ;;  %7392 = vst [vmem:[#allocation15_spill] sm:$0xff] %v6012_v7  ;;  %v6020_v52 = vadd.f32 %v7397_v41, %v7396_v56  ;;  %v7400_v37 = vld [vmem:[#allocation40_spill] sm:$0xff]  ;;  %v7402_v14 = vld [vmem:[#allocation158_spill] sm:$0xff] }
 0x1e3   :  { %7395 = vst [vmem:[#allocation117_spill] sm:$0xff] %v6016_v63  ;;  %v6024_v44 = vadd.f32 %v7400_v37, %v7399_v17  ;;  %v7403_v39 = vld [vmem:[#allocation41_spill] sm:$0xff]  ;;  %v7405_v20 = vld [vmem:[#allocation159_spill] sm:$0xff]  ;;  %v7406_v50 = vld [vmem:[#allocation42_spill] sm:$0xff] }
 0x1e4   :  { %7398 = vst [vmem:[#allocation133_spill] sm:$0xff] %v6020_v52  ;;  %v6028_v57 = vadd.f32 %v7403_v39, %v7402_v14  ;;  %v6032_v31 = vadd.f32 %v7406_v50, %v7405_v20  ;;  %v7408_v32 = vld [vmem:[#allocation160_spill] sm:$0xff]  ;;  %v7409_v7 = vld [vmem:[#allocation43_spill] sm:$0xff]  ;;  %v7411_v48 = vld [vmem:[#allocation161_spill] sm:$0xff] }
 0x1e5   :  { %7401 = vst [vmem:[#allocation16_spill] sm:$0xff] %v6024_v44  ;;  %v6036_v46 = vadd.f32 %v7409_v7, %v7408_v32  ;;  %v7412_v63 = vld [vmem:[#allocation44_spill] sm:$0xff]  ;;  %v7414_v56 = vld [vmem:[#allocation162_spill] sm:$0xff]  ;;  %v7415_v52 = vld [vmem:[#allocation45_spill] sm:$0xff] }
 0x1e6   :  { %7404 = vst [vmem:[#allocation118_spill] sm:$0xff] %v6028_v57  ;;  %7407 = vst [vmem:[#allocation134_spill] sm:$0xff] %v6032_v31  ;;  %v6040_v41 = vadd.f32 %v7412_v63, %v7411_v48  ;;  %v6044_v37 = vadd.f32 %v7415_v52, %v7414_v56  ;;  %v7417_v17 = vld [vmem:[#allocation163_spill] sm:$0xff]  ;;  %v7418_v44 = vld [vmem:[#allocation46_spill] sm:$0xff] }
 0x1e7   :  { %7410 = vst [vmem:[#allocation17_spill] sm:$0xff] %v6036_v46  ;;  %v6048_v39 = vadd.f32 %v7418_v44, %v7417_v17  ;;  %v7420_v14 = vld [vmem:[#allocation164_spill] sm:$0xff]  ;;  %v7421_v57 = vld [vmem:[#allocation47_spill] sm:$0xff]  ;;  %v7423_v20 = vld [vmem:[#allocation165_spill] sm:$0xff] }
 0x1e8   :  { %7413 = vst [vmem:[#allocation119_spill] sm:$0xff] %v6040_v41  ;;  %7416 = vst [vmem:[#allocation135_spill] sm:$0xff] %v6044_v37  ;;  %v6052_v50 = vadd.f32 %v7421_v57, %v7420_v14  ;;  %v7424_v31 = vld [vmem:[#allocation48_spill] sm:$0xff]  ;;  %v7426_v32 = vld [vmem:[#allocation166_spill] sm:$0xff] }
 0x1e9   :  { %7419 = vst [vmem:[#allocation18_spill] sm:$0xff] %v6048_v39  ;;  %v6056_v7 = vadd.f32 %v7424_v31, %v7423_v20  ;;  %v7427_v46 = vld [vmem:[#allocation49_spill] sm:$0xff]  ;;  %v7429_v48 = vld [vmem:[#allocation167_spill] sm:$0xff]  ;;  %v7430_v41 = vld [vmem:[#allocation50_spill] sm:$0xff] }
 0x1ea   :  { %7422 = vst [vmem:[#allocation120_spill] sm:$0xff] %v6052_v50  ;;  %v6060_v63 = vadd.f32 %v7427_v46, %v7426_v32  ;;  %v6064_v52 = vadd.f32 %v7430_v41, %v7429_v48  ;;  %v7432_v56 = vld [vmem:[#allocation168_spill] sm:$0xff]  ;;  %v7433_v37 = vld [vmem:[#allocation51_spill] sm:$0xff]  ;;  %v7435_v17 = vld [vmem:[#allocation169_spill] sm:$0xff] }
 0x1eb   :  { %7425 = vst [vmem:[#allocation136_spill] sm:$0xff] %v6056_v7  ;;  %v6068_v44 = vadd.f32 %v7433_v37, %v7432_v56  ;;  %v7436_v39 = vld [vmem:[#allocation52_spill] sm:$0xff]  ;;  %v7438_v14 = vld [vmem:[#allocation170_spill] sm:$0xff]  ;;  %v7439_v50 = vld [vmem:[#allocation53_spill] sm:$0xff] }
 0x1ec   :  { %7428 = vst [vmem:[#allocation19_spill] sm:$0xff] %v6060_v63  ;;  %7431 = vst [vmem:[#allocation121_spill] sm:$0xff] %v6064_v52  ;;  %v6072_v57 = vadd.f32 %v7436_v39, %v7435_v17  ;;  %v6076_v31 = vadd.f32 %v7439_v50, %v7438_v14  ;;  %v7441_v20 = vld [vmem:[#allocation171_spill] sm:$0xff]  ;;  %v7442_v7 = vld [vmem:[#allocation54_spill] sm:$0xff] }
 0x1ed   :  { %7434 = vst [vmem:[#allocation137_spill] sm:$0xff] %v6068_v44  ;;  %v6080_v46 = vadd.f32 %v7442_v7, %v7441_v20  ;;  %v7444_v32 = vld [vmem:[#allocation172_spill] sm:$0xff]  ;;  %v7445_v63 = vld [vmem:[#allocation55_spill] sm:$0xff]  ;;  %v7447_v48 = vld [vmem:[#allocation173_spill] sm:$0xff] }
 0x1ee   :  { %7437 = vst [vmem:[#allocation20_spill] sm:$0xff] %v6072_v57  ;;  %7440 = vst [vmem:[#allocation138_spill] sm:$0xff] %v6076_v31  ;;  %v6084_v41 = vadd.f32 %v7445_v63, %v7444_v32  ;;  %v7448_v52 = vld [vmem:[#allocation56_spill] sm:$0xff]  ;;  %v7450_v56 = vld [vmem:[#allocation174_spill] sm:$0xff] }
 0x1ef   :  { %7443 = vst [vmem:[#allocation21_spill] sm:$0xff] %v6080_v46  ;;  %v6088_v37 = vadd.f32 %v7448_v52, %v7447_v48  ;;  %v7451_v44 = vld [vmem:[#allocation57_spill] sm:$0xff]  ;;  %v7453_v17 = vld [vmem:[#allocation175_spill] sm:$0xff]  ;;  %v7454_v57 = vld [vmem:[#allocation58_spill] sm:$0xff] }
 0x1f0   :  { %7446 = vst [vmem:[#allocation122_spill] sm:$0xff] %v6084_v41  ;;  %v6092_v39 = vadd.f32 %v7451_v44, %v7450_v56  ;;  %v6096_v50 = vadd.f32 %v7454_v57, %v7453_v17  ;;  %v7456_v14 = vld [vmem:[#allocation176_spill] sm:$0xff]  ;;  %v7457_v31 = vld [vmem:[#allocation59_spill] sm:$0xff]  ;;  %v7459_v20 = vld [vmem:[#allocation177_spill] sm:$0xff] }
 0x1f1   :  { %7449 = vst [vmem:[#allocation139_spill] sm:$0xff] %v6088_v37  ;;  %v6100_v7 = vadd.f32 %v7457_v31, %v7456_v14  ;;  %v7460_v46 = vld [vmem:[#allocation60_spill] sm:$0xff]  ;;  %v7462_v32 = vld [vmem:[#allocation178_spill] sm:$0xff]  ;;  %v7463_v41 = vld [vmem:[#allocation61_spill] sm:$0xff] }
 0x1f2   :  { %7452 = vst [vmem:[#allocation22_spill] sm:$0xff] %v6092_v39  ;;  %7455 = vst [vmem:[#allocation140_spill] sm:$0xff] %v6096_v50  ;;  %v6104_v63 = vadd.f32 %v7460_v46, %v7459_v20  ;;  %v6108_v52 = vadd.f32 %v7463_v41, %v7462_v32  ;;  %v7465_v48 = vld [vmem:[#allocation179_spill] sm:$0xff]  ;;  %v7466_v37 = vld [vmem:[#allocation62_spill] sm:$0xff] }
 0x1f3   :  { %7458 = vst [vmem:[#allocation23_spill] sm:$0xff] %v6100_v7  ;;  %v6112_v44 = vadd.f32 %v7466_v37, %v7465_v48  ;;  %v7467_v56 = vld [vmem:[#allocation180_spill] sm:$0xff]  ;;  %v7468_v39 = vld [vmem:[#allocation63_spill] sm:$0xff]  ;;  %v7469_v17 = vld [vmem:[#allocation181_spill] sm:$0xff] }
 0x1f4   :  { %7461 = vst [vmem:[#allocation141_spill] sm:$0xff] %v6104_v63  ;;  %7464 = vst [vmem:[#allocation24_spill] sm:$0xff] %v6108_v52  ;;  %v6116_v57 = vadd.f32 %v7468_v39, %v7467_v56  ;;  %v7470_v50 = vld [vmem:[#allocation64_spill] sm:$0xff]  ;;  %v7471_v14 = vld [vmem:[#allocation182_spill] sm:$0xff] }
 0x1f5   :  { %v6120_v31 = vadd.f32 %v7470_v50, %v7469_v17  ;;  %v7472_v7 = vld [vmem:[#allocation65_spill] sm:$0xff]  ;;  %v7473_v20 = vld [vmem:[#allocation183_spill] sm:$0xff]  ;;  %v7474_v63 = vld [vmem:[#allocation66_spill] sm:$0xff] }
 0x1f6   :  { %v6124_v46 = vadd.f32 %v7472_v7, %v7471_v14  ;;  %v6128_v41 = vadd.f32 %v7474_v63, %v7473_v20  ;;  %v7475_v32 = vld [vmem:[#allocation184_spill] sm:$0xff]  ;;  %v7476_v52 = vld [vmem:[#allocation67_spill] sm:$0xff]  ;;  %v7477_v48 = vld [vmem:[#allocation185_spill] sm:$0xff] }
 0x1f7   :  { %v6132_v37 = vadd.f32 %v7476_v52, %v7475_v32  ;;  %v6136_v39 = vadd.f32 %v5485_v47, %v7477_v48  ;;  %v7478_v56 = vld [vmem:[#allocation186_spill] sm:$0xff]  ;;  %v7480_v14 = vld [vmem:[#allocation71_spill] sm:$0xff]  ;;  %v7482_v32 = vld [vmem:[#allocation188_spill] sm:$0xff] }
 0x1f8   :  { %v6140_v50 = vadd.f32 %v5492_v13, %v7478_v56  ;;  %v7479_v17 = vld [vmem:[#allocation70_spill] sm:$0xff]  ;;  %v6148_v63 = vadd.f32 %v5506_v15, %v7480_v14  ;;  %v7481_v20 = vld [vmem:[#allocation187_spill] sm:$0xff]  ;;  %v6156_v47 = vadd.f32 %v5520_v12, %v7482_v32  ;;  %v7483_v48 = vld [vmem:[#allocation189_spill] sm:$0xff] }
 0x1f9   :  { %v6144_v7 = vadd.f32 %v5499_v45, %v7479_v17  ;;  %v6152_v52 = vadd.f32 %v5513_v30, %v7481_v20  ;;  %v6160_v13 = vadd.f32 %v5527_v49, %v7483_v48  ;;  %v7484_v56 = vld [vmem:[#allocation190_spill] sm:$0xff]  ;;  %v7486_v17 = vld [vmem:[#allocation191_spill] sm:$0xff]  ;;  %v7488_v14 = vld [vmem:[#allocation192_spill] sm:$0xff] }
 0x1fa   :  { %v6164_v45 = vadd.f32 %v5534_v3, %v7484_v56  ;;  %v6168_v15 = vadd.f32 %v5541_v34, %v7486_v17  ;;  %v6172_v30 = vadd.f32 %v5548_v35, %v7488_v14  ;;  %v7490_v20 = vld [vmem:[#allocation193_spill] sm:$0xff]  ;;  %v7491_v32 = vld [vmem:[#allocation194_spill] sm:$0xff]  ;;  %v7493_v48 = vld [vmem:[#allocation195_spill] sm:$0xff] }
 0x1fb   :  { %v6176_v12 = vadd.f32 %v5555_v22, %v7490_v20  ;;  %v6180_v49 = vadd.f32 %v5562_v60, %v7491_v32  ;;  %v6184_v3 = vadd.f32 %v5569_v27, %v7493_v48  ;;  %v7495_v56 = vld [vmem:[#allocation196_spill] sm:$0xff]  ;;  %v7497_v17 = vld [vmem:[#allocation197_spill] sm:$0xff]  ;;  %v7500_v14 = vld [vmem:[#allocation198_spill] sm:$0xff] }
 0x1fc   :  { %7485 = vst [vmem:[#allocation142_spill] sm:$0xff] %v6164_v45  ;;  %7487 = vst [vmem:[#allocation25_spill] sm:$0xff] %v6168_v15  ;;  %v7496_v45 = vld [vmem:[#allocation68_spill] sm:$0xff]  ;;  %v7498_v15 = vld [vmem:[#allocation69_spill] sm:$0xff] }
 0x1fd   :  { %7489 = vst [vmem:[#allocation143_spill] sm:$0xff] %v6172_v30  ;;  %7492 = vst [vmem:[#allocation26_spill] sm:$0xff] %v6180_v49  ;;  %v6188_v34 = vadd.f32 %v7496_v45, %v7495_v56  ;;  %v6192_v35 = vadd.f32 %v7498_v15, %v7497_v17  ;;  %v7501_v30 = vld [vmem:[#allocation72_spill] sm:$0xff]  ;;  %v7503_v20 = vld [vmem:[#allocation199_spill] sm:$0xff] }
 0x1fe   :  { %7494 = vst [vmem:[#allocation144_spill] sm:$0xff] %v6184_v3  ;;  %v6196_v22 = vadd.f32 %v7501_v30, %v7500_v14  ;;  %v6200_v60 = vadd.f32 %v5597_v51, %v7503_v20  ;;  %v7504_v32 = vld [vmem:[#allocation200_spill] sm:$0xff]  ;;  %v7505_v49 = vld [vmem:[#allocation73_spill] sm:$0xff]  ;;  %v7507_v48 = vld [vmem:[#allocation75_spill] sm:$0xff] }
 0x1ff   :  { %7499 = vst [vmem:[#allocation27_spill] sm:$0xff] %v6192_v35  ;;  %v6204_v27 = vadd.f32 %v7505_v49, %v7504_v32  ;;  %v7508_v3 = vld [vmem:[#allocation74_spill] sm:$0xff]  ;;  %v7510_v56 = vld [vmem:[#allocation201_spill] sm:$0xff]  ;;  %v7512_v35 = vld [vmem:[#allocation76_spill] sm:$0xff] }
 0x200   :  { %7502 = vst [vmem:[#allocation145_spill] sm:$0xff] %v6196_v22  ;;  %v6208_v45 = vadd.f32 %v7508_v3, %v7507_v48  ;;  %v6212_v15 = vadd.f32 %v5618_v25, %v7510_v56  ;;  %v7511_v17 = vld [vmem:[#allocation202_spill] sm:$0xff]  ;;  %v7515_v22 = vld [vmem:[#allocation77_spill] sm:$0xff]  ;;  %v7517_v20 = vld [vmem:[#allocation203_spill] sm:$0xff] }
 0x201   :  { %7506 = vst [vmem:[#allocation28_spill] sm:$0xff] %v6204_v27  ;;  %v6216_v30 = vadd.f32 %v7512_v35, %v7511_v17  ;;  %v7514_v14 = vld [vmem:[#allocation78_spill] sm:$0xff]  ;;  %v6224_v49 = vadd.f32 %v5639_v61, %v7517_v20  ;;  %v7518_v32 = vld [vmem:[#allocation204_spill] sm:$0xff]  ;;  %v7519_v27 = vld [vmem:[#allocation79_spill] sm:$0xff] }
 0x202   :  { %7509 = vst [vmem:[#allocation146_spill] sm:$0xff] %v6208_v45  ;;  %v6220_v51 = vadd.f32 %v7515_v22, %v7514_v14  ;;  %v6228_v3 = vadd.f32 %v7519_v27, %v7518_v32  ;;  %v7521_v48 = vld [vmem:[#allocation81_spill] sm:$0xff]  ;;  %v7522_v45 = vld [vmem:[#allocation80_spill] sm:$0xff]  ;;  %v7525_v17 = vld [vmem:[#allocation206_spill] sm:$0xff] }
 0x203   :  { %7513 = vst [vmem:[#allocation29_spill] sm:$0xff] %v6216_v30  ;;  %v6232_v25 = vadd.f32 %v7522_v45, %v7521_v48  ;;  %v7524_v56 = vld [vmem:[#allocation205_spill] sm:$0xff]  ;;  %v7526_v30 = vld [vmem:[#allocation84_spill] sm:$0xff]  ;;  %v7528_v14 = vld [vmem:[#allocation86_spill] sm:$0xff] }
 0x204   :  { %7516 = vst [vmem:[#allocation147_spill] sm:$0xff] %v6220_v51  ;;  %7520 = vst [vmem:[#allocation30_spill] sm:$0xff] %v6228_v3  ;;  %v6236_v35 = vadd.f32 %v5660_v54, %v7524_v56  ;;  %v6240_v22 = vadd.f32 %v7526_v30, %v7525_v17  ;;  %v7529_v51 = vld [vmem:[#allocation85_spill] sm:$0xff]  ;;  %v7531_v20 = vld [vmem:[#allocation207_spill] sm:$0xff] }
 0x205   :  { %7523 = vst [vmem:[#allocation148_spill] sm:$0xff] %v6232_v25  ;;  %v6244_v61 = vadd.f32 %v7529_v51, %v7528_v14  ;;  %v6248_v27 = vadd.f32 %v5681_v6, %v7531_v20  ;;  %v7532_v32 = vld [vmem:[#allocation208_spill] sm:$0xff]  ;;  %v7533_v3 = vld [vmem:[#allocation87_spill] sm:$0xff]  ;;  %v7535_v48 = vld [vmem:[#allocation89_spill] sm:$0xff] }
 0x206   :  { %7527 = vst [vmem:[#allocation31_spill] sm:$0xff] %v6240_v22  ;;  %v6252_v45 = vadd.f32 %v7533_v3, %v7532_v32  ;;  %v7536_v25 = vld [vmem:[#allocation88_spill] sm:$0xff]  ;;  %v7538_v56 = vld [vmem:[#allocation209_spill] sm:$0xff]  ;;  %v7539_v17 = vld [vmem:[#allocation210_spill] sm:$0xff] }
 0x207   :  { %7530 = vst [vmem:[#allocation149_spill] sm:$0xff] %v6244_v61  ;;  %v6256_v54 = vadd.f32 %v7536_v25, %v7535_v48  ;;  %v6260_v30 = vadd.f32 %v5702_v18, %v7538_v56  ;;  %v7540_v22 = vld [vmem:[#allocation90_spill] sm:$0xff]  ;;  %v7542_v14 = vld [vmem:[#allocation92_spill] sm:$0xff]  ;;  %v7543_v61 = vld [vmem:[#allocation91_spill] sm:$0xff] }
 0x208   :  { %7534 = vst [vmem:[#allocation32_spill] sm:$0xff] %v6252_v45  ;;  %v6264_v51 = vadd.f32 %v7540_v22, %v7539_v17  ;;  %v6268_v6 = vadd.f32 %v7543_v61, %v7542_v14  ;;  %v7545_v20 = vld [vmem:[#allocation211_spill] sm:$0xff]  ;;  %v7547_v32 = vld [vmem:[#allocation212_spill] sm:$0xff]  ;;  %v7548_v45 = vld [vmem:[#allocation93_spill] sm:$0xff] }
 0x209   :  { %7537 = vst [vmem:[#allocation150_spill] sm:$0xff] %v6256_v54  ;;  %v6272_v3 = vadd.f32 %v5723_v5, %v7545_v20  ;;  %v6276_v25 = vadd.f32 %v7548_v45, %v7547_v32  ;;  %v7550_v48 = vld [vmem:[#allocation95_spill] sm:$0xff]  ;;  %v7551_v54 = vld [vmem:[#allocation94_spill] sm:$0xff]  ;;  %v7553_v56 = vld [vmem:[#allocation213_spill] sm:$0xff] }
 0x20a   :  { %7541 = vst [vmem:[#allocation33_spill] sm:$0xff] %v6264_v51  ;;  %7544 = vst [vmem:[#allocation151_spill] sm:$0xff] %v6268_v6  ;;  %v6280_v18 = vadd.f32 %v7551_v54, %v7550_v48  ;;  %v6284_v22 = vadd.f32 %v5744_v59, %v7553_v56  ;;  %v7555_v17 = vld [vmem:[#allocation214_spill] sm:$0xff]  ;;  %v7556_v51 = vld [vmem:[#allocation96_spill] sm:$0xff] }
 0x20b   :  { %7546 = vst [vmem:[#allocation34_spill] sm:$0xff] %v6272_v3  ;;  %7549 = vst [vmem:[#allocation152_spill] sm:$0xff] %v6276_v25  ;;  %v6288_v61 = vadd.f32 %v7556_v51, %v7555_v17  ;;  %v7558_v14 = vld [vmem:[#allocation98_spill] sm:$0xff]  ;;  %v7559_v6 = vld [vmem:[#allocation97_spill] sm:$0xff] }
 0x20c   :  { %7552 = vst [vmem:[#allocation35_spill] sm:$0xff] %v6280_v18  ;;  %7554 = vst [vmem:[#allocation153_spill] sm:$0xff] %v6284_v22  ;;  %v6292_v5 = vadd.f32 %v7559_v6, %v7558_v14  ;;  %v7560_v20 = vld [vmem:[#allocation215_spill] sm:$0xff]  ;;  %v7563_v32 = vld [vmem:[#allocation216_spill] sm:$0xff] }
 0x20d   :  { %7557 = vst [vmem:[#allocation36_spill] sm:$0xff] %v6288_v61  ;;  %v7561_v3 = vld [vmem:[#allocation99_spill] sm:$0xff]  ;;  %v7564_v25 = vld [vmem:[#allocation100_spill] sm:$0xff]  ;;  %v7565_v48 = vld [vmem:[#allocation217_spill] sm:$0xff] }
 0x20e   :  { %v6296_v45 = vadd.f32 %v7561_v3, %v7560_v20  ;;  %v6300_v54 = vadd.f32 %v7564_v25, %v7563_v32  ;;  %v7566_v18 = vld [vmem:[#allocation101_spill] sm:$0xff]  ;;  %v7567_v56 = vld [vmem:[#allocation218_spill] sm:$0xff]  ;;  %v7569_v17 = vld [vmem:[#allocation219_spill] sm:$0xff] }
 0x20f   :  { %v6304_v59 = vadd.f32 %v7566_v18, %v7565_v48  ;;  %v7568_v22 = vld [vmem:[#allocation102_spill] sm:$0xff]  ;;  %v7570_v61 = vld [vmem:[#allocation103_spill] sm:$0xff]  ;;  %v7571_v14 = vld [vmem:[#allocation220_spill] sm:$0xff] }
 0x210   :  { %7562 = vst [vmem:[#allocation154_spill] sm:$0xff] %v6296_v45  ;;  %v6308_v51 = vadd.f32 %v7568_v22, %v7567_v56  ;;  %v6312_v6 = vadd.f32 %v7570_v61, %v7569_v17  ;;  %v6316_v3 = vadd.f32 %v5800_v26, %v7571_v14  ;;  %v7572_v20 = vld [vmem:[#allocation221_spill] sm:$0xff]  ;;  %v7573_v45 = vld [vmem:[#allocation104_spill] sm:$0xff]  ;;  %v7574_v32 = vld [vmem:[#allocation106_spill] sm:$0xff] }
 0x211   :  { %v6320_v25 = vadd.f32 %v7573_v45, %v7572_v20  ;;  %v6324_v18 = vadd.f32 %v5814_v29, %v7574_v32  ;;  %v7575_v48 = vld [vmem:[#allocation107_spill] sm:$0xff]  ;;  %v7576_v56 = vld [vmem:[#allocation108_spill] sm:$0xff]  ;;  %v7577_v17 = vld [vmem:[#allocation222_spill] sm:$0xff] }
 0x212   :  { %v6328_v22 = vadd.f32 %v5818_v36, %v7575_v48  ;;  %v6332_v61 = vadd.f32 %v5826_v1, %v7576_v56  ;;  %v6336_v26 = vadd.f32 %v5834_v58, %v7577_v17  ;;  %v7578_v14 = vld [vmem:[#allocation223_spill] sm:$0xff]  ;;  %v7579_v20 = vld [vmem:[#allocation224_spill] sm:$0xff]  ;;  %v7580_v32 = vld [vmem:[#allocation225_spill] sm:$0xff] }
 0x213   :  { %v6340_v45 = vadd.f32 %v5842_v38, %v7578_v14  ;;  %v6344_v29 = vadd.f32 %v5850_v40, %v7579_v20  ;;  %v6348_v36 = vadd.f32 %v5858_v62, %v7580_v32  ;;  %v7581_v48 = vld [vmem:[#allocation226_spill] sm:$0xff]  ;;  %v7583_v56 = vld [vmem:[#allocation227_spill] sm:$0xff]  ;;  %v7585_v17 = vld [vmem:[#allocation228_spill] sm:$0xff] }
 0x214   :  { %v6352_v1 = vadd.f32 %v5866_v33, %v7581_v48  ;;  %v6356_v58 = vadd.f32 %v5874_v9, %v7583_v56  ;;  %v6360_v38 = vadd.f32 %v5882_v11, %v7585_v17  ;;  %v7587_v14 = vld [vmem:[#allocation229_spill] sm:$0xff]  ;;  %v7589_v20 = vld [vmem:[#allocation230_spill] sm:$0xff]  ;;  %v7591_v32 = vld [vmem:[#allocation231_spill] sm:$0xff] }
 0x215   :  { %v6364_v40 = vadd.f32 %v5890_v10, %v7587_v14  ;;  %v6368_v62 = vadd.f32 %v5898_v42, %v7589_v20  ;;  %v6372_v33 = vadd.f32 %v5906_v19, %v7591_v32  ;;  %v7593_v48 = vld [vmem:[#allocation232_spill] sm:$0xff]  ;;  %v7595_v56 = vld [vmem:[#allocation233_spill] sm:$0xff]  ;;  %v7597_v17 = vld [vmem:[#allocation234_spill] sm:$0xff] }
 0x216   :  { %7582 = vst [vmem:[#allocation37_spill] sm:$0xff] %v6352_v1  ;;  %7584 = vst [vmem:[#allocation155_spill] sm:$0xff] %v6356_v58  ;;  %v6376_v9 = vadd.f32 %v5914_v4, %v7593_v48  ;;  %v6380_v11 = vadd.f32 %v5922_v53, %v7595_v56  ;;  %v6384_v10 = vadd.f32 %v5930_v21, %v7597_v17  ;;  %v7599_v14 = vld [vmem:[#allocation235_spill] sm:$0xff]  ;;  %v7601_v20 = vld [vmem:[#allocation236_spill] sm:$0xff] }
 0x217   :  { %7586 = vst [vmem:[#allocation38_spill] sm:$0xff] %v6360_v38  ;;  %7588 = vst [vmem:[#allocation156_spill] sm:$0xff] %v6364_v40  ;;  %v6388_v42 = vadd.f32 %v5942_v8, %v7599_v14  ;;  %v6392_v19 = vadd.f32 %v5953_v0, %v7601_v20  ;;  %v7603_v32 = vld [vmem:[#allocation82_spill] sm:$0xff]  ;;  %v2002_v53 = vadd.f32 %v5886_v23, %v5822_v16  ;;  %v7605_v48 = vld [vmem:[#allocation105_spill] sm:$0xff] }
 0x218   :  { %7590 = vst [vmem:[#allocation39_spill] sm:$0xff] %v6368_v62  ;;  %7592 = vst [vmem:[#allocation157_spill] sm:$0xff] %v6372_v33  ;;  %v6396_v4 = vadd.f32 %v5968_v55, %v7603_v32  ;;  %v7606_v56 = vld [vmem:[#allocation83_spill] sm:$0xff]  ;;  %v7612_v20 = vld [vmem:[#allocation125_spill] sm:$0xff] }
 0x219   :  { %7594 = vst [vmem:[#allocation40_spill] sm:$0xff] %v6376_v9  ;;  %7596 = vst [vmem:[#allocation158_spill] sm:$0xff] %v6380_v11  ;;  %v2017_v11 = vadd.f32 %v7606_v56, %v7605_v48  ;;  %v7607_v21 = vld [vmem:[#allocation123_spill] sm:$0xff]  ;;  %v7609_v9 = vld [vmem:[#allocation124_spill] sm:$0xff]  ;;  %v2003_v48 = vadd.f32 %v2002_v53, %v5946_v24 }
 0x21a   :  { %7598 = vst [vmem:[#allocation41_spill] sm:$0xff] %v6384_v10  ;;  %7600 = vst [vmem:[#allocation159_spill] sm:$0xff] %v6388_v42  ;;  %v7608_v17 = vld [vmem:[#allocation111_spill] sm:$0xff]  ;;  %v7611_v42 = vld [vmem:[#allocation109_spill] sm:$0xff] }
 0x21b   :  { %7602 = vst [vmem:[#allocation42_spill] sm:$0xff] %v6392_v19  ;;  %7604 = vst [vmem:[#allocation160_spill] sm:$0xff] %v6396_v4  ;;  %v2032_v10 = vadd.f32 %v7608_v17, %v7607_v21  ;;  %v7610_v8 = vld [vmem:[#allocation127_spill] sm:$0xff]  ;;  %v2062_v0 = vadd.f32 %v5918_v28, %v7611_v42  ;;  %v2077_v19 = vadd.f32 %v5926_v2, %v7612_v20  ;;  %v7613_v55 = vld [vmem:[#allocation110_spill] sm:$0xff] }
 0x21c   :  { %v2047_v14 = vadd.f32 %v7610_v8, %v7609_v9  ;;  %v2092_v32 = vadd.f32 %v5934_v43, %v7613_v55  ;;  %v7614_v4 = vld [vmem:[#allocation126_spill] sm:$0xff]  ;;  %v7615_v16 = vld [vmem:[#allocation237_spill] sm:$0xff]  ;;  %v7616_v56 = vld [vmem:[#allocation112_spill] sm:$0xff] }
 0x21d   :  { %v2107_v23 = vadd.f32 %v7615_v16, %v7614_v4  ;;  %v2018_v33 = vadd.f32 %v2017_v11, %v7616_v56  ;;  %v7617_v21 = vld [vmem:[#allocation128_spill] sm:$0xff]  ;;  %v7618_v62 = vld [vmem:[#allocation11_spill] sm:$0xff]  ;;  %v7619_v8 = vld [vmem:[#allocation113_spill] sm:$0xff] }
 0x21e   :  { %v2033_v17 = vadd.f32 %v2032_v10, %v7617_v21  ;;  %v2048_v9 = vadd.f32 %v2047_v14, %v7618_v62  ;;  %v2063_v40 = vadd.f32 %v2062_v0, %v7619_v8  ;;  %v7620_v28 = vld [vmem:[#allocation129_spill] sm:$0xff]  ;;  %v7621_v38 = vld [vmem:[#allocation12_spill] sm:$0xff]  ;;  %v7622_v20 = vld [vmem:[#allocation114_spill] sm:$0xff] }
 0x21f   :  { %v2078_v42 = vadd.f32 %v2077_v19, %v7620_v28  ;;  %v2093_v2 = vadd.f32 %v2092_v32, %v7621_v38  ;;  %v2108_v58 = vadd.f32 %v2107_v23, %v7622_v20  ;;  %v7623_v43 = vld [vmem:[#allocation130_spill] sm:$0xff]  ;;  %v7624_v1 = vld [vmem:[#allocation13_spill] sm:$0xff]  ;;  %v7625_v16 = vld [vmem:[#allocation115_spill] sm:$0xff] }
 0x220   :  { %v2004_v55 = vadd.f32 %v2003_v48, %v7623_v43  ;;  %v2019_v4 = vadd.f32 %v2018_v33, %v7624_v1  ;;  %v2034_v24 = vadd.f32 %v2033_v17, %v7625_v16  ;;  %v7626_v53 = vld [vmem:[#allocation131_spill] sm:$0xff]  ;;  %v7627_v56 = vld [vmem:[#allocation14_spill] sm:$0xff]  ;;  %v7628_v21 = vld [vmem:[#allocation116_spill] sm:$0xff] }
 0x221   :  { %v2049_v11 = vadd.f32 %v2048_v9, %v7626_v53  ;;  %v2064_v10 = vadd.f32 %v2063_v40, %v7627_v56  ;;  %v2079_v62 = vadd.f32 %v2078_v42, %v7628_v21  ;;  %v7629_v14 = vld [vmem:[#allocation132_spill] sm:$0xff]  ;;  %v7630_v8 = vld [vmem:[#allocation15_spill] sm:$0xff]  ;;  %v7631_v28 = vld [vmem:[#allocation117_spill] sm:$0xff] }
 0x222   :  { %v2094_v0 = vadd.f32 %v2093_v2, %v7629_v14  ;;  %v2109_v19 = vadd.f32 %v2108_v58, %v7630_v8  ;;  %v2005_v38 = vadd.f32 %v2004_v55, %v7631_v28  ;;  %v7632_v32 = vld [vmem:[#allocation133_spill] sm:$0xff]  ;;  %v7633_v20 = vld [vmem:[#allocation16_spill] sm:$0xff]  ;;  %v7634_v43 = vld [vmem:[#allocation118_spill] sm:$0xff] }
 0x223   :  { %v2020_v23 = vadd.f32 %v2019_v4, %v7632_v32  ;;  %v2035_v48 = vadd.f32 %v2034_v24, %v7633_v20  ;;  %v2050_v1 = vadd.f32 %v2049_v11, %v7634_v43  ;;  %v7635_v33 = vld [vmem:[#allocation134_spill] sm:$0xff]  ;;  %v7636_v16 = vld [vmem:[#allocation17_spill] sm:$0xff]  ;;  %v7637_v53 = vld [vmem:[#allocation119_spill] sm:$0xff] }
 0x224   :  { %v2065_v17 = vadd.f32 %v2064_v10, %v7635_v33  ;;  %v2080_v9 = vadd.f32 %v2079_v62, %v7636_v16  ;;  %v2095_v40 = vadd.f32 %v2094_v0, %v7637_v53  ;;  %v7638_v56 = vld [vmem:[#allocation135_spill] sm:$0xff]  ;;  %v7639_v21 = vld [vmem:[#allocation18_spill] sm:$0xff]  ;;  %v7640_v14 = vld [vmem:[#allocation120_spill] sm:$0xff] }
 0x225   :  { %v2110_v42 = vadd.f32 %v2109_v19, %v7638_v56  ;;  %v2006_v2 = vadd.f32 %v2005_v38, %v7639_v21  ;;  %v2021_v58 = vadd.f32 %v2020_v23, %v7640_v14  ;;  %v7641_v8 = vld [vmem:[#allocation136_spill] sm:$0xff]  ;;  %v7642_v28 = vld [vmem:[#allocation19_spill] sm:$0xff]  ;;  %v7643_v32 = vld [vmem:[#allocation121_spill] sm:$0xff] }
 0x226   :  { %v2036_v55 = vadd.f32 %v2035_v48, %v7641_v8  ;;  %v2051_v4 = vadd.f32 %v2050_v1, %v7642_v28  ;;  %v2066_v24 = vadd.f32 %v2065_v17, %v7643_v32  ;;  %v7644_v20 = vld [vmem:[#allocation137_spill] sm:$0xff]  ;;  %v7645_v43 = vld [vmem:[#allocation20_spill] sm:$0xff]  ;;  %v7646_v33 = vld [vmem:[#allocation138_spill] sm:$0xff] }
 0x227   :  { %v2081_v11 = vadd.f32 %v2080_v9, %v7644_v20  ;;  %v2096_v10 = vadd.f32 %v2095_v40, %v7645_v43  ;;  %v2111_v62 = vadd.f32 %v2110_v42, %v7646_v33  ;;  %v7647_v16 = vld [vmem:[#allocation21_spill] sm:$0xff]  ;;  %v7648_v53 = vld [vmem:[#allocation122_spill] sm:$0xff]  ;;  %v7649_v56 = vld [vmem:[#allocation139_spill] sm:$0xff] }
 0x228   :  { %v2007_v0 = vadd.f32 %v2006_v2, %v7647_v16  ;;  %v2022_v19 = vadd.f32 %v2021_v58, %v7648_v53  ;;  %v2037_v38 = vadd.f32 %v2036_v55, %v7649_v56  ;;  %v7650_v21 = vld [vmem:[#allocation22_spill] sm:$0xff]  ;;  %v7651_v14 = vld [vmem:[#allocation140_spill] sm:$0xff]  ;;  %v7652_v8 = vld [vmem:[#allocation23_spill] sm:$0xff] }
 0x229   :  { %v2052_v23 = vadd.f32 %v2051_v4, %v7650_v21  ;;  %v2067_v48 = vadd.f32 %v2066_v24, %v7651_v14  ;;  %v2082_v1 = vadd.f32 %v2081_v11, %v7652_v8  ;;  %v7653_v28 = vld [vmem:[#allocation141_spill] sm:$0xff]  ;;  %v7654_v32 = vld [vmem:[#allocation24_spill] sm:$0xff]  ;;  %v7658_v16 = vld [vmem:[#allocation26_spill] sm:$0xff] }
 0x22a   :  { %v2097_v17 = vadd.f32 %v2096_v10, %v7653_v28  ;;  %v2112_v9 = vadd.f32 %v2111_v62, %v7654_v32  ;;  %v2008_v40 = vadd.f32 %v2007_v0, %v6112_v44  ;;  %v2023_v42 = vadd.f32 %v2022_v19, %v6116_v57  ;;  %v7655_v10 = vld [vmem:[#allocation142_spill] sm:$0xff]  ;;  %v7656_v33 = vld [vmem:[#allocation25_spill] sm:$0xff]  ;;  %v7657_v62 = vld [vmem:[#allocation143_spill] sm:$0xff] }
 0x22b   :  { %v2038_v2 = vadd.f32 %v2037_v38, %v6120_v31  ;;  %v2053_v58 = vadd.f32 %v2052_v23, %v6124_v46  ;;  %v2068_v55 = vadd.f32 %v2067_v48, %v6128_v41  ;;  %v2083_v4 = vadd.f32 %v2082_v1, %v6132_v37  ;;  %v7659_v0 = vld [vmem:[#allocation144_spill] sm:$0xff]  ;;  %v7660_v53 = vld [vmem:[#allocation27_spill] sm:$0xff]  ;;  %v7661_v19 = vld [vmem:[#allocation145_spill] sm:$0xff] }
 0x22c   :  { %v2098_v24 = vadd.f32 %v2097_v17, %v6136_v39  ;;  %v2113_v20 = vadd.f32 %v2112_v9, %v6140_v50  ;;  %v2009_v11 = vadd.f32 %v2008_v40, %v6144_v7  ;;  %v2024_v43 = vadd.f32 %v2023_v42, %v6148_v63  ;;  %v7662_v56 = vld [vmem:[#allocation28_spill] sm:$0xff]  ;;  %v7663_v21 = vld [vmem:[#allocation146_spill] sm:$0xff]  ;;  %v7664_v48 = vld [vmem:[#allocation29_spill] sm:$0xff] }
 0x22d   :  { %v2039_v44 = vadd.f32 %v2038_v2, %v6152_v52  ;;  %v2054_v57 = vadd.f32 %v2053_v58, %v6156_v47  ;;  %v2069_v31 = vadd.f32 %v2068_v55, %v6160_v13  ;;  %v2084_v46 = vadd.f32 %v2083_v4, %v7655_v10  ;;  %v7665_v8 = vld [vmem:[#allocation147_spill] sm:$0xff]  ;;  %v7666_v17 = vld [vmem:[#allocation30_spill] sm:$0xff]  ;;  %v7667_v32 = vld [vmem:[#allocation148_spill] sm:$0xff] }
 0x22e   :  { %v2099_v41 = vadd.f32 %v2098_v24, %v7656_v33  ;;  %v2114_v37 = vadd.f32 %v2113_v20, %v7657_v62  ;;  %v2010_v39 = vadd.f32 %v2009_v11, %v6176_v12  ;;  %v2025_v50 = vadd.f32 %v2024_v43, %v7658_v16  ;;  %v7668_v42 = vld [vmem:[#allocation31_spill] sm:$0xff]  ;;  %v7669_v2 = vld [vmem:[#allocation149_spill] sm:$0xff]  ;;  %v7670_v4 = vld [vmem:[#allocation32_spill] sm:$0xff] }
 0x22f   :  { %v2040_v7 = vadd.f32 %v2039_v44, %v7659_v0  ;;  %v2055_v63 = vadd.f32 %v2054_v57, %v6188_v34  ;;  %v2070_v52 = vadd.f32 %v2069_v31, %v7660_v53  ;;  %v2085_v47 = vadd.f32 %v2084_v46, %v7661_v19  ;;  %v7671_v24 = vld [vmem:[#allocation150_spill] sm:$0xff]  ;;  %v7672_v43 = vld [vmem:[#allocation33_spill] sm:$0xff]  ;;  %v7673_v44 = vld [vmem:[#allocation151_spill] sm:$0xff] }
 0x230   :  { %v2100_v13 = vadd.f32 %v2099_v41, %v6200_v60  ;;  %v2115_v38 = vadd.f32 %v2114_v37, %v7662_v56  ;;  %v2011_v23 = vadd.f32 %v2010_v39, %v7663_v21  ;;  %v2026_v14 = vadd.f32 %v2025_v50, %v6212_v15  ;;  %v7674_v31 = vld [vmem:[#allocation34_spill] sm:$0xff]  ;;  %v7675_v46 = vld [vmem:[#allocation152_spill] sm:$0xff]  ;;  %v7676_v33 = vld [vmem:[#allocation35_spill] sm:$0xff] }
 0x231   :  { %v2041_v12 = vadd.f32 %v2040_v7, %v7664_v48  ;;  %v2056_v1 = vadd.f32 %v2055_v63, %v7665_v8  ;;  %v2071_v28 = vadd.f32 %v2070_v52, %v6224_v49  ;;  %v2086_v34 = vadd.f32 %v2085_v47, %v7666_v17  ;;  %v7677_v62 = vld [vmem:[#allocation153_spill] sm:$0xff]  ;;  %v7678_v39 = vld [vmem:[#allocation36_spill] sm:$0xff]  ;;  %v7679_v50 = vld [vmem:[#allocation154_spill] sm:$0xff] }
 0x232   :  { %v2101_v9 = vadd.f32 %v2100_v13, %v7667_v32  ;;  %v2116_v40 = vadd.f32 %v2115_v38, %v6236_v35  ;;  %v2012_v60 = vadd.f32 %v2011_v23, %v7668_v42  ;;  %v2027_v58 = vadd.f32 %v2026_v14, %v7669_v2  ;;  %v7680_v38 = vld [vmem:[#allocation37_spill] sm:$0xff]  ;;  %v7681_v21 = vld [vmem:[#allocation155_spill] sm:$0xff]  ;;  %v7682_v23 = vld [vmem:[#allocation38_spill] sm:$0xff] }
 0x233   :  { %v2042_v55 = vadd.f32 %v2041_v12, %v6248_v27  ;;  %v2057_v15 = vadd.f32 %v2056_v1, %v7670_v4  ;;  %v2072_v20 = vadd.f32 %v2071_v28, %v7671_v24  ;;  %v2087_v11 = vadd.f32 %v2086_v34, %v6260_v30  ;;  %v7683_v14 = vld [vmem:[#allocation156_spill] sm:$0xff]  ;;  %v7684_v48 = vld [vmem:[#allocation39_spill] sm:$0xff]  ;;  %v7685_v12 = vld [vmem:[#allocation157_spill] sm:$0xff] }
 0x234   :  { %v2102_v49 = vadd.f32 %v2101_v9, %v7672_v43  ;;  %v2117_v57 = vadd.f32 %v2116_v40, %v7673_v44  ;;  %v2013_v10 = vadd.f32 %v2012_v60, %v7674_v31  ;;  %v2028_v35 = vadd.f32 %v2027_v58, %v7675_v46  ;;  %v7686_v8 = vld [vmem:[#allocation40_spill] sm:$0xff]  ;;  %v7687_v1 = vld [vmem:[#allocation158_spill] sm:$0xff]  ;;  %v7689_v28 = vld [vmem:[#allocation159_spill] sm:$0xff] }
 0x235   :  { %v2043_v41 = vadd.f32 %v2042_v55, %v7676_v33  ;;  %v2058_v37 = vadd.f32 %v2057_v15, %v7677_v62  ;;  %v2073_v27 = vadd.f32 %v2072_v20, %v7678_v39  ;;  %v2088_v16 = vadd.f32 %v2087_v11, %v6292_v5  ;;  %v7690_v34 = vld [vmem:[#allocation42_spill] sm:$0xff]  ;;  %v7691_v9 = vld [vmem:[#allocation160_spill] sm:$0xff] }
 0x236   :  { %v2103_v0 = vadd.f32 %v2102_v49, %v7679_v50  ;;  %v2118_v30 = vadd.f32 %v2117_v57, %v6300_v54  ;;  %v2014_v7 = vadd.f32 %v2013_v10, %v6304_v59  ;;  %v2029_v63 = vadd.f32 %v2028_v35, %v6308_v51 }
 0x237   :  { %v2044_v53 = vadd.f32 %v2043_v41, %v6312_v6  ;;  %v2059_v52 = vadd.f32 %v2058_v37, %v6316_v3  ;;  %v2074_v19 = vadd.f32 %v2073_v27, %v6320_v25  ;;  %v2089_v47 = vadd.f32 %v2088_v16, %v6324_v18 }
 0x238   :  { %v2104_v13 = vadd.f32 %v2103_v0, %v6328_v22  ;;  %v2119_v5 = vadd.f32 %v2118_v30, %v6332_v61  ;;  %v2015_v56 = vadd.f32 %v2014_v7, %v6336_v26  ;;  %v2030_v54 = vadd.f32 %v2029_v63, %v6340_v45 }
 0x239   :  { %v2045_v59 = vadd.f32 %v2044_v53, %v6344_v29  ;;  %v2060_v51 = vadd.f32 %v2059_v52, %v6348_v36  ;;  %v2075_v6 = vadd.f32 %v2074_v19, %v7680_v38  ;;  %v2090_v3 = vadd.f32 %v2089_v47, %v7681_v21  ;;  %v7688_v29 = vld [vmem:[#allocation41_spill] sm:$0xff] }
 0x23a   :  { %v2105_v25 = vadd.f32 %v2104_v13, %v7682_v23  ;;  %v2120_v18 = vadd.f32 %v2119_v5, %v7683_v14  ;;  %v2016_v22 = vadd.f32 %v2015_v56, %v7684_v48  ;;  %v2031_v61 = vadd.f32 %v2030_v54, %v7685_v12 }
 0x23b   :  { %v2046_v26 = vadd.f32 %v2045_v59, %v7686_v8  ;;  %v2061_v45 = vadd.f32 %v2060_v51, %v7687_v1  ;;  %v2076_v36 = vadd.f32 %v2075_v6, %v7688_v29  ;;  %v2091_v17 = vadd.f32 %v2090_v3, %v7689_v28 }
 0x23c   :  { %v2106_v32 = vadd.f32 %v2105_v25, %v7690_v34  ;;  %v2121_v40 = vadd.f32 %v2120_v18, %v7691_v9  ;;  %2130 = vst [vmem:[#allocation7] sm:$0xff] %v2016_v22  ;;  %2131 = vst [vmem:[#allocation7 + $0x8] sm:$0xff] %v2031_v61 }
 0x23d   :  { %2132 = vst [vmem:[#allocation7 + $0x10] sm:$0xff] %v2046_v26  ;;  %2133 = vst [vmem:[#allocation7 + $0x18] sm:$0xff] %v2061_v45 }
 0x23e   :  { %2134 = vst [vmem:[#allocation7 + $0x20] sm:$0xff] %v2076_v36  ;;  %2135 = vst [vmem:[#allocation7 + $0x28] sm:$0xff] %v2091_v17 }
 0x23f   :  { %2136 = vst [vmem:[#allocation7 + $0x30] sm:$0xff] %v2106_v32  ;;  %2137 = vst [vmem:[#allocation7 + $0x38] sm:$0xff] %v2121_v40 }
 0x240   :  { %3239 = shalt.err (!%p3236_p0)
}
 0x241   :  { %2147 = dma.vmem_to_hbm [thread:$0]  %s2145_s1, 1024, %s6531_s2, [#allocation4]  }
 0x242   :  { %3252 = dma.done.wait [#allocation4], 1024  }
 0x243   :  { %3253 = vsyncadd [#allocation4], 4294966272 }
 0x244   :  { %2151 = vsyncpa [#allocation3], 1 }
 0x245   :  { %2152 = vsyncpa [#allocation6], 1 }
 0x246   :  { %2153 = vsyncpa [#allocation4], 1 }

</bundles_post_ra>
